<compile_context>
chip_gen: v7x
topology: tpu7x:2x2x1
jax: 0.10.0
libtpu: 0.0.40
codegen_flags: <defaults>
</compile_context>

<pallas_src>
import functools

import jax
import jax.numpy as jnp
from jax.experimental import pallas as pl
from jax.experimental.pallas import tpu as pltpu

LATENT_DIM = 20
CONDITION_DIM = 10
COMBINED_DIM = LATENT_DIM + CONDITION_DIM   # 30
HIDDEN_DIM = 400
OUTPUT_DIM = 784                            # 28*28 MNIST reconstruction

# lane/sublane-friendly padded feature dims
COMBINED_PAD = 32                           # K of first matmul
HIDDEN_PAD = 512                            # 400 -> 512 (4*128)
OUTPUT_PAD = 896                            # 784 -> 896 (7*128)


def _choose_tile_b(batch):
    """Largest tile in {512,256,128,64} that still yields >= 2 grid steps
    (so the 'parallel' axis can shard across v7x's two TensorCores);
    falls back to 64 for tiny batches."""
    for t in (512, 256, 128, 64):
        if pl.cdiv(batch, t) >= 2:
            return t
    return 64


def decoder_kernel(x_ref, w1_ref, b1_ref, w2_ref, b2_ref, w3_ref, b3_ref,
                   out_ref):
    # h1 = relu(x @ W1 + b1)   -- x is [TILE_B, 32] bf16, W1 [32, 512] bf16
    h1 = (jnp.dot(x_ref[...], w1_ref[...], preferred_element_type=jnp.float32)
          + b1_ref[...])
    h1 = jnp.maximum(h1, 0.0).astype(jnp.bfloat16)

    # h2 = relu(h1 @ W2 + b2)
    h2 = (jnp.dot(h1, w2_ref[...], preferred_element_type=jnp.float32)
          + b2_ref[...])
    h2 = jnp.maximum(h2, 0.0).astype(jnp.bfloat16)

    # out = h2 @ W3 + b3   (f32 accumulation, store in out_ref.dtype)
    out = (jnp.dot(h2, w3_ref[...], preferred_element_type=jnp.float32)
           + b3_ref[...])
    out_ref[...] = out.astype(out_ref.dtype)


def init_params(key):
    """PyTorch nn.Linear-style init, weights stored as [in, out] in f32."""
    dims = [(COMBINED_DIM, HIDDEN_DIM), (HIDDEN_DIM, HIDDEN_DIM),
            (HIDDEN_DIM, OUTPUT_DIM)]
    params = []
    for fan_in, fan_out in dims:
        key, kw, kb = jax.random.split(key, 3)
        bound = 1.0 / (fan_in ** 0.5)
        w = jax.random.uniform(kw, (fan_in, fan_out), jnp.float32, -bound, bound)
        b = jax.random.uniform(kb, (1, fan_out), jnp.float32, -bound, bound)
        params.extend([w, b])
    return tuple(params)


def prepare_params(params_f32):
    """Zero-pad feature dims to lane/sublane-friendly sizes, cast weights to
    bf16 (MXU inputs); biases stay f32 (added to the f32 accumulator)."""
    w1, b1, w2, b2, w3, b3 = params_f32
    kp = COMBINED_PAD - COMBINED_DIM
    hp = HIDDEN_PAD - HIDDEN_DIM
    op = OUTPUT_PAD - OUTPUT_DIM

    w1p = jnp.pad(w1, ((0, kp), (0, hp))).astype(jnp.bfloat16)   # [32, 512]
    b1p = jnp.pad(b1, ((0, 0), (0, hp))).astype(jnp.float32)     # [1, 512]
    w2p = jnp.pad(w2, ((0, hp), (0, hp))).astype(jnp.bfloat16)   # [512, 512]
    b2p = jnp.pad(b2, ((0, 0), (0, hp))).astype(jnp.float32)     # [1, 512]
    w3p = jnp.pad(w3, ((0, hp), (0, op))).astype(jnp.bfloat16)   # [512, 896]
    b3p = jnp.pad(b3, ((0, 0), (0, op))).astype(jnp.float32)     # [1, 896]
    return (w1p, b1p, w2p, b2p, w3p, b3p)


def _decoder_forward_impl(z, c, packed, out_dtype):
    """Returns the padded (B_pad, OUTPUT_PAD) output slab (no post-slice)."""
    w1, b1, w2, b2, w3, b3 = packed
    B = z.shape[0]
    tile_b = _choose_tile_b(B)
    B_pad = pl.cdiv(B, tile_b) * tile_b

    # Concatenate + pad in the wrapper (cheap XLA ops on tiny tensors).
    x = jnp.concatenate([z, c], axis=1)
    x = jnp.pad(x, ((0, B_pad - B), (0, COMBINED_PAD - COMBINED_DIM)))
    x = x.astype(jnp.bfloat16)                     # [B_pad, 32]

    batch_map = lambda i: (i, 0)   # batch-tiled operands
    const_map = lambda i: (0, 0)   # VMEM-resident weights (DMA'd once)

    out_itemsize = jnp.dtype(out_dtype).itemsize
    flops = 2 * B_pad * (COMBINED_PAD * HIDDEN_PAD
                         + HIDDEN_PAD * HIDDEN_PAD
                         + HIDDEN_PAD * OUTPUT_PAD)
    bytes_accessed = (
        B_pad * COMBINED_PAD * 2                                  # x (bf16)
        + (COMBINED_PAD * HIDDEN_PAD + HIDDEN_PAD * HIDDEN_PAD
           + HIDDEN_PAD * OUTPUT_PAD) * 2                         # weights
        + (2 * HIDDEN_PAD + OUTPUT_PAD) * 4                       # biases
        + B_pad * OUTPUT_PAD * out_itemsize                       # output
    )

    out = pl.pallas_call(
        decoder_kernel,
        out_shape=jax.ShapeDtypeStruct((B_pad, OUTPUT_PAD), out_dtype),
        grid_spec=pltpu.PrefetchScalarGridSpec(
            num_scalar_prefetch=0,
            grid=(B_pad // tile_b,),
            in_specs=[
                pl.BlockSpec((tile_b, COMBINED_PAD), batch_map),
                pl.BlockSpec(w1.shape, const_map),
                pl.BlockSpec(b1.shape, const_map),
                pl.BlockSpec(w2.shape, const_map),
                pl.BlockSpec(b2.shape, const_map),
                pl.BlockSpec(w3.shape, const_map),
                pl.BlockSpec(b3.shape, const_map),
            ],
            out_specs=pl.BlockSpec((tile_b, OUTPUT_PAD), batch_map),
        ),
        compiler_params=pltpu.CompilerParams(
            dimension_semantics=("parallel",),
            vmem_limit_bytes=32 << 20,
        ),
        cost_estimate=pl.CostEstimate(
            flops=flops, transcendentals=0, bytes_accessed=bytes_accessed),
    )(x, w1, b1, w2, b2, w3, b3)
    return out


# Padded-output entry point: embedding callers should prefer this and consume
# the (B_pad, 896) slab directly (columns >= 784 and rows >= B are zero-derived
# padding) to avoid an extra full HBM read+write pass for the slice.
decoder_forward_padded = functools.partial(
    jax.jit, static_argnames="out_dtype")(_decoder_forward_impl)


@functools.partial(jax.jit, static_argnames="out_dtype")
def decoder_forward(z, c, packed, out_dtype=jnp.float32):
    out = _decoder_forward_impl(z, c, packed, out_dtype)
    B = z.shape[0]
    if out.shape[0] == B:
        return out[:, :OUTPUT_DIM]     # only the unavoidable column slice
    return out[:B, :OUTPUT_DIM]


def reference_forward_f32(z, c, params):
    w1, b1, w2, b2, w3, b3 = params
    x = jnp.concatenate([z, c], axis=1)
    h1 = jnp.maximum(x @ w1 + b1, 0.0)
    h2 = jnp.maximum(h1 @ w2 + b2, 0.0)
    return h2 @ w3 + b3


def reference_forward_bf16(z, c, params):
    """Mirrors kernel numerics: bf16 MXU inputs, f32 accumulation."""
    w1, b1, w2, b2, w3, b3 = params
    bf = jnp.bfloat16
    x = jnp.concatenate([z, c], axis=1).astype(bf)
    h1 = jnp.maximum(
        jnp.dot(x, w1.astype(bf), preferred_element_type=jnp.float32) + b1, 0.0)
    h2 = jnp.maximum(
        jnp.dot(h1.astype(bf), w2.astype(bf),
                preferred_element_type=jnp.float32) + b2, 0.0)
    return jnp.dot(h2.astype(bf), w3.astype(bf),
                   preferred_element_type=jnp.float32) + b3


if __name__ == "__main__":
    key = jax.random.PRNGKey(0)
    kp, kz, kc = jax.random.split(key, 3)

    params = init_params(kp)
    packed = prepare_params(params)

    # Main check: batch 200 -> pads to 256, TILE_B=128, 2-step parallel grid.
    BATCH = 200
    z = jax.random.normal(kz, (BATCH, LATENT_DIM), jnp.float32)
    c = jax.random.normal(kc, (BATCH, CONDITION_DIM), jnp.float32)

    out = decoder_forward(z, c, packed)
    out = jax.block_until_ready(out)
    assert out.shape == (BATCH, OUTPUT_DIM)

    ref_bf16 = reference_forward_bf16(z, c, params)
    assert jnp.allclose(out, ref_bf16, atol=2e-2, rtol=2e-2), \
        "mismatch vs bf16 reference"
    ref_f32 = reference_forward_f32(z, c, params)
    assert jnp.allclose(out, ref_f32, atol=0.15, rtol=0.1), \
        "mismatch vs f32 reference"

    # Secondary check: larger batch exercises TILE_B=256 and the bf16 output
    # path (halved HBM write stream for v6e-style deployments).
    BATCH2 = 512
    kz2, kc2 = jax.random.split(jax.random.PRNGKey(1))
    z2 = jax.random.normal(kz2, (BATCH2, LATENT_DIM), jnp.float32)
    c2 = jax.random.normal(kc2, (BATCH2, CONDITION_DIM), jnp.float32)
    out2 = decoder_forward(z2, c2, packed, out_dtype=jnp.bfloat16)
    out2 = jax.block_until_ready(out2)
    assert out2.shape == (BATCH2, OUTPUT_DIM)
    ref2 = reference_forward_bf16(z2, c2, params)
    assert jnp.allclose(out2.astype(jnp.float32), ref2, atol=6e-2, rtol=6e-2), \
        "mismatch vs bf16 reference (bf16 output path)"

    print("KERNEL_OK")
</pallas_src>

<mosaic_0001>
module attributes {stable_mosaic.version = 11 : i64} {
  func.func @decoder_kernel(%arg0: i32, %arg1: memref<128x32xbf16, #tpu.memory_space<vmem>>, %arg2: memref<32x512xbf16, #tpu.memory_space<vmem>>, %arg3: memref<1x512xf32, #tpu.memory_space<vmem>>, %arg4: memref<512x512xbf16, #tpu.memory_space<vmem>>, %arg5: memref<1x512xf32, #tpu.memory_space<vmem>>, %arg6: memref<512x896xbf16, #tpu.memory_space<vmem>>, %arg7: memref<1x896xf32, #tpu.memory_space<vmem>>, %arg8: memref<128x896xf32, #tpu.memory_space<vmem>>) attributes {dimension_semantics = [#tpu.dimension_semantics<parallel>], iteration_bounds = array<i64: 2>, scalar_prefetch = 0 : i64, scratch_operands = 0 : i64, tpu.core_type = #tpu.core_type<tc>, window_params = [{transform_indices = @transform_0, window_bounds = array<i64: 128, 32>}, {pipeline_mode = #tpu.pipeline_mode<synchronous>, transform_indices = @transform_1, window_bounds = array<i64: 32, 512>}, {pipeline_mode = #tpu.pipeline_mode<synchronous>, transform_indices = @transform_2, window_bounds = array<i64: 1, 512>}, {pipeline_mode = #tpu.pipeline_mode<synchronous>, transform_indices = @transform_3, window_bounds = array<i64: 512, 512>}, {pipeline_mode = #tpu.pipeline_mode<synchronous>, transform_indices = @transform_4, window_bounds = array<i64: 1, 512>}, {pipeline_mode = #tpu.pipeline_mode<synchronous>, transform_indices = @transform_5, window_bounds = array<i64: 512, 896>}, {pipeline_mode = #tpu.pipeline_mode<synchronous>, transform_indices = @transform_6, window_bounds = array<i64: 1, 896>}, {transform_indices = @transform_7, window_bounds = array<i64: 128, 896>}]} {
    %c0 = arith.constant 0 : index
    %c0_0 = arith.constant 0 : index
    %0 = vector.load %arg1[%c0, %c0_0] : memref<128x32xbf16, #tpu.memory_space<vmem>>, vector<128x32xbf16>
    %c0_1 = arith.constant 0 : index
    %c0_2 = arith.constant 0 : index
    %1 = vector.load %arg2[%c0_1, %c0_2] : memref<32x512xbf16, #tpu.memory_space<vmem>>, vector<32x512xbf16>
    %cst = arith.constant dense<0.000000e+00> : vector<128x512xf32>
    %2 = tpu.matmul %0, %1, %cst {dimension_numbers = #tpu.dot_dimension_numbers<[1], [0], [0], [1], [0, 0, 1, 1], [], []>} : vector<128x32xbf16>, vector<32x512xbf16>, vector<128x512xf32> -> vector<128x512xf32>
    %c0_3 = arith.constant 0 : index
    %c0_4 = arith.constant 0 : index
    %3 = vector.load %arg3[%c0_3, %c0_4] : memref<1x512xf32, #tpu.memory_space<vmem>>, vector<1x512xf32>
    %4 = vector.broadcast %3 : vector<1x512xf32> to vector<128x512xf32>
    %5 = arith.addf %2, %4 : vector<128x512xf32>
    %cst_5 = arith.constant 0.000000e+00 : f32
    %6 = vector.broadcast %cst_5 : f32 to vector<128x512xf32>
    %7 = arith.maximumf %5, %6 : vector<128x512xf32>
    %8 = arith.truncf %7 : vector<128x512xf32> to vector<128x512xbf16>
    %c0_6 = arith.constant 0 : index
    %c0_7 = arith.constant 0 : index
    %9 = vector.load %arg4[%c0_6, %c0_7] : memref<512x512xbf16, #tpu.memory_space<vmem>>, vector<512x512xbf16>
    %cst_8 = arith.constant dense<0.000000e+00> : vector<128x512xf32>
    %10 = tpu.matmul %8, %9, %cst_8 {dimension_numbers = #tpu.dot_dimension_numbers<[1], [0], [0], [1], [0, 0, 1, 1], [], []>} : vector<128x512xbf16>, vector<512x512xbf16>, vector<128x512xf32> -> vector<128x512xf32>
    %c0_9 = arith.constant 0 : index
    %c0_10 = arith.constant 0 : index
    %11 = vector.load %arg5[%c0_9, %c0_10] : memref<1x512xf32, #tpu.memory_space<vmem>>, vector<1x512xf32>
    %12 = vector.broadcast %11 : vector<1x512xf32> to vector<128x512xf32>
    %13 = arith.addf %10, %12 : vector<128x512xf32>
    %cst_11 = arith.constant 0.000000e+00 : f32
    %14 = vector.broadcast %cst_11 : f32 to vector<128x512xf32>
    %15 = arith.maximumf %13, %14 : vector<128x512xf32>
    %16 = arith.truncf %15 : vector<128x512xf32> to vector<128x512xbf16>
    %c0_12 = arith.constant 0 : index
    %c0_13 = arith.constant 0 : index
    %17 = vector.load %arg6[%c0_12, %c0_13] : memref<512x896xbf16, #tpu.memory_space<vmem>>, vector<512x896xbf16>
    %cst_14 = arith.constant dense<0.000000e+00> : vector<128x896xf32>
    %18 = tpu.matmul %16, %17, %cst_14 {dimension_numbers = #tpu.dot_dimension_numbers<[1], [0], [0], [1], [0, 0, 1, 1], [], []>} : vector<128x512xbf16>, vector<512x896xbf16>, vector<128x896xf32> -> vector<128x896xf32>
    %c0_15 = arith.constant 0 : index
    %c0_16 = arith.constant 0 : index
    %19 = vector.load %arg7[%c0_15, %c0_16] : memref<1x896xf32, #tpu.memory_space<vmem>>, vector<1x896xf32>
    %20 = vector.broadcast %19 : vector<1x896xf32> to vector<128x896xf32>
    %21 = arith.addf %18, %20 : vector<128x896xf32>
    %c0_17 = arith.constant 0 : index
    %c0_18 = arith.constant 0 : index
    %22 = vector.load %arg8[%c0_17, %c0_18] : memref<128x896xf32, #tpu.memory_space<vmem>>, vector<128x896xf32>
    tpu.vector_store %arg8[%c0_17, %c0_18], %21 {strides = array<i32>} : memref<128x896xf32, #tpu.memory_space<vmem>>, vector<128x896xf32>,
    return
  }
  func.func @transform_0(%arg0: i32) -> (i32, i32) {
    %c0_i32 = arith.constant 0 : i32
    %c0_i32_0 = arith.constant 0 : i32
    return %arg0, %c0_i32 : i32, i32
  }
  func.func @transform_1(%arg0: i32) -> (i32, i32) {
    %c0_i32 = arith.constant 0 : i32
    %c0_i32_0 = arith.constant 0 : i32
    %c0_i32_1 = arith.constant 0 : i32
    return %c0_i32, %c0_i32_0 : i32, i32
  }
  func.func @transform_2(%arg0: i32) -> (i32, i32) {
    %c0_i32 = arith.constant 0 : i32
    %c0_i32_0 = arith.constant 0 : i32
    %c0_i32_1 = arith.constant 0 : i32
    return %c0_i32, %c0_i32_0 : i32, i32
  }
  func.func @transform_3(%arg0: i32) -> (i32, i32) {
    %c0_i32 = arith.constant 0 : i32
    %c0_i32_0 = arith.constant 0 : i32
    %c0_i32_1 = arith.constant 0 : i32
    return %c0_i32, %c0_i32_0 : i32, i32
  }
  func.func @transform_4(%arg0: i32) -> (i32, i32) {
    %c0_i32 = arith.constant 0 : i32
    %c0_i32_0 = arith.constant 0 : i32
    %c0_i32_1 = arith.constant 0 : i32
    return %c0_i32, %c0_i32_0 : i32, i32
  }
  func.func @transform_5(%arg0: i32) -> (i32, i32) {
    %c0_i32 = arith.constant 0 : i32
    %c0_i32_0 = arith.constant 0 : i32
    %c0_i32_1 = arith.constant 0 : i32
    return %c0_i32, %c0_i32_0 : i32, i32
  }
  func.func @transform_6(%arg0: i32) -> (i32, i32) {
    %c0_i32 = arith.constant 0 : i32
    %c0_i32_0 = arith.constant 0 : i32
    %c0_i32_1 = arith.constant 0 : i32
    return %c0_i32, %c0_i32_0 : i32, i32
  }
  func.func @transform_7(%arg0: i32) -> (i32, i32) {
    %c0_i32 = arith.constant 0 : i32
    %c0_i32_0 = arith.constant 0 : i32
    return %arg0, %c0_i32 : i32, i32
  }
}

</mosaic_0001>

<bundles_post_ra>
// kernel: decoder_forward.1
= control target key start
LH: loop header
LB: loop body
LE: loop exit
PB: predicated region body
PF: predicated region fallthrough
CT: control target
= control target key end

     0   :  { %12 = vsyncpa [#allocation3], 0  ;;  %s7063_s0 = inlined_call_operand.vmem [shape: bf16[256,32], index: 0, kind: input, shape index: {}]   ;;  %s7064_s1 = inlined_call_operand.vmem [shape: bf16[32,512], index: 1, kind: input, shape index: {}]   ;;  %s7065_s2 = inlined_call_operand.vmem [shape: f32[1,512], index: 2, kind: input, shape index: {}]   ;;  %s7066_s3 = inlined_call_operand.hbm [shape: bf16[512,512], index: 3, kind: input, shape index: {}]   ;;  %s7067_s4 = inlined_call_operand.vmem [shape: f32[1,512], index: 4, kind: input, shape index: {}]   ;;  %s7068_s5 = inlined_call_operand.hbm [shape: bf16[512,896], index: 5, kind: input, shape index: {}]   ;;  %s7069_s6 = inlined_call_operand.vmem [shape: f32[1,896], index: 6, kind: input, shape index: {}]   ;;  %s7070_s7 = inlined_call_operand.vmem [shape: f32[256,896], index: 7, kind: output, shape index: {}]  }
   0x1   :  { %13 = vsyncpa [#allocation5], 0  ;;  %s6168_s24 = smov 0  }
   0x2 LB: > { %s6121_s25 = smov [#allocation2]   ;;  %s4635_s27 = sadd.s32 4294967295, %s6119_s24   ;;  %s6119_s24 = sphi %s6168_s24, %s19_s24  }
   0x3   : > { %s220_s26 = sshll.u32 %s6121_s25, 4  ;;  %p4637_p0 = scmp.ge.s32.totalorder %s6119_s24, 1  ;;  %s221_s26 = int_to_ptr.vmem [resolvable:$true] %s220_s26 }
   0x4   : > { %p202_p1 = scmp.lt.s32.totalorder %s6119_s24, 3  ;;  %p6182_p3 = scmp.eq.s32.totalorder %s4635_s27, 0 }
   0x5   : > { %s6122_s30 = smov [#allocation4]   ;;  %s6049_s12 = scalar_lea.hbm %s7066_s3, 16384 }
   0x6   : > { %p6176_p2 = pnand %p4637_p0, %p202_p1  ;;  %s236_s8 = sshll.u32 %s6122_s30, 4  ;;  %s6194_s8 = int_to_ptr.vmem [resolvable:$true] %s236_s8 }
   0x7   : > { %s7075_s29 = scalar_select %p6182_p3, 1, 0 }
   0x8   : > { %s7074_s28 = scalar_select %p6176_p2, 1, 0 }
   0x9   : > { %p5491_p4 = pneg %p6176_p2  ;;  %p6050_p6 = scmp.ne.s32.totalorder %s7066_s3, %s6049_s12 }
   0xa   : > { %p6056_p10 = scmp.lt.u32.totalorder %s6049_s12, %s7066_s3 }
   0xb   : > { %p6190_p5 = pnand %p6182_p3, %p5491_p4 }
   0xd   : > { %p6051_p7 = pneg %p6190_p5 }
   0xf   : > { %p6052_p8 = pnand %p6051_p7, %p6050_p6 }
  0x11   : > { %p6053_p9 = pneg %p6052_p8 }
  0x13   : > { %p6058_p11 = pnand %p6056_p10, %p6053_p9 }
  0x15   : > { %6061 = shalt.err (!%p6058_p11)
}
  0x16   : > { %s6062_s17 = scalar_lea.vmem %s221_s26, 16384  ;;  %p6070_p1 = scmp.lt.s32.totalorder %s221_s26, %s221_s26 }
  0x17   : > { %p6063_p12 = scmp.ne.s32.totalorder %s221_s26, %s6062_s17  ;;  %p6071_p4 = scmp.lt.s32.totalorder %s6062_s17, %s6062_s17 }
  0x19   : > { %p6065_p13 = pnand %p6063_p12, %p6051_p7  ;;  %p6072_p3 = por %p6071_p4, %p6070_p1 }
  0x1b   : > { %p6066_p0 = pneg %p6065_p13 }
  0x1d   : > { %p6073_p2 = pnand %p6072_p3, %p6066_p0 }
  0x1f   : > { %6076 = shalt.err (!%p6073_p2)
}
  0x20   : > { %s6123_s18 = smov 256   ;;  %s6124_s19 = smov 16  }
  0x21   : > { %5494 = dma.hbm_to_vmem [thread:$0]  (!%p6190_p5), %s7066_s3, 16384, %s221_s26, [#allocation3], %s6123_s18, %s6123_s18, %s6124_s19  }
  0x22   : > { %s6077_s25 = scalar_lea.hbm %s7068_s5, 28672 }
  0x23   : > { %p6078_p6 = scmp.ne.s32.totalorder %s7068_s5, %s6077_s25  ;;  %p6084_p8 = scmp.lt.u32.totalorder %s6077_s25, %s7068_s5 }
  0x25   : > { %p6080_p2 = pnand %p6078_p6, %p6051_p7 }
  0x27   : > { %p6081_p3 = pneg %p6080_p2 }
  0x29   : > { %p6086_p9 = pnand %p6084_p8, %p6081_p3 }
  0x2b   : > { %6089 = shalt.err (!%p6086_p9)
}
  0x2c   : > { %s6090_s26 = scalar_lea.vmem %s6194_s8, 28672  ;;  %p6098_p13 = scmp.lt.s32.totalorder %s6194_s8, %s6194_s8 }
  0x2d   : > { %p6091_p10 = scmp.ne.s32.totalorder %s6194_s8, %s6090_s26  ;;  %p6099_p0 = scmp.lt.s32.totalorder %s6090_s26, %s6090_s26 }
  0x2f   : > { %p6093_p11 = pnand %p6091_p10, %p6051_p7  ;;  %p6100_p1 = por %p6099_p0, %p6098_p13 }
  0x31   : > { %p6094_p12 = pneg %p6093_p11 }
  0x33   : > { %p6101_p4 = pnand %p6100_p1, %p6094_p12 }
  0x35   : > { %6104 = shalt.err (!%p6101_p4)
}
  0x36   : > { %s6125_s13 = smov 448   ;;  %s6126_s14 = smov 28  }
  0x37   : > { %5497 = dma.hbm_to_vmem [thread:$0]  (!%p6190_p5), %s7068_s5, 28672, %s6194_s8, [#allocation5], %s6125_s13, %s6125_s13, %s6126_s14  }
  0x38   : > { %p7077_p6 = scmp.ne.s32.totalorder %s7074_s28, 0 }
  0x39   : > { %p7078_p7 = scmp.ne.s32.totalorder (!%p7077_p6), %s7075_s29, 0 }
  0x3a   : > { %264 = sbr.rel (%p7077_p6) target bundleno = 1054 (0x41e), region = 48 }
  0x41   : > { %6110 = dma.done.wait (%p7078_p7), [#allocation3], 16384  }
  0x42   : > { %6112 = vsyncadd (%p7078_p7), [#allocation3], 4294950912 }
  0x43   : > { %6114 = dma.done.wait (%p7078_p7), [#allocation5], 28672  }
  0x44   : > { %6116 = vsyncadd (%p7078_p7), [#allocation5], 4294938624  ;;  %s4644_s9 = sshll.u32 %s4635_s27, 4  ;;  %v6127_v0 = vmov 0   ;;  %v5517_v1 = vld [vmem:[%s7064_s1 + $0x4] ss:$16 sps:$4 sm:$0xff]  }
  0x45   : > { %498 = vmatprep.mubr.bf16.mxu0 %v6127_v0  ;;  %p302_p5 = scmp.lt.s32.totalorder %s4644_s9, 31  ;;  %611 = vmatprep.mubr.bf16.mxu1 %v6127_v0  ;;  %v5519_v2 = vld [vmem:[%s7064_s1] ss:$16 sps:$4 sm:$0xff]   ;;  %v5520_v3 = vld [vmem:[%s7064_s1 + $0x24] ss:$16 sps:$4 sm:$0xff]   ;;  %vm441_vm0 = vcmask 261120  }
  0x46   : > { %466 = vmatprep.subr.bf16.mxu0 %v5517_v1  ;;  %v5522_v4 = vld [vmem:[%s7064_s1 + $0x20] ss:$16 sps:$4 sm:$0xff]   ;;  %v5530_v6 = vld [vmem:[%s7064_s1 + $0xc] ss:$16 sps:$4 sm:$0xff]   ;;  %v5532_v7 = vld [vmem:[%s7064_s1 + $0x8] ss:$16 sps:$4 sm:$0xff]  }
  0x47   : > { %s7080_s9 = smov (!%p302_p5, %s4644_s9), 31  ;;  %467 = vmatpush1.bf16.msra.mxu0 %v5519_v2  ;;  %579 = vmatprep.subr.bf16.mxu1 %v5530_v6  ;;  %v5534_v9 = vld [vmem:[%s7064_s1 + $0x2c] ss:$16 sps:$4 sm:$0xff]   ;;  %v5536_v10 = vld [vmem:[%s7064_s1 + $0x28] ss:$16 sps:$4 sm:$0xff]  }
  0x48   : > { %s4645_s28 = sshll.u32 %s7080_s9, 2  ;;  %468 = vmatprep.subr.bf16.mxu0 %v5520_v3  ;;  %580 = vmatpush1.bf16.msra.mxu1 %v5532_v7  ;;  %v5537_v11 = vld [vmem:[#allocation2] ss:$16 sps:$4 sm:$0xff]   ;;  %v5539_v12 = vld [vmem:[#allocation2 + $0x4] ss:$16 sps:$4 sm:$0xff]   ;;  %s5482_s19 = smul.u32 56, %s7080_s9 }
  0x49   : > { %s6269_s20 = scalar_lea.vmem %s7063_s0, %s4645_s28  ;;  %581 = vmatprep.subr.bf16.mxu1 %v5534_v9  ;;  %v5542_v13 = vld [vmem:[#allocation2 + $0xc] ss:$16 sps:$4 sm:$0xff]   ;;  %v5540_v14 = vld [vmem:[#allocation2 + $0x8] ss:$16 sps:$4 sm:$0xff]   ;;  %v5545_v15 = vld [vmem:[#allocation2 + $0x24] ss:$16 sps:$4 sm:$0xff]  }
  0x4a   : > { %v5523_v5 = vld [vmem:[%s6269_s20] sm:$0xff]   ;;  %v5524_v8 = vld [vmem:[%s6269_s20 + $0x8] sm:$0xff]   ;;  %v5525_v20 = vld [vmem:[%s6269_s20 + $0x10] sm:$0xff]   ;;  %s6780_s9 = scalar_lea.vmem %s7070_s7, %s5482_s19 }
  0x4b   : > { %469 = vmatpush1.bf16.msra.mxu0 %v5522_v4  ;;  %v5543_v16 = vld [vmem:[#allocation2 + $0x20] ss:$16 sps:$4 sm:$0xff]   ;;  %v5548_v17 = vld [vmem:[#allocation2 + $0x2c] ss:$16 sps:$4 sm:$0xff]   ;;  %v5551_v18 = vld [vmem:[#allocation2 + $0x44] ss:$16 sps:$4 sm:$0xff]  }
  0x4c   : > { %1578 = vmatprep.subr.bf16.mxu0 %v5539_v12  ;;  %582 = vmatpush1.bf16.msra.mxu1 %v5536_v10  ;;  %v5546_v19 = vld [vmem:[#allocation2 + $0x28] ss:$16 sps:$4 sm:$0xff]   ;;  %v5554_v21 = vld [vmem:[#allocation2 + $0x4c] ss:$16 sps:$4 sm:$0xff]   ;;  %v5549_v22 = vld [vmem:[#allocation2 + $0x40] ss:$16 sps:$4 sm:$0xff]  }
  0x4d   : > { %1804 = vmatprep.subr.bf16.mxu1 %v5542_v13  ;;  %v5557_v23 = vld [vmem:[#allocation2 + $0x64] ss:$16 sps:$4 sm:$0xff]   ;;  %v5552_v24 = vld [vmem:[#allocation2 + $0x48] ss:$16 sps:$4 sm:$0xff]   ;;  %v5560_v25 = vld [vmem:[#allocation2 + $0x6c] ss:$16 sps:$4 sm:$0xff]  }
  0x4e   : > { %4664 = vmatmul.mubr.msk.bf16.vlgmr.msra.gmra.mrb[0].mxu0 %vm441_vm0, %v5523_v5  ;;  %v5555_v26 = vld [vmem:[#allocation2 + $0x60] ss:$16 sps:$4 sm:$0xff]   ;;  %v5563_v27 = vld [vmem:[#allocation2 + $0x84] ss:$16 sps:$4 sm:$0xff]   ;;  %v5558_v28 = vld [vmem:[#allocation2 + $0x68] ss:$16 sps:$4 sm:$0xff]  }
  0x4f   : > { %508 = vmatprep.mubr.bf16.mxu0 %v6127_v0  ;;  %1579 = vmatpush1.bf16.msra.mxu0 %v5537_v11  ;;  %v5526_v29 = vld [vmem:[%s6269_s20 + $0x18] sm:$0xff]   ;;  %v5561_v31 = vld [vmem:[#allocation2 + $0x80] ss:$16 sps:$4 sm:$0xff]   ;;  %v5569_v32 = vld [vmem:[#allocation2 + $0xa4] ss:$16 sps:$4 sm:$0xff]  }
  0x50   : > { %1580 = vmatprep.subr.bf16.mxu0 %v5545_v15  ;;  %4672 = vmatmul.mubr.msk.bf16.vlgmr.msra.gmra.mrb[0].mxu1 %vm441_vm0, %v5523_v5  ;;  %v5566_v30 = vld [vmem:[#allocation2 + $0x8c] ss:$16 sps:$4 sm:$0xff]   ;;  %v5564_v33 = vld [vmem:[#allocation2 + $0x88] ss:$16 sps:$4 sm:$0xff]   ;;  %v5567_v35 = vld [vmem:[#allocation2 + $0xa0] ss:$16 sps:$4 sm:$0xff]  }
  0x51   : > { %621 = vmatprep.mubr.bf16.mxu1 %v6127_v0  ;;  %1805 = vmatpush1.bf16.msra.mxu1 %v5540_v14  ;;  %v5572_v34 = vld [vmem:[#allocation2 + $0xac] ss:$16 sps:$4 sm:$0xff]   ;;  %v5575_v36 = vld [vmem:[#allocation2 + $0xc4] ss:$16 sps:$4 sm:$0xff]   ;;  %v5570_v37 = vld [vmem:[#allocation2 + $0xa8] ss:$16 sps:$4 sm:$0xff]  }
  0x52   : > { %1806 = vmatprep.subr.bf16.mxu1 %v5548_v17  ;;  %v5527_v38 = vld [vmem:[%s6269_s20 + $0x20] sm:$0xff]   ;;  %v5578_v39 = vld [vmem:[#allocation2 + $0xcc] ss:$16 sps:$4 sm:$0xff]   ;;  %v5576_v42 = vld [vmem:[#allocation2 + $0xc8] ss:$16 sps:$4 sm:$0xff]  }
  0x53   : > { %1581 = vmatpush1.bf16.msra.mxu0 %v5543_v16  ;;  %v5573_v40 = vld [vmem:[#allocation2 + $0xc0] ss:$16 sps:$4 sm:$0xff]   ;;  %v5581_v41 = vld [vmem:[#allocation2 + $0xe4] ss:$16 sps:$4 sm:$0xff]   ;;  %v5584_v43 = vld [vmem:[#allocation2 + $0xec] ss:$16 sps:$4 sm:$0xff]  }
  0x54   : > { %1582 = vmatprep.subr.bf16.mxu0 %v5551_v18  ;;  %v5579_v44 = vld [vmem:[#allocation2 + $0xe0] ss:$16 sps:$4 sm:$0xff]   ;;  %v5587_v45 = vld [vmem:[#allocation2 + $0x104] ss:$16 sps:$4 sm:$0xff]   ;;  %v5582_v46 = vld [vmem:[#allocation2 + $0xe8] ss:$16 sps:$4 sm:$0xff]  }
  0x55   : > { %1807 = vmatpush1.bf16.msra.mxu1 %v5546_v19  ;;  %v5528_v47 = vld [vmem:[%s6269_s20 + $0x28] sm:$0xff]   ;;  %v5585_v49 = vld [vmem:[#allocation2 + $0x100] ss:$16 sps:$4 sm:$0xff]   ;;  %v5593_v50 = vld [vmem:[#allocation2 + $0x124] ss:$16 sps:$4 sm:$0xff]   ;;  %v341_v19 = vlaneseq }
  0x56   : > { %4665 = vmatmul.mubr.msk.bf16.gmra.mrb[4].mxu0 %vm441_vm0, %v5524_v8  ;;  %1808 = vmatprep.subr.bf16.mxu1 %v5554_v21  ;;  %v5590_v48 = vld [vmem:[#allocation2 + $0x10c] ss:$16 sps:$4 sm:$0xff]   ;;  %v5588_v51 = vld [vmem:[#allocation2 + $0x108] ss:$16 sps:$4 sm:$0xff]   ;;  %v5591_v52 = vld [vmem:[#allocation2 + $0x120] ss:$16 sps:$4 sm:$0xff]  }
  0x57   : > { %518 = vmatprep.mubr.bf16.mxu0 %v6127_v0  ;;  %1583 = vmatpush1.bf16.msra.mxu0 %v5549_v22  ;;  %v5596_v53 = vld [vmem:[#allocation2 + $0x12c] ss:$16 sps:$4 sm:$0xff]   ;;  %v5599_v54 = vld [vmem:[#allocation2 + $0x144] ss:$16 sps:$4 sm:$0xff]   ;;  %v5594_v55 = vld [vmem:[#allocation2 + $0x128] ss:$16 sps:$4 sm:$0xff]  }
  0x58   : > { %4673 = vmatmul.mubr.msk.bf16.gmra.mrb[4].mxu1 %vm441_vm0, %v5524_v8  ;;  %1584 = vmatprep.subr.bf16.mxu0 %v5557_v23  ;;  %v5529_v56 = vld [vmem:[%s6269_s20 + $0x30] sm:$0xff]   ;;  %v5602_v57 = vld [vmem:[#allocation2 + $0x14c] ss:$16 sps:$4 sm:$0xff]   ;;  %v5600_v60 = vld [vmem:[#allocation2 + $0x148] ss:$16 sps:$4 sm:$0xff]  }
  0x59   : > { %631 = vmatprep.mubr.bf16.mxu1 %v6127_v0  ;;  %1809 = vmatpush1.bf16.msra.mxu1 %v5552_v24  ;;  %v5597_v58 = vld [vmem:[#allocation2 + $0x140] ss:$16 sps:$4 sm:$0xff]   ;;  %v5605_v59 = vld [vmem:[#allocation2 + $0x164] ss:$16 sps:$4 sm:$0xff]   ;;  %v5608_v61 = vld [vmem:[#allocation2 + $0x16c] ss:$16 sps:$4 sm:$0xff]  }
  0x5a   : > { %1810 = vmatprep.subr.bf16.mxu1 %v5560_v25  ;;  %v5603_v62 = vld [vmem:[#allocation2 + $0x160] ss:$16 sps:$4 sm:$0xff]   ;;  %v5611_v63 = vld [vmem:[#allocation2 + $0x184] ss:$16 sps:$4 sm:$0xff]   ;;  %v5606_v1 = vld [vmem:[#allocation2 + $0x168] ss:$16 sps:$4 sm:$0xff]  }
  0x5b   : > { %1585 = vmatpush1.bf16.msra.mxu0 %v5555_v26  ;;  %v5533_v2 = vld [vmem:[%s6269_s20 + $0x38] sm:$0xff]   ;;  %v5609_v4 = vld [vmem:[#allocation2 + $0x180] ss:$16 sps:$4 sm:$0xff]   ;;  %v5617_v5 = vld [vmem:[#allocation2 + $0x1a4] ss:$16 sps:$4 sm:$0xff]  }
  0x5c   : > { %1586 = vmatprep.subr.bf16.mxu0 %v5563_v27  ;;  %v5614_v3 = vld [vmem:[#allocation2 + $0x18c] ss:$16 sps:$4 sm:$0xff]   ;;  %v5612_v6 = vld [vmem:[#allocation2 + $0x188] ss:$16 sps:$4 sm:$0xff]   ;;  %v5615_v8 = vld [vmem:[#allocation2 + $0x1a0] ss:$16 sps:$4 sm:$0xff]  }
  0x5d   : > { %1811 = vmatpush1.bf16.msra.mxu1 %v5558_v28  ;;  %v5620_v7 = vld [vmem:[#allocation2 + $0x1ac] ss:$16 sps:$4 sm:$0xff]   ;;  %v5618_v9 = vld [vmem:[#allocation2 + $0x1a8] ss:$16 sps:$4 sm:$0xff]   ;;  %v5623_v10 = vld [vmem:[#allocation2 + $0x1c4] ss:$16 sps:$4 sm:$0xff]  }
  0x5e   : > { %4666 = vmatmul.mubr.msk.bf16.gmra.mrb[8].mxu0 %vm441_vm0, %v5525_v20  ;;  %1812 = vmatprep.subr.bf16.mxu1 %v5566_v30  ;;  %v5626_v11 = vld [vmem:[#allocation2 + $0x1cc] ss:$16 sps:$4 sm:$0xff]   ;;  %v5621_v12 = vld [vmem:[#allocation2 + $0x1c0] ss:$16 sps:$4 sm:$0xff]   ;;  %v5624_v13 = vld [vmem:[#allocation2 + $0x1c8] ss:$16 sps:$4 sm:$0xff]  }
  0x5f   : > { %528 = vmatprep.mubr.bf16.mxu0 %v6127_v0  ;;  %1587 = vmatpush1.bf16.msra.mxu0 %v5561_v31  ;;  %v5629_v14 = vld [vmem:[#allocation2 + $0x1e4] ss:$16 sps:$4 sm:$0xff]   ;;  %v5632_v15 = vld [vmem:[#allocation2 + $0x1ec] ss:$16 sps:$4 sm:$0xff]   ;;  %v5627_v16 = vld [vmem:[#allocation2 + $0x1e0] ss:$16 sps:$4 sm:$0xff]  }
  0x60   : > { %4674 = vmatmul.mubr.msk.bf16.gmra.mrb[8].mxu1 %vm441_vm0, %v5525_v20  ;;  %1588 = vmatprep.subr.bf16.mxu0 %v5569_v32  ;;  %v5630_v17 = vld [vmem:[#allocation2 + $0x1e8] ss:$16 sps:$4 sm:$0xff]   ;;  %v5638_v18 = vld [vmem:[#allocation2 + $0x20c] ss:$16 sps:$4 sm:$0xff]   ;;  %v6327_v20 = vshrl.u32 %v341_v19, 7 }
  0x61   : > { %641 = vmatprep.mubr.bf16.mxu1 %v6127_v0  ;;  %1813 = vmatpush1.bf16.msra.mxu1 %v5564_v33  ;;  %v339_v22 = vld [vmem:[%s7065_s2] sm:$0xf]  ;;  %v5653_v19 = vld [vmem:[#allocation2 + $0x264] ss:$16 sps:$4 sm:$0xff]  }
  0x62   : > { %1814 = vmatprep.subr.bf16.mxu1 %v5572_v34  ;;  %v6330_v21 = vsub.s32 0, %v6327_v20  ;;  %v6336_v23 = vsub.s32 1, %v6327_v20  ;;  %v6348_v33 = vsub.s32 2, %v6327_v20 }
  0x63   : > { %1589 = vmatpush1.bf16.msra.mxu0 %v5567_v35  ;;  %v6352_v35 = vsub.s32 3, %v6327_v20 }
  0x64   : > { %1590 = vmatprep.subr.bf16.mxu0 %v5575_v36  ;;  %v6339_v24 = vrot.slane %v339_v22, %v6330_v21  ;;  %v6342_v25 = vrot.slane %v339_v22, %v6336_v23 }
  0x65   : > { %1815 = vmatpush1.bf16.msra.mxu1 %v5570_v37 }
  0x66   : > { %4667 = vmatmul.mubr.msk.bf16.gmra.mrb[12].mxu0 %vm441_vm0, %v5526_v29  ;;  %1816 = vmatprep.subr.bf16.mxu1 %v5578_v39 }
  0x67   : > { %538 = vmatprep.mubr.bf16.mxu0 %v6127_v0  ;;  %1591 = vmatpush1.bf16.msra.mxu0 %v5573_v40 }
  0x68   : > { %4675 = vmatmul.mubr.msk.bf16.gmra.mrb[12].mxu1 %vm441_vm0, %v5526_v29  ;;  %1592 = vmatprep.subr.bf16.mxu0 %v5581_v41  ;;  %v6355_v41 = vrot.slane %v339_v22, %v6348_v33 }
  0x69   : > { %651 = vmatprep.mubr.bf16.mxu1 %v6127_v0  ;;  %1817 = vmatpush1.bf16.msra.mxu1 %v5576_v42 }
  0x6a   : > { %1818 = vmatprep.subr.bf16.mxu1 %v5584_v43 }
  0x6b   : > { %1593 = vmatpush1.bf16.msra.mxu0 %v5579_v44  ;;  %v5633_v44 = vld [vmem:[#allocation2 + $0x200] ss:$16 sps:$4 sm:$0xff]  }
  0x6c   : > { %1594 = vmatprep.subr.bf16.mxu0 %v5587_v45  ;;  %v5636_v45 = vld [vmem:[#allocation2 + $0x208] ss:$16 sps:$4 sm:$0xff]  }
  0x6d   : > { %1819 = vmatpush1.bf16.msra.mxu1 %v5582_v46  ;;  %v6358_v46 = vrot.slane %v339_v22, %v6352_v35  ;;  %v5656_v22 = vld [vmem:[#allocation2 + $0x26c] ss:$16 sps:$4 sm:$0xff]  }
  0x6e   : > { %4668 = vmatmul.mubr.msk.bf16.gmra.mrb[16].mxu0 %vm441_vm0, %v5527_v38  ;;  %1820 = vmatprep.subr.bf16.mxu1 %v5590_v48 }
  0x6f   : > { %548 = vmatprep.mubr.bf16.mxu0 %v6127_v0  ;;  %1595 = vmatpush1.bf16.msra.mxu0 %v5585_v49  ;;  %v5641_v49 = vld [vmem:[#allocation2 + $0x224] ss:$16 sps:$4 sm:$0xff]  }
  0x70   : > { %4676 = vmatmul.mubr.msk.bf16.gmra.mrb[16].mxu1 %vm441_vm0, %v5527_v38  ;;  %1596 = vmatprep.subr.bf16.mxu0 %v5593_v50  ;;  %v5644_v50 = vld [vmem:[#allocation2 + $0x22c] ss:$16 sps:$4 sm:$0xff]  }
  0x71   : > { %661 = vmatprep.mubr.bf16.mxu1 %v6127_v0  ;;  %1821 = vmatpush1.bf16.msra.mxu1 %v5588_v51 }
  0x72   : > { %1822 = vmatprep.subr.bf16.mxu1 %v5596_v53 }
  0x73   : > { %1597 = vmatpush1.bf16.msra.mxu0 %v5591_v52 }
  0x74   : > { %1598 = vmatprep.subr.bf16.mxu0 %v5599_v54 }
  0x75   : > { %1823 = vmatpush1.bf16.msra.mxu1 %v5594_v55 }
  0x76   : > { %4669 = vmatmul.mubr.msk.bf16.gmra.mrb[20].mxu0 %vm441_vm0, %v5528_v47  ;;  %1824 = vmatprep.subr.bf16.mxu1 %v5602_v57 }
  0x77   : > { %558 = vmatprep.mubr.bf16.mxu0 %v6127_v0  ;;  %1599 = vmatpush1.bf16.msra.mxu0 %v5597_v58 }
  0x78   : > { %4677 = vmatmul.mubr.msk.bf16.gmra.mrb[20].mxu1 %vm441_vm0, %v5528_v47  ;;  %1600 = vmatprep.subr.bf16.mxu0 %v5605_v59 }
  0x79   : > { %671 = vmatprep.mubr.bf16.mxu1 %v6127_v0  ;;  %1825 = vmatpush1.bf16.msra.mxu1 %v5600_v60  ;;  %v5642_v60 = vld [vmem:[#allocation2 + $0x228] ss:$16 sps:$4 sm:$0xff]  }
  0x7a   : > { %1826 = vmatprep.subr.bf16.mxu1 %v5608_v61  ;;  %v5647_v61 = vld [vmem:[#allocation2 + $0x244] ss:$16 sps:$4 sm:$0xff]  }
  0x7b   : > { %1601 = vmatpush1.bf16.msra.mxu0 %v5603_v62 }
  0x7c   : > { %1602 = vmatprep.subr.bf16.mxu0 %v5611_v63 }
  0x7d   : > { %1827 = vmatpush1.bf16.msra.mxu1 %v5606_v1 }
  0x7e   : > { %4670 = vmatmul.mubr.msk.bf16.gmra.mrb[24].mxu0 %vm441_vm0, %v5529_v56  ;;  %1828 = vmatprep.subr.bf16.mxu1 %v5614_v3  ;;  %v5650_v3 = vld [vmem:[#allocation2 + $0x24c] ss:$16 sps:$4 sm:$0xff]  }
  0x7f   : > { %568 = vmatprep.mubr.bf16.mxu0 %v6127_v0  ;;  %1603 = vmatpush1.bf16.msra.mxu0 %v5609_v4 }
  0x80   : > { %4678 = vmatmul.mubr.msk.bf16.gmra.mrb[24].mxu1 %vm441_vm0, %v5529_v56  ;;  %1604 = vmatprep.subr.bf16.mxu0 %v5617_v5  ;;  %v5639_v56 = vld [vmem:[#allocation2 + $0x220] ss:$16 sps:$4 sm:$0xff]  }
  0x81   : > { %681 = vmatprep.mubr.bf16.mxu1 %v6127_v0  ;;  %1829 = vmatpush1.bf16.msra.mxu1 %v5612_v6  ;;  %v5635_v0 = vld [vmem:[#allocation2 + $0x204] ss:$16 sps:$4 sm:$0xff]  }
  0x82   : > { %1830 = vmatprep.subr.bf16.mxu1 %v5620_v7 }
  0x83   : > { %1605 = vmatpush1.bf16.msra.mxu0 %v5615_v8 }
  0x84   : > { %1606 = vmatprep.subr.bf16.mxu0 %v5623_v10 }
  0x85   : > { %1831 = vmatpush1.bf16.msra.mxu1 %v5618_v9 }
  0x86   : > { %4671 = vmatmul.mubr.msk.bf16.gmra.mrb[28].mxu0 %vm441_vm0, %v5533_v2  ;;  %1832 = vmatprep.subr.bf16.mxu1 %v5626_v11 }
  0x87   : > { %1607 = vmatpush1.bf16.msra.mxu0 %v5621_v12 }
  0x88   : > { %4679 = vmatmul.mubr.msk.bf16.gmra.mrb[28].mxu1 %vm441_vm0, %v5533_v2  ;;  %1608 = vmatprep.subr.bf16.mxu0 %v5629_v14 }
  0x89   : > { %1833 = vmatpush1.bf16.msra.mxu1 %v5624_v13 }
  0x8a   : > { %1834 = vmatprep.subr.bf16.mxu1 %v5632_v15  ;;  %v5645_v15 = vld [vmem:[#allocation2 + $0x240] ss:$16 sps:$4 sm:$0xff]  }
  0x8b   : > { %1609 = vmatpush1.bf16.msra.mxu0 %v5627_v16  ;;  %v5648_v16 = vld [vmem:[#allocation2 + $0x248] ss:$16 sps:$4 sm:$0xff]  }
  0x8c   : > { %1691 = vmatprep.subr.bf16.mxu0 %v5635_v0 }
  0x8d   : > { %1835 = vmatpush1.bf16.msra.mxu1 %v5630_v17 }
  0x8e   : > { %1917 = vmatprep.subr.bf16.mxu1 %v5638_v18 }
 0x121   : > { %v500_v26 = vpop.f32.mrb[0].mxu0 }
 0x122   : > { %v501_v27 = vadd.f32 %v500_v26, %v6339_v24  ;;  %v502_v28 = vpop.f32.mrb[1].mxu0 }
 0x123   : > { %v503_v29 = vadd.f32 %v502_v28, %v6342_v25  ;;  %v504_v30 = vpop.f32.mrb[2].mxu0  ;;  %v613_v53 = vpop.f32.mrb[0].mxu1 }
 0x124   : > { %v505_v31 = vadd.f32 %v504_v30, %v6339_v24  ;;  %v506_v32 = vpop.f32.mrb[3].mxu0  ;;  %v692_v36 = vmax.f32 %v501_v27, 0.0  ;;  %v614_v57 = vadd.f32 %v613_v53, %v6355_v41  ;;  %v615_v58 = vpop.f32.mrb[1].mxu1 }
 0x125   : > { %v507_v34 = vadd.f32 %v506_v32, %v6342_v25  ;;  %v693_v38 = vmax.f32 %v503_v29, 0.0  ;;  %v616_v62 = vadd.f32 %v615_v58, %v6358_v46  ;;  %v617_v63 = vpop.f32.mrb[2].mxu1 }
 0x126   : > { %v696_v37 = vmax.f32 %v505_v31, 0.0  ;;  %v694_v4 = vmax.f32 %v614_v57, 0.0  ;;  %v618_v5 = vadd.f32 %v617_v63, %v6355_v41  ;;  %v619_v6 = vpop.f32.mrb[3].mxu1 }
 0x127   : > { %v697_v39 = vmax.f32 %v507_v34, 0.0  ;;  %v695_v9 = vmax.f32 %v616_v62, 0.0  ;;  %v620_v10 = vadd.f32 %v619_v6, %v6358_v46  ;;  %v5651_v34 = vld [vmem:[#allocation2 + $0x260] ss:$16 sps:$4 sm:$0xff]  }
 0x128   : > { %v756_v40 = vpack.c.bf16 %v696_v37, %v692_v36  ;;  %v698_v12 = vmax.f32 %v618_v5, 0.0 }
 0x129   : > { %v757_v42 = vpack.c.bf16 %v697_v39, %v693_v38  ;;  %v510_v43 = vpop.f32.mrb[4].mxu0  ;;  %v699_v17 = vmax.f32 %v620_v10, 0.0  ;;  %v5654_v39 = vld [vmem:[#allocation2 + $0x268] ss:$16 sps:$4 sm:$0xff]   ;;  %v5663_v10 = vld [vmem:[#allocation2 + $0x2a0] ss:$16 sps:$4 sm:$0xff]  }
 0x12a   : > { %v511_v47 = vadd.f32 %v510_v43, %v6339_v24  ;;  %v512_v48 = vpop.f32.mrb[5].mxu0  ;;  %v6369_v26 = vpack.c.bf16 %v698_v12, %v694_v4 }
 0x12b   : > { %v513_v51 = vadd.f32 %v512_v48, %v6342_v25  ;;  %v514_v52 = vpop.f32.mrb[6].mxu0  ;;  %1610 = vmatprep.mubr.bf16.mxu0 %v757_v42  ;;  %1836 = vmatprep.mubr.bf16.mxu1 %v757_v42  ;;  %v6372_v29 = vpack.c.bf16 %v699_v17, %v695_v9  ;;  %v623_v30 = vpop.f32.mrb[4].mxu1 }
 0x12c   : > { %v515_v54 = vadd.f32 %v514_v52, %v6339_v24  ;;  %v516_v55 = vpop.f32.mrb[7].mxu0  ;;  %1611 = vmatmul.mubr.bf16.vlgmr.msra.gmra.mrb[32].mxu0 %v756_v40  ;;  %1837 = vmatmul.mubr.bf16.vlgmr.msra.gmra.mrb[32].mxu1 %v756_v40  ;;  %v700_v1 = vmax.f32 %v511_v47, 0.0  ;;  %v624_v36 = vadd.f32 %v623_v30, %v6355_v41  ;;  %v625_v37 = vpop.f32.mrb[5].mxu1  ;;  %v5659_v40 = vld [vmem:[#allocation2 + $0x284] ss:$16 sps:$4 sm:$0xff]  }
 0x12d   : > { %v517_v59 = vadd.f32 %v516_v55, %v6342_v25  ;;  %1692 = vmatpush1.bf16.msra.mxu0 %v5633_v44  ;;  %1918 = vmatpush1.bf16.msra.mxu1 %v5636_v45  ;;  %v701_v7 = vmax.f32 %v513_v51, 0.0  ;;  %v626_v42 = vadd.f32 %v625_v37, %v6358_v46  ;;  %v627_v43 = vpop.f32.mrb[6].mxu1  ;;  %v5662_v47 = vld [vmem:[#allocation2 + $0x28c] ss:$16 sps:$4 sm:$0xff]  }
 0x12e   : > { %v704_v2 = vmax.f32 %v515_v54, 0.0  ;;  %1693 = vmatprep.subr.bf16.mxu0 %v5641_v49  ;;  %1919 = vmatprep.subr.bf16.mxu1 %v5644_v50  ;;  %v702_v48 = vmax.f32 %v624_v36, 0.0  ;;  %v628_v49 = vadd.f32 %v627_v43, %v6355_v41  ;;  %v629_v50 = vpop.f32.mrb[7].mxu1 }
 0x12f   : > { %v705_v8 = vmax.f32 %v517_v59, 0.0  ;;  %v703_v53 = vmax.f32 %v626_v42, 0.0  ;;  %v630_v54 = vadd.f32 %v629_v50, %v6358_v46  ;;  %v5657_v59 = vld [vmem:[#allocation2 + $0x280] ss:$16 sps:$4 sm:$0xff]   ;;  %v5672_v42 = vld [vmem:[#allocation2 + $0x2c8] ss:$16 sps:$4 sm:$0xff]  }
 0x130   : > { %v760_v11 = vpack.c.bf16 %v704_v2, %v700_v1  ;;  %v5665_v1 = vld [vmem:[#allocation2 + $0x2a4] ss:$16 sps:$4 sm:$0xff]   ;;  %v5668_v2 = vld [vmem:[#allocation2 + $0x2ac] ss:$16 sps:$4 sm:$0xff]  }
 0x131   : > { %v761_v13 = vpack.c.bf16 %v705_v8, %v701_v7  ;;  %1694 = vmatpush1.bf16.msra.mxu0 %v5639_v56  ;;  %v520_v14 = vpop.f32.mrb[8].mxu0  ;;  %1920 = vmatpush1.bf16.msra.mxu1 %v5642_v60  ;;  %v706_v56 = vmax.f32 %v628_v49, 0.0  ;;  %v5660_v60 = vld [vmem:[#allocation2 + $0x288] ss:$16 sps:$4 sm:$0xff]  }
 0x132   : > { %v521_v0 = vadd.f32 %v520_v14, %v6339_v24  ;;  %v522_v18 = vpop.f32.mrb[9].mxu0  ;;  %1695 = vmatprep.subr.bf16.mxu0 %v5647_v61  ;;  %1921 = vmatprep.subr.bf16.mxu1 %v5650_v3  ;;  %v707_v61 = vmax.f32 %v630_v54, 0.0  ;;  %v5666_v14 = vld [vmem:[#allocation2 + $0x2a8] ss:$16 sps:$4 sm:$0xff]  }
 0x133   : > { %v523_v27 = vadd.f32 %v522_v18, %v6342_v25  ;;  %v524_v28 = vpop.f32.mrb[10].mxu0  ;;  %1620 = vmatprep.mubr.bf16.mxu0 %v761_v13  ;;  %1846 = vmatprep.mubr.bf16.mxu1 %v761_v13  ;;  %v6381_v3 = vpack.c.bf16 %v706_v56, %v702_v48  ;;  %v633_v7 = vpop.f32.mrb[8].mxu1  ;;  %v5680_v48 = vld [vmem:[#allocation2 + $0x2ec] ss:$16 sps:$4 sm:$0xff]   ;;  %v5675_v56 = vld [vmem:[#allocation2 + $0x2e0] ss:$16 sps:$4 sm:$0xff]  }
 0x134   : > { %v525_v31 = vadd.f32 %v524_v28, %v6339_v24  ;;  %v526_v32 = vpop.f32.mrb[11].mxu0  ;;  %1621 = vmatmul.mubr.bf16.gmra.mrb[36].mxu0 %v760_v11  ;;  %1847 = vmatmul.mubr.bf16.gmra.mrb[36].mxu1 %v760_v11  ;;  %v708_v44 = vmax.f32 %v521_v0, 0.0  ;;  %v6384_v6 = vpack.c.bf16 %v707_v61, %v703_v53  ;;  %v634_v11 = vadd.f32 %v633_v7, %v6355_v41  ;;  %v635_v12 = vpop.f32.mrb[9].mxu1  ;;  %v5683_v61 = vld [vmem:[#allocation2 + $0x304] ss:$16 sps:$4 sm:$0xff]  }
 0x135   : > { %v527_v38 = vadd.f32 %v526_v32, %v6342_v25  ;;  %1696 = vmatpush1.bf16.msra.mxu0 %v5645_v15  ;;  %1922 = vmatpush1.bf16.msra.mxu1 %v5648_v16  ;;  %v709_v51 = vmax.f32 %v523_v27, 0.0  ;;  %v5671_v15 = vld [vmem:[#allocation2 + $0x2c4] ss:$16 sps:$4 sm:$0xff]   ;;  %v636_v16 = vadd.f32 %v635_v12, %v6358_v46  ;;  %v637_v17 = vpop.f32.mrb[10].mxu1 }
 0x136   : > { %v712_v45 = vmax.f32 %v525_v31, 0.0  ;;  %1697 = vmatprep.subr.bf16.mxu0 %v5653_v19  ;;  %1923 = vmatprep.subr.bf16.mxu1 %v5656_v22  ;;  %v5674_v19 = vld [vmem:[#allocation2 + $0x2cc] ss:$16 sps:$4 sm:$0xff]   ;;  %v710_v22 = vmax.f32 %v634_v11, 0.0  ;;  %v638_v27 = vadd.f32 %v637_v17, %v6355_v41  ;;  %v639_v28 = vpop.f32.mrb[11].mxu1 }
 0x137   : > { %v713_v52 = vmax.f32 %v527_v38, 0.0  ;;  %v711_v32 = vmax.f32 %v636_v16, 0.0  ;;  %v5681_v17 = vld [vmem:[#allocation2 + $0x300] ss:$16 sps:$4 sm:$0xff]  }
 0x138   : > { %v764_v55 = vpack.c.bf16 %v712_v45, %v708_v44  ;;  %v714_v37 = vmax.f32 %v638_v27, 0.0  ;;  %v5689_v27 = vld [vmem:[#allocation2 + $0x324] ss:$16 sps:$4 sm:$0xff]  }
 0x139   : > { %v765_v57 = vpack.c.bf16 %v713_v52, %v709_v51  ;;  %1698 = vmatpush1.bf16.msra.mxu0 %v5651_v34  ;;  %v530_v58 = vpop.f32.mrb[12].mxu0  ;;  %1924 = vmatpush1.bf16.msra.mxu1 %v5654_v39  ;;  %v640_v34 = vadd.f32 %v639_v28, %v6358_v46  ;;  %v5692_v28 = vld [vmem:[#allocation2 + $0x32c] ss:$16 sps:$4 sm:$0xff]  }
 0x13a   : > { %v531_v62 = vadd.f32 %v530_v58, %v6339_v24  ;;  %v532_v63 = vpop.f32.mrb[13].mxu0  ;;  %1699 = vmatprep.subr.bf16.mxu0 %v5659_v40  ;;  %1925 = vmatprep.subr.bf16.mxu1 %v5662_v47  ;;  %v5669_v40 = vld [vmem:[#allocation2 + $0x2c0] ss:$16 sps:$4 sm:$0xff]   ;;  %v5677_v47 = vld [vmem:[#allocation2 + $0x2e4] ss:$16 sps:$4 sm:$0xff]   ;;  %v6393_v49 = vpack.c.bf16 %v714_v37, %v710_v22 }
 0x13b   : > { %v533_v4 = vadd.f32 %v532_v63, %v6342_v25  ;;  %v534_v5 = vpop.f32.mrb[14].mxu0  ;;  %1630 = vmatprep.mubr.bf16.mxu0 %v765_v57  ;;  %1856 = vmatprep.mubr.bf16.mxu1 %v765_v57  ;;  %v715_v43 = vmax.f32 %v640_v34, 0.0  ;;  %v643_v53 = vpop.f32.mrb[12].mxu1 }
 0x13c   : > { %v535_v8 = vadd.f32 %v534_v5, %v6339_v24  ;;  %v536_v9 = vpop.f32.mrb[15].mxu0  ;;  %1631 = vmatmul.mubr.bf16.gmra.mrb[40].mxu0 %v764_v55  ;;  %1857 = vmatmul.mubr.bf16.gmra.mrb[40].mxu1 %v764_v55  ;;  %v716_v0 = vmax.f32 %v531_v62, 0.0  ;;  %v644_v57 = vadd.f32 %v643_v53, %v6355_v41  ;;  %v645_v58 = vpop.f32.mrb[13].mxu1  ;;  %v5698_v53 = vld [vmem:[#allocation2 + $0x34c] ss:$16 sps:$4 sm:$0xff]  }
 0x13d   : > { %v537_v13 = vadd.f32 %v536_v9, %v6342_v25  ;;  %1700 = vmatpush1.bf16.msra.mxu0 %v5657_v59  ;;  %1926 = vmatpush1.bf16.msra.mxu1 %v5660_v60  ;;  %v717_v30 = vmax.f32 %v533_v4, 0.0  ;;  %v6396_v52 = vpack.c.bf16 %v715_v43, %v711_v32  ;;  %v5678_v60 = vld [vmem:[#allocation2 + $0x2e8] ss:$16 sps:$4 sm:$0xff]   ;;  %v646_v62 = vadd.f32 %v645_v58, %v6358_v46  ;;  %v647_v63 = vpop.f32.mrb[14].mxu1  ;;  %v5686_v4 = vld [vmem:[#allocation2 + $0x30c] ss:$16 sps:$4 sm:$0xff]  }
 0x13e   : > { %v720_v18 = vmax.f32 %v535_v8, 0.0  ;;  %1701 = vmatprep.subr.bf16.mxu0 %v5665_v1  ;;  %1927 = vmatprep.subr.bf16.mxu1 %v5668_v2  ;;  %v718_v5 = vmax.f32 %v644_v57, 0.0  ;;  %v648_v7 = vadd.f32 %v647_v63, %v6355_v41  ;;  %v649_v8 = vpop.f32.mrb[15].mxu1 }
 0x13f   : > { %v721_v31 = vmax.f32 %v537_v13, 0.0  ;;  %v719_v11 = vmax.f32 %v646_v62, 0.0  ;;  %v650_v12 = vadd.f32 %v649_v8, %v6358_v46 }
 0x140   : > { %v768_v36 = vpack.c.bf16 %v720_v18, %v716_v0  ;;  %v5684_v0 = vld [vmem:[#allocation2 + $0x308] ss:$16 sps:$4 sm:$0xff]  }
 0x141   : > { %v769_v38 = vpack.c.bf16 %v721_v31, %v717_v30  ;;  %1702 = vmatpush1.bf16.msra.mxu0 %v5663_v10  ;;  %v540_v39 = vpop.f32.mrb[16].mxu0  ;;  %1928 = vmatpush1.bf16.msra.mxu1 %v5666_v14  ;;  %v722_v14 = vmax.f32 %v648_v7, 0.0  ;;  %v723_v18 = vmax.f32 %v650_v12, 0.0 }
 0x142   : > { %v541_v44 = vadd.f32 %v540_v39, %v6339_v24  ;;  %v542_v45 = vpop.f32.mrb[17].mxu0  ;;  %1703 = vmatprep.subr.bf16.mxu0 %v5671_v15  ;;  %1929 = vmatprep.subr.bf16.mxu1 %v5674_v19  ;;  %v5687_v39 = vld [vmem:[#allocation2 + $0x320] ss:$16 sps:$4 sm:$0xff]  }
 0x143   : > { %v543_v50 = vadd.f32 %v542_v45, %v6342_v25  ;;  %v544_v51 = vpop.f32.mrb[18].mxu0  ;;  %1640 = vmatprep.mubr.bf16.mxu0 %v769_v38  ;;  %1866 = vmatprep.mubr.bf16.mxu1 %v769_v38  ;;  %v6405_v30 = vpack.c.bf16 %v722_v14, %v718_v5  ;;  %v6408_v34 = vpack.c.bf16 %v723_v18, %v719_v11  ;;  %v5695_v45 = vld [vmem:[#allocation2 + $0x344] ss:$16 sps:$4 sm:$0xff]  }
 0x144   : > { %v545_v54 = vadd.f32 %v544_v51, %v6339_v24  ;;  %v546_v55 = vpop.f32.mrb[19].mxu0  ;;  %1641 = vmatmul.mubr.bf16.gmra.mrb[44].mxu0 %v768_v36  ;;  %1867 = vmatmul.mubr.bf16.gmra.mrb[44].mxu1 %v768_v36  ;;  %v724_v1 = vmax.f32 %v541_v44, 0.0  ;;  %v653_v36 = vpop.f32.mrb[16].mxu1  ;;  %v5690_v44 = vld [vmem:[#allocation2 + $0x328] ss:$16 sps:$4 sm:$0xff]  }
 0x145   : > { %v547_v59 = vadd.f32 %v546_v55, %v6342_v25  ;;  %1704 = vmatpush1.bf16.msra.mxu0 %v5669_v40  ;;  %1930 = vmatpush1.bf16.msra.mxu1 %v5672_v42  ;;  %v725_v9 = vmax.f32 %v543_v50, 0.0  ;;  %v654_v40 = vadd.f32 %v653_v36, %v6355_v41  ;;  %v655_v42 = vpop.f32.mrb[17].mxu1 }
 0x146   : > { %v728_v2 = vmax.f32 %v545_v54, 0.0  ;;  %1705 = vmatprep.subr.bf16.mxu0 %v5677_v47  ;;  %1931 = vmatprep.subr.bf16.mxu1 %v5680_v48  ;;  %v656_v47 = vadd.f32 %v655_v42, %v6358_v46  ;;  %v657_v48 = vpop.f32.mrb[18].mxu1 }
 0x147   : > { %v729_v10 = vmax.f32 %v547_v59, 0.0  ;;  %v726_v54 = vmax.f32 %v654_v40, 0.0  ;;  %v658_v55 = vadd.f32 %v657_v48, %v6355_v41 }
 0x148   : > { %v772_v13 = vpack.c.bf16 %v728_v2, %v724_v1  ;;  %v727_v59 = vmax.f32 %v656_v47, 0.0  ;;  %v5693_v2 = vld [vmem:[#allocation2 + $0x340] ss:$16 sps:$4 sm:$0xff]  }
 0x149   : > { %v773_v15 = vpack.c.bf16 %v729_v10, %v725_v9  ;;  %1706 = vmatpush1.bf16.msra.mxu0 %v5675_v56  ;;  %v550_v16 = vpop.f32.mrb[20].mxu0  ;;  %1932 = vmatpush1.bf16.msra.mxu1 %v5678_v60  ;;  %v659_v56 = vpop.f32.mrb[19].mxu1  ;;  %v730_v62 = vmax.f32 %v658_v55, 0.0  ;;  %v5701_v9 = vld [vmem:[#allocation2 + $0x364] ss:$16 sps:$4 sm:$0xff]  }
 0x14a   : > { %v551_v19 = vadd.f32 %v550_v16, %v6339_v24  ;;  %v552_v22 = vpop.f32.mrb[21].mxu0  ;;  %1707 = vmatprep.subr.bf16.mxu0 %v5683_v61  ;;  %1933 = vmatprep.subr.bf16.mxu1 %v5686_v4  ;;  %v660_v60 = vadd.f32 %v659_v56, %v6358_v46  ;;  %v5696_v4 = vld [vmem:[#allocation2 + $0x348] ss:$16 sps:$4 sm:$0xff]   ;;  %v5704_v10 = vld [vmem:[#allocation2 + $0x36c] ss:$16 sps:$4 sm:$0xff]  }
 0x14b   : > { %v553_v31 = vadd.f32 %v552_v22, %v6342_v25  ;;  %v554_v32 = vpop.f32.mrb[22].mxu0  ;;  %1650 = vmatprep.mubr.bf16.mxu0 %v773_v15  ;;  %1876 = vmatprep.mubr.bf16.mxu1 %v773_v15  ;;  %v6417_v11 = vpack.c.bf16 %v730_v62, %v726_v54  ;;  %v663_v15 = vpop.f32.mrb[20].mxu1  ;;  %v5705_v54 = vld [vmem:[#allocation2 + $0x380] ss:$16 sps:$4 sm:$0xff]   ;;  %v5708_v55 = vld [vmem:[#allocation2 + $0x388] ss:$16 sps:$4 sm:$0xff]  }
 0x14c   : > { %v555_v37 = vadd.f32 %v554_v32, %v6339_v24  ;;  %v556_v38 = vpop.f32.mrb[23].mxu0  ;;  %1651 = vmatmul.mubr.bf16.gmra.mrb[48].mxu0 %v772_v13  ;;  %1877 = vmatmul.mubr.bf16.gmra.mrb[48].mxu1 %v772_v13  ;;  %v732_v50 = vmax.f32 %v551_v19, 0.0  ;;  %v731_v5 = vmax.f32 %v660_v60, 0.0  ;;  %v664_v18 = vadd.f32 %v663_v15, %v6355_v41  ;;  %v665_v19 = vpop.f32.mrb[21].mxu1  ;;  %v5716_v60 = vld [vmem:[#allocation2 + $0x3ac] ss:$16 sps:$4 sm:$0xff]  }
 0x14d   : > { %v557_v43 = vadd.f32 %v556_v38, %v6342_v25  ;;  %1708 = vmatpush1.bf16.msra.mxu0 %v5681_v17  ;;  %1934 = vmatpush1.bf16.msra.mxu1 %v5684_v0  ;;  %v733_v57 = vmax.f32 %v553_v31, 0.0  ;;  %v5699_v0 = vld [vmem:[#allocation2 + $0x360] ss:$16 sps:$4 sm:$0xff]   ;;  %v666_v31 = vadd.f32 %v665_v19, %v6358_v46  ;;  %v667_v32 = vpop.f32.mrb[22].mxu1  ;;  %v5710_v38 = vld [vmem:[#allocation2 + $0x38c] ss:$16 sps:$4 sm:$0xff]  }
 0x14e   : > { %v736_v51 = vmax.f32 %v555_v37, 0.0  ;;  %1709 = vmatprep.subr.bf16.mxu0 %v5689_v27  ;;  %1935 = vmatprep.subr.bf16.mxu1 %v5692_v28  ;;  %v6420_v14 = vpack.c.bf16 %v731_v5, %v727_v59  ;;  %v5702_v27 = vld [vmem:[#allocation2 + $0x368] ss:$16 sps:$4 sm:$0xff]   ;;  %v5707_v28 = vld [vmem:[#allocation2 + $0x384] ss:$16 sps:$4 sm:$0xff]   ;;  %v668_v40 = vadd.f32 %v667_v32, %v6355_v41  ;;  %v669_v42 = vpop.f32.mrb[23].mxu1 }
 0x14f   : > { %v737_v58 = vmax.f32 %v557_v43, 0.0  ;;  %v670_v47 = vadd.f32 %v669_v42, %v6358_v46  ;;  %v5713_v59 = vld [vmem:[#allocation2 + $0x3a4] ss:$16 sps:$4 sm:$0xff]  }
 0x150   : > { %v776_v61 = vpack.c.bf16 %v736_v51, %v732_v50  ;;  %v738_v50 = vmax.f32 %v668_v40, 0.0  ;;  %v5725_v42 = vld [vmem:[#allocation2 + $0x3e4] ss:$16 sps:$4 sm:$0xff]  }
 0x151   : > { %v777_v63 = vpack.c.bf16 %v737_v58, %v733_v57  ;;  %1710 = vmatpush1.bf16.msra.mxu0 %v5687_v39  ;;  %v560_v1 = vpop.f32.mrb[24].mxu0  ;;  %1936 = vmatpush1.bf16.msra.mxu1 %v5690_v44  ;;  %v734_v39 = vmax.f32 %v664_v18, 0.0  ;;  %v739_v56 = vmax.f32 %v670_v47, 0.0 }
 0x152   : > { %v561_v7 = vadd.f32 %v560_v1, %v6339_v24  ;;  %v562_v8 = vpop.f32.mrb[25].mxu0  ;;  %1711 = vmatprep.subr.bf16.mxu0 %v5695_v45  ;;  %1937 = vmatprep.subr.bf16.mxu1 %v5698_v53  ;;  %v735_v45 = vmax.f32 %v666_v31, 0.0 }
 0x153   : > { %v563_v12 = vadd.f32 %v562_v8, %v6342_v25  ;;  %v564_v13 = vpop.f32.mrb[26].mxu0  ;;  %1660 = vmatprep.mubr.bf16.mxu0 %v777_v63  ;;  %1886 = vmatprep.mubr.bf16.mxu1 %v777_v63 }
 0x154   : > { %v565_v16 = vadd.f32 %v564_v13, %v6339_v24  ;;  %v566_v17 = vpop.f32.mrb[27].mxu0  ;;  %1661 = vmatmul.mubr.bf16.gmra.mrb[52].mxu0 %v776_v61  ;;  %1887 = vmatmul.mubr.bf16.gmra.mrb[52].mxu1 %v776_v61  ;;  %v740_v36 = vmax.f32 %v561_v7, 0.0  ;;  %v6429_v61 = vpack.c.bf16 %v738_v50, %v734_v39  ;;  %v6432_v1 = vpack.c.bf16 %v739_v56, %v735_v45  ;;  %v5711_v7 = vld [vmem:[#allocation2 + $0x3a0] ss:$16 sps:$4 sm:$0xff]   ;;  %v5719_v13 = vld [vmem:[#allocation2 + $0x3c4] ss:$16 sps:$4 sm:$0xff]  }
 0x155   : > { %v567_v22 = vadd.f32 %v566_v17, %v6342_v25  ;;  %1712 = vmatpush1.bf16.msra.mxu0 %v5693_v2  ;;  %1938 = vmatpush1.bf16.msra.mxu1 %v5696_v4  ;;  %v741_v43 = vmax.f32 %v563_v12, 0.0  ;;  %v673_v2 = vpop.f32.mrb[24].mxu1  ;;  %v5714_v12 = vld [vmem:[#allocation2 + $0x3a8] ss:$16 sps:$4 sm:$0xff]  }
 0x156   : > { %v744_v37 = vmax.f32 %v565_v16, 0.0  ;;  %1713 = vmatprep.subr.bf16.mxu0 %v5701_v9  ;;  %1939 = vmatprep.subr.bf16.mxu1 %v5704_v10  ;;  %v674_v8 = vadd.f32 %v673_v2, %v6355_v41  ;;  %v675_v9 = vpop.f32.mrb[25].mxu1  ;;  %v5720_v39 = vld [vmem:[#allocation2 + $0x3c8] ss:$16 sps:$4 sm:$0xff]  }
 0x157   : > { %v745_v44 = vmax.f32 %v567_v22, 0.0  ;;  %v676_v15 = vadd.f32 %v675_v9, %v6358_v46  ;;  %v677_v16 = vpop.f32.mrb[26].mxu1  ;;  %v5737_v9 = vld [vmem:[#allocation4 + $0x44] ss:$28 sps:$4 sm:$0xff]  }
 0x158   : > { %v780_v48 = vpack.c.bf16 %v744_v37, %v740_v36  ;;  %v742_v18 = vmax.f32 %v674_v8, 0.0  ;;  %v678_v19 = vadd.f32 %v677_v16, %v6355_v41  ;;  %v679_v22 = vpop.f32.mrb[27].mxu1  ;;  %v5732_v8 = vld [vmem:[#allocation4] ss:$28 sps:$4 sm:$0xff]   ;;  %v5744_v16 = vld [vmem:[#allocation4 + $0x70] ss:$28 sps:$4 sm:$0xff]  }
 0x159   : > { %v781_v51 = vpack.c.bf16 %v745_v44, %v741_v43  ;;  %1714 = vmatpush1.bf16.msra.mxu0 %v5699_v0  ;;  %v570_v53 = vpop.f32.mrb[28].mxu0  ;;  %1940 = vmatpush1.bf16.msra.mxu1 %v5702_v27  ;;  %v743_v31 = vmax.f32 %v676_v15, 0.0  ;;  %v5728_v44 = vld [vmem:[#allocation2 + $0x3ec] ss:$16 sps:$4 sm:$0xff]   ;;  %v5741_v15 = vld [vmem:[#allocation4 + $0x78] ss:$28 sps:$4 sm:$0xff]  }
 0x15a   : > { %v571_v57 = vadd.f32 %v570_v53, %v6339_v24  ;;  %v572_v58 = vpop.f32.mrb[29].mxu0  ;;  %1715 = vmatprep.subr.bf16.mxu0 %v5707_v28  ;;  %1941 = vmatprep.subr.bf16.mxu1 %v5710_v38  ;;  %v746_v36 = vmax.f32 %v678_v19, 0.0  ;;  %v5717_v38 = vld [vmem:[#allocation2 + $0x3c0] ss:$16 sps:$4 sm:$0xff]   ;;  %v5726_v53 = vld [vmem:[#allocation2 + $0x3e8] ss:$16 sps:$4 sm:$0xff]  }
 0x15b   : > { %v573_v62 = vadd.f32 %v572_v58, %v6342_v25  ;;  %v574_v63 = vpop.f32.mrb[30].mxu0  ;;  %1670 = vmatprep.mubr.bf16.mxu0 %v781_v51  ;;  %1896 = vmatprep.mubr.bf16.mxu1 %v781_v51  ;;  %v683_v47 = vpop.f32.mrb[28].mxu1  ;;  %v5723_v51 = vld [vmem:[#allocation2 + $0x3e0] ss:$16 sps:$4 sm:$0xff]   ;;  %v5753_v19 = vld [vmem:[#allocation4 + $0xe8] ss:$28 sps:$4 sm:$0xff]  }
 0x15c   : > { %v575_v4 = vadd.f32 %v574_v63, %v6339_v24  ;;  %v576_v5 = vpop.f32.mrb[31].mxu0  ;;  %1671 = vmatmul.mubr.bf16.gmra.mrb[56].mxu0 %v780_v48  ;;  %1897 = vmatmul.mubr.bf16.gmra.mrb[56].mxu1 %v780_v48  ;;  %v748_v17 = vmax.f32 %v571_v57, 0.0  ;;  %v5722_v24 = vld [vmem:[#allocation2 + $0x3cc] ss:$16 sps:$4 sm:$0xff]   ;;  %v6440_v43 = vpack.c.bf16 %v746_v36, %v742_v18  ;;  %v684_v48 = vadd.f32 %v683_v47, %v6355_v41  ;;  %v685_v50 = vpop.f32.mrb[29].mxu1 }
 0x15d   : > { %v577_v10 = vadd.f32 %v576_v5, %v6342_v25  ;;  %1716 = vmatpush1.bf16.msra.mxu0 %v5705_v54  ;;  %1942 = vmatpush1.bf16.msra.mxu1 %v5708_v55  ;;  %v749_v27 = vmax.f32 %v573_v62, 0.0  ;;  %v680_v25 = vadd.f32 %v679_v22, %v6358_v46  ;;  %v686_v54 = vadd.f32 %v685_v50, %v6358_v46  ;;  %v687_v55 = vpop.f32.mrb[30].mxu1  ;;  %v5758_v18 = vld [vmem:[#allocation4 + $0xe4] ss:$28 sps:$4 sm:$0xff]   ;;  %v5768_v36 = vld [vmem:[#allocation4 + $0x150] ss:$28 sps:$4 sm:$0xff]  }
 0x15e   : > { %v752_v0 = vmax.f32 %v575_v4, 0.0  ;;  %1717 = vmatprep.subr.bf16.mxu0 %v5713_v59  ;;  %1943 = vmatprep.subr.bf16.mxu1 %v5716_v60  ;;  %v750_v56 = vmax.f32 %v684_v48, 0.0  ;;  %v688_v57 = vadd.f32 %v687_v55, %v6355_v41  ;;  %v689_v58 = vpop.f32.mrb[31].mxu1  ;;  %v5731_v59 = vld [vmem:[#allocation4 + $0xc] ss:$28 sps:$4 sm:$0xff]  }
 0x15f   : > { %v753_v28 = vmax.f32 %v577_v10, 0.0  ;;  %v747_v40 = vmax.f32 %v680_v25, 0.0  ;;  %v5734_v60 = vld [vmem:[#allocation4 + $0x4] ss:$28 sps:$4 sm:$0xff]   ;;  %v751_v62 = vmax.f32 %v686_v54, 0.0  ;;  %v690_v63 = vadd.f32 %v689_v58, %v6358_v46 }
 0x160   : > { %v784_v32 = vpack.c.bf16 %v752_v0, %v748_v17  ;;  %v754_v2 = vmax.f32 %v688_v57, 0.0  ;;  %v5740_v10 = vld [vmem:[#allocation4 + $0x3c] ss:$28 sps:$4 sm:$0xff]   ;;  %v5749_v17 = vld [vmem:[#allocation4 + $0xb4] ss:$28 sps:$4 sm:$0xff]  }
 0x161   : > { %v785_v37 = vpack.c.bf16 %v753_v28, %v749_v27  ;;  %1718 = vmatpush1.bf16.msra.mxu0 %v5711_v7  ;;  %1944 = vmatpush1.bf16.msra.mxu1 %v5714_v12  ;;  %v6442_v45 = vpack.c.bf16 %v747_v40, %v743_v31  ;;  %v755_v4 = vmax.f32 %v690_v63, 0.0  ;;  %v5729_v7 = vld [vmem:[#allocation4 + $0x8] ss:$28 sps:$4 sm:$0xff]   ;;  %v5735_v46 = vld [vmem:[#allocation4 + $0x40] ss:$28 sps:$4 sm:$0xff]  }
 0x162   : > { %1719 = vmatprep.subr.bf16.mxu0 %v5719_v13  ;;  %1945 = vmatprep.subr.bf16.mxu1 %v5722_v24  ;;  %v6450_v5 = vpack.c.bf16 %v754_v2, %v750_v56  ;;  %v5743_v12 = vld [vmem:[#allocation4 + $0x7c] ss:$28 sps:$4 sm:$0xff]   ;;  %v5746_v13 = vld [vmem:[#allocation4 + $0x74] ss:$28 sps:$4 sm:$0xff]   ;;  %v5750_v0 = vld [vmem:[#allocation4 + $0xa8] ss:$28 sps:$4 sm:$0xff]  }
 0x163   : > { %1680 = vmatprep.mubr.bf16.mxu0 %v785_v37  ;;  %1906 = vmatprep.mubr.bf16.mxu1 %v785_v37  ;;  %v6452_v41 = vpack.c.bf16 %v755_v4, %v751_v62  ;;  %v5755_v24 = vld [vmem:[#allocation4 + $0xec] ss:$28 sps:$4 sm:$0xff]   ;;  %v5756_v22 = vld [vmem:[#allocation4 + $0xe0] ss:$28 sps:$4 sm:$0xff]   ;;  %v5762_v28 = vld [vmem:[#allocation4 + $0x118] ss:$28 sps:$4 sm:$0xff]  }
 0x164   : > { %1681 = vmatmul.mubr.bf16.gmra.mrb[60].mxu0 %v784_v32  ;;  %1907 = vmatmul.mubr.bf16.gmra.mrb[60].mxu1 %v784_v32  ;;  %v5761_v27 = vld [vmem:[#allocation4 + $0x124] ss:$28 sps:$4 sm:$0xff]   ;;  %v5767_v31 = vld [vmem:[#allocation4 + $0x15c] ss:$28 sps:$4 sm:$0xff]   ;;  %v5770_v25 = vld [vmem:[#allocation4 + $0x154] ss:$28 sps:$4 sm:$0xff]  }
 0x165   : > { %1720 = vmatpush1.bf16.msra.mxu0 %v5717_v38  ;;  %1946 = vmatpush1.bf16.msra.mxu1 %v5720_v39  ;;  %v5765_v32 = vld [vmem:[#allocation4 + $0x158] ss:$28 sps:$4 sm:$0xff]   ;;  %v5774_v38 = vld [vmem:[#allocation4 + $0x188] ss:$28 sps:$4 sm:$0xff]   ;;  %v5792_v54 = vld [vmem:[#allocation4 + $0x230] ss:$28 sps:$4 sm:$0xff]  }
 0x166   : > { %1721 = vmatprep.subr.bf16.mxu0 %v5725_v42  ;;  %1723 = vmatprep.mubr.bf16.mxu0 %v6372_v29  ;;  %v5773_v37 = vld [vmem:[#allocation4 + $0x194] ss:$28 sps:$4 sm:$0xff]   ;;  %v5779_v39 = vld [vmem:[#allocation4 + $0x1cc] ss:$28 sps:$4 sm:$0xff]   ;;  %v5782_v40 = vld [vmem:[#allocation4 + $0x1c4] ss:$28 sps:$4 sm:$0xff]  }
 0x167   : > { %1947 = vmatprep.subr.bf16.mxu1 %v5728_v44  ;;  %1949 = vmatprep.mubr.bf16.mxu1 %v6372_v29  ;;  %v5738_v29 = vld [vmem:[#allocation4 + $0x38] ss:$28 sps:$4 sm:$0xff]   ;;  %v5777_v42 = vld [vmem:[#allocation4 + $0x1c8] ss:$28 sps:$4 sm:$0xff]   ;;  %v5780_v44 = vld [vmem:[#allocation4 + $0x1c0] ss:$28 sps:$4 sm:$0xff]  }
 0x168   : > { %v5785_v47 = vld [vmem:[#allocation4 + $0x204] ss:$28 sps:$4 sm:$0xff]   ;;  %v5786_v48 = vld [vmem:[#allocation4 + $0x1f8] ss:$28 sps:$4 sm:$0xff]   ;;  %v5803_v57 = vld [vmem:[#allocation4 + $0x2ac] ss:$28 sps:$4 sm:$0xff]  }
 0x169   : > { %1722 = vmatpush1.bf16.msra.mxu0 %v5723_v51  ;;  %1948 = vmatpush1.bf16.msra.mxu1 %v5726_v53  ;;  %v5791_v50 = vld [vmem:[#allocation4 + $0x23c] ss:$28 sps:$4 sm:$0xff]   ;;  %v5794_v51 = vld [vmem:[#allocation4 + $0x234] ss:$28 sps:$4 sm:$0xff]   ;;  %v5798_v56 = vld [vmem:[#allocation4 + $0x268] ss:$28 sps:$4 sm:$0xff]  }
 0x16a   : > { %3797 = vmatprep.subr.bf16.mxu1 %v5731_v59  ;;  %3571 = vmatprep.subr.bf16.mxu0 %v5734_v60  ;;  %v5789_v53 = vld [vmem:[#allocation4 + $0x238] ss:$28 sps:$4 sm:$0xff]   ;;  %v5806_v58 = vld [vmem:[#allocation4 + $0x2a4] ss:$28 sps:$4 sm:$0xff]  }
 0x16b   : > { %v5797_v55 = vld [vmem:[#allocation4 + $0x274] ss:$28 sps:$4 sm:$0xff]   ;;  %v5801_v59 = vld [vmem:[#allocation4 + $0x2a8] ss:$28 sps:$4 sm:$0xff]   ;;  %v5804_v60 = vld [vmem:[#allocation4 + $0x2a0] ss:$28 sps:$4 sm:$0xff]  }
 0x16c   : > { %1724 = vmatmul.mubr.bf16.vlgmr.msra.gmra.mrb[32].mxu0 %v6369_v26  ;;  %1950 = vmatmul.mubr.bf16.vlgmr.msra.gmra.mrb[32].mxu1 %v6369_v26  ;;  %v5752_v26 = vld [vmem:[#allocation4 + $0xac] ss:$28 sps:$4 sm:$0xff]   ;;  %v5809_v62 = vld [vmem:[#allocation4 + $0x2e4] ss:$28 sps:$4 sm:$0xff]   ;;  %v5810_v63 = vld [vmem:[#allocation4 + $0x2d8] ss:$28 sps:$4 sm:$0xff]  }
 0x16d   : > { %1733 = vmatprep.mubr.bf16.mxu0 %v6384_v6  ;;  %1959 = vmatprep.mubr.bf16.mxu1 %v6384_v6  ;;  %v5747_v6 = vld [vmem:[#allocation4 + $0xb0] ss:$28 sps:$4 sm:$0xff]   ;;  %v5815_v2 = vld [vmem:[#allocation4 + $0x31c] ss:$28 sps:$4 sm:$0xff]  }
 0x16e   : > { %3798 = vmatpush1.bf16.msra.mxu1 %v5729_v7  ;;  %3572 = vmatpush1.bf16.msra.mxu0 %v5732_v8  ;;  %v5818_v4 = vld [vmem:[#allocation4 + $0x314] ss:$28 sps:$4 sm:$0xff]  }
 0x16f   : > { %3799 = vmatprep.subr.bf16.mxu1 %v5737_v9  ;;  %3573 = vmatprep.subr.bf16.mxu0 %v5740_v10  ;;  %v5813_v7 = vld [vmem:[#allocation4 + $0x318] ss:$28 sps:$4 sm:$0xff]   ;;  %v5819_v9 = vld [vmem:[#allocation4 + $0x350] ss:$28 sps:$4 sm:$0xff]   ;;  %v5822_v10 = vld [vmem:[#allocation4 + $0x348] ss:$28 sps:$4 sm:$0xff]  }
 0x170   : > { %v5821_v8 = vld [vmem:[#allocation4 + $0x354] ss:$28 sps:$4 sm:$0xff]  }
 0x172   : > { %3800 = vmatpush1.bf16.msra.mxu1 %v5735_v46  ;;  %3574 = vmatpush1.bf16.msra.mxu0 %v5738_v29  ;;  %v5827_v46 = vld [vmem:[#allocation4 + $0x38c] ss:$28 sps:$4 sm:$0xff]   ;;  %v5830_v29 = vld [vmem:[#allocation4 + $0x384] ss:$28 sps:$4 sm:$0xff]  }
 0x173   : > { %3801 = vmatprep.subr.bf16.mxu1 %v5743_v12  ;;  %3575 = vmatprep.subr.bf16.mxu0 %v5746_v13 }
 0x174   : > { %1734 = vmatmul.mubr.bf16.gmra.mrb[36].mxu0 %v6381_v3  ;;  %1960 = vmatmul.mubr.bf16.gmra.mrb[36].mxu1 %v6381_v3  ;;  %v5764_v3 = vld [vmem:[#allocation4 + $0x11c] ss:$28 sps:$4 sm:$0xff]  }
 0x175   : > { %1743 = vmatprep.mubr.bf16.mxu0 %v6396_v52  ;;  %1969 = vmatprep.mubr.bf16.mxu1 %v6396_v52  ;;  %v5759_v52 = vld [vmem:[#allocation4 + $0x120] ss:$28 sps:$4 sm:$0xff]  }
 0x176   : > { %3802 = vmatpush1.bf16.msra.mxu1 %v5741_v15  ;;  %3576 = vmatpush1.bf16.msra.mxu0 %v5744_v16 }
 0x177   : > { %3803 = vmatprep.subr.bf16.mxu1 %v5749_v17  ;;  %3577 = vmatprep.subr.bf16.mxu0 %v5752_v26 }
 0x17a   : > { %3804 = vmatpush1.bf16.msra.mxu1 %v5747_v6  ;;  %3578 = vmatpush1.bf16.msra.mxu0 %v5750_v0 }
 0x17b   : > { %3805 = vmatprep.subr.bf16.mxu1 %v5755_v24  ;;  %3579 = vmatprep.subr.bf16.mxu0 %v5758_v18 }
 0x17c   : > { %1744 = vmatmul.mubr.bf16.gmra.mrb[40].mxu0 %v6393_v49  ;;  %1970 = vmatmul.mubr.bf16.gmra.mrb[40].mxu1 %v6393_v49  ;;  %v5776_v49 = vld [vmem:[#allocation4 + $0x18c] ss:$28 sps:$4 sm:$0xff]  }
 0x17d   : > { %1753 = vmatprep.mubr.bf16.mxu0 %v6408_v34  ;;  %1979 = vmatprep.mubr.bf16.mxu1 %v6408_v34  ;;  %v5771_v34 = vld [vmem:[#allocation4 + $0x190] ss:$28 sps:$4 sm:$0xff]  }
 0x17e   : > { %3806 = vmatpush1.bf16.msra.mxu1 %v5753_v19  ;;  %3580 = vmatpush1.bf16.msra.mxu0 %v5756_v22 }
 0x17f   : > { %3807 = vmatprep.subr.bf16.mxu1 %v5761_v27  ;;  %3581 = vmatprep.subr.bf16.mxu0 %v5764_v3 }
 0x182   : > { %3808 = vmatpush1.bf16.msra.mxu1 %v5759_v52  ;;  %3582 = vmatpush1.bf16.msra.mxu0 %v5762_v28 }
 0x183   : > { %3809 = vmatprep.subr.bf16.mxu1 %v5767_v31  ;;  %3583 = vmatprep.subr.bf16.mxu0 %v5770_v25 }
 0x184   : > { %1754 = vmatmul.mubr.bf16.gmra.mrb[44].mxu0 %v6405_v30  ;;  %1980 = vmatmul.mubr.bf16.gmra.mrb[44].mxu1 %v6405_v30  ;;  %v5788_v30 = vld [vmem:[#allocation4 + $0x1fc] ss:$28 sps:$4 sm:$0xff]  }
 0x185   : > { %1763 = vmatprep.mubr.bf16.mxu0 %v6420_v14  ;;  %1989 = vmatprep.mubr.bf16.mxu1 %v6420_v14  ;;  %v5783_v14 = vld [vmem:[#allocation4 + $0x200] ss:$28 sps:$4 sm:$0xff]  }
 0x186   : > { %3810 = vmatpush1.bf16.msra.mxu1 %v5765_v32  ;;  %3584 = vmatpush1.bf16.msra.mxu0 %v5768_v36 }
 0x187   : > { %3811 = vmatprep.subr.bf16.mxu1 %v5773_v37  ;;  %3585 = vmatprep.subr.bf16.mxu0 %v5776_v49 }
 0x18a   : > { %3812 = vmatpush1.bf16.msra.mxu1 %v5771_v34  ;;  %3586 = vmatpush1.bf16.msra.mxu0 %v5774_v38 }
 0x18b   : > { %3813 = vmatprep.subr.bf16.mxu1 %v5779_v39  ;;  %3587 = vmatprep.subr.bf16.mxu0 %v5782_v40 }
 0x18c   : > { %1764 = vmatmul.mubr.bf16.gmra.mrb[48].mxu0 %v6417_v11  ;;  %1990 = vmatmul.mubr.bf16.gmra.mrb[48].mxu1 %v6417_v11  ;;  %v5800_v11 = vld [vmem:[#allocation4 + $0x26c] ss:$28 sps:$4 sm:$0xff]  }
 0x18d   : > { %1773 = vmatprep.mubr.bf16.mxu0 %v6432_v1  ;;  %1999 = vmatprep.mubr.bf16.mxu1 %v6432_v1  ;;  %v5795_v1 = vld [vmem:[#allocation4 + $0x270] ss:$28 sps:$4 sm:$0xff]  }
 0x18e   : > { %3814 = vmatpush1.bf16.msra.mxu1 %v5777_v42  ;;  %3588 = vmatpush1.bf16.msra.mxu0 %v5780_v44 }
 0x18f   : > { %3815 = vmatprep.subr.bf16.mxu1 %v5785_v47  ;;  %3589 = vmatprep.subr.bf16.mxu0 %v5788_v30 }
 0x192   : > { %3816 = vmatpush1.bf16.msra.mxu1 %v5783_v14  ;;  %3590 = vmatpush1.bf16.msra.mxu0 %v5786_v48 }
 0x193   : > { %3817 = vmatprep.subr.bf16.mxu1 %v5791_v50  ;;  %3591 = vmatprep.subr.bf16.mxu0 %v5794_v51 }
 0x194   : > { %1774 = vmatmul.mubr.bf16.gmra.mrb[52].mxu0 %v6429_v61  ;;  %2000 = vmatmul.mubr.bf16.gmra.mrb[52].mxu1 %v6429_v61  ;;  %v5812_v61 = vld [vmem:[#allocation4 + $0x2dc] ss:$28 sps:$4 sm:$0xff]  }
 0x195   : > { %1783 = vmatprep.mubr.bf16.mxu0 %v6442_v45  ;;  %2009 = vmatprep.mubr.bf16.mxu1 %v6442_v45  ;;  %v5807_v45 = vld [vmem:[#allocation4 + $0x2e0] ss:$28 sps:$4 sm:$0xff]  }
 0x196   : > { %3818 = vmatpush1.bf16.msra.mxu1 %v5789_v53  ;;  %3592 = vmatpush1.bf16.msra.mxu0 %v5792_v54  ;;  %v5825_v53 = vld [vmem:[#allocation4 + $0x388] ss:$28 sps:$4 sm:$0xff]   ;;  %v5828_v54 = vld [vmem:[#allocation4 + $0x380] ss:$28 sps:$4 sm:$0xff]  }
 0x197   : > { %3819 = vmatprep.subr.bf16.mxu1 %v5797_v55  ;;  %3593 = vmatprep.subr.bf16.mxu0 %v5800_v11 }
 0x19a   : > { %3820 = vmatpush1.bf16.msra.mxu1 %v5795_v1  ;;  %3594 = vmatpush1.bf16.msra.mxu0 %v5798_v56 }
 0x19b   : > { %3821 = vmatprep.subr.bf16.mxu1 %v5803_v57  ;;  %3595 = vmatprep.subr.bf16.mxu0 %v5806_v58  ;;  %v5833_v57 = vld [vmem:[#allocation4 + $0x3c4] ss:$28 sps:$4 sm:$0xff]   ;;  %v5836_v58 = vld [vmem:[#allocation4 + $0x3bc] ss:$28 sps:$4 sm:$0xff]  }
 0x19c   : > { %1784 = vmatmul.mubr.bf16.gmra.mrb[56].mxu0 %v6440_v43  ;;  %2010 = vmatmul.mubr.bf16.gmra.mrb[56].mxu1 %v6440_v43  ;;  %v5816_v43 = vld [vmem:[#allocation4 + $0x310] ss:$28 sps:$4 sm:$0xff]  }
 0x19d   : > { %1793 = vmatprep.mubr.bf16.mxu0 %v6452_v41  ;;  %2019 = vmatprep.mubr.bf16.mxu1 %v6452_v41  ;;  %v5824_v41 = vld [vmem:[#allocation4 + $0x34c] ss:$28 sps:$4 sm:$0xff]  }
 0x19e   : > { %3822 = vmatpush1.bf16.msra.mxu1 %v5801_v59  ;;  %3596 = vmatpush1.bf16.msra.mxu0 %v5804_v60 }
 0x19f   : > { %3823 = vmatprep.subr.bf16.mxu1 %v5809_v62  ;;  %3597 = vmatprep.subr.bf16.mxu0 %v5812_v61 }
 0x1a2   : > { %3824 = vmatpush1.bf16.msra.mxu1 %v5807_v45  ;;  %3598 = vmatpush1.bf16.msra.mxu0 %v5810_v63 }
 0x1a3   : > { %3825 = vmatprep.subr.bf16.mxu1 %v5815_v2  ;;  %3599 = vmatprep.subr.bf16.mxu0 %v5818_v4 }
 0x1a4   : > { %1794 = vmatmul.mubr.bf16.gmra.mrb[60].mxu0 %v6450_v5  ;;  %2020 = vmatmul.mubr.bf16.gmra.mrb[60].mxu1 %v6450_v5  ;;  %v916_v5 = vld [vmem:[%s7067_s4] sm:$0xf] }
 0x1a5   : > { %v6488_v12 = vrot.slane %v916_v5, %v6330_v21  ;;  %v6491_v13 = vrot.slane %v916_v5, %v6348_v33  ;;  %v6494_v15 = vrot.slane %v916_v5, %v6336_v23  ;;  %v6497_v16 = vrot.slane %v916_v5, %v6352_v35 }
 0x1a6   : > { %3826 = vmatpush1.bf16.msra.mxu1 %v5813_v7  ;;  %3600 = vmatpush1.bf16.msra.mxu0 %v5816_v43 }
 0x1a7   : > { %3827 = vmatprep.subr.bf16.mxu1 %v5821_v8  ;;  %3601 = vmatprep.subr.bf16.mxu0 %v5824_v41  ;;  %v5831_v8 = vld [vmem:[#allocation4 + $0x3c0] ss:$28 sps:$4 sm:$0xff]   ;;  %v5834_v41 = vld [vmem:[#allocation4 + $0x3b8] ss:$28 sps:$4 sm:$0xff]  }
 0x1aa   : > { %3828 = vmatpush1.bf16.msra.mxu1 %v5819_v9  ;;  %3602 = vmatpush1.bf16.msra.mxu0 %v5822_v10  ;;  %v5839_v9 = vld [vmem:[#allocation4 + $0x3fc] ss:$28 sps:$4 sm:$0xff]  }
 0x1ab   : > { %3910 = vmatprep.subr.bf16.mxu1 %v5827_v46  ;;  %3684 = vmatprep.subr.bf16.mxu0 %v5830_v29 }
 0x23f   : > { %v1725_v17 = vpop.f32.mrb[32].mxu0  ;;  %v1951_v26 = vpop.f32.mrb[32].mxu1 }
 0x240   : > { %v5162_v6 = vadd.f32 %v1725_v17, %v6488_v12  ;;  %v5194_v0 = vadd.f32 %v1951_v26, %v6491_v13  ;;  %v1727_v24 = vpop.f32.mrb[33].mxu0  ;;  %v1953_v18 = vpop.f32.mrb[33].mxu1  ;;  %v5842_v17 = vld [vmem:[#allocation4 + $0x3f4] ss:$28 sps:$4 sm:$0xff]  }
 0x241   : > { %v5163_v19 = vadd.f32 %v1727_v24, %v6494_v15  ;;  %v5195_v22 = vadd.f32 %v1953_v18, %v6497_v16  ;;  %v1729_v27 = vpop.f32.mrb[34].mxu0  ;;  %v1955_v3 = vpop.f32.mrb[34].mxu1 }
 0x242   : > { %v5164_v52 = vadd.f32 %v1729_v27, %v6488_v12  ;;  %v5196_v28 = vadd.f32 %v1955_v3, %v6491_v13  ;;  %v1731_v31 = vpop.f32.mrb[35].mxu0  ;;  %v1957_v25 = vpop.f32.mrb[35].mxu1  ;;  %v2030_v37 = vmax.f32 %v5162_v6, 0.0  ;;  %v2032_v49 = vmax.f32 %v5194_v0, 0.0 }
 0x243   : > { %v5165_v32 = vadd.f32 %v1731_v31, %v6494_v15  ;;  %v5197_v36 = vadd.f32 %v1957_v25, %v6497_v16  ;;  %v2031_v39 = vmax.f32 %v5163_v19, 0.0  ;;  %v2033_v40 = vmax.f32 %v5195_v22, 0.0  ;;  %v5840_v31 = vld [vmem:[#allocation4 + $0x3f0] ss:$28 sps:$4 sm:$0xff]  }
 0x244   : > { %v2034_v34 = vmax.f32 %v5164_v52, 0.0  ;;  %v2036_v38 = vmax.f32 %v5196_v28, 0.0  ;;  %v5837_v28 = vld [vmem:[#allocation4 + $0x3f8] ss:$28 sps:$4 sm:$0xff]  }
 0x245   : > { %v2035_v42 = vmax.f32 %v5165_v32, 0.0  ;;  %v2037_v44 = vmax.f32 %v5197_v36, 0.0 }
 0x246   : > { %v6507_v47 = vpack.c.bf16 %v2034_v34, %v2030_v37  ;;  %v6509_v30 = vpack.c.bf16 %v2036_v38, %v2032_v49  ;;  %v5845_v49 = vld [vmem:[#allocation4 + $0x434] ss:$28 sps:$4 sm:$0xff]   ;;  %v5848_v34 = vld [vmem:[#allocation4 + $0x42c] ss:$28 sps:$4 sm:$0xff]  }
 0x247   : > { %v6511_v14 = vpack.c.bf16 %v2035_v42, %v2031_v39  ;;  %v6513_v48 = vpack.c.bf16 %v2037_v44, %v2033_v40  ;;  %v1735_v50 = vpop.f32.mrb[36].mxu0  ;;  %v1961_v51 = vpop.f32.mrb[36].mxu1 }
 0x248   : > { %v5166_v55 = vadd.f32 %v1735_v50, %v6488_v12  ;;  %v5198_v11 = vadd.f32 %v1961_v51, %v6491_v13  ;;  %v1737_v1 = vpop.f32.mrb[37].mxu0  ;;  %v1963_v56 = vpop.f32.mrb[37].mxu1 }
 0x249   : > { %v5167_v59 = vadd.f32 %v1737_v1, %v6494_v15  ;;  %v5199_v60 = vadd.f32 %v1963_v56, %v6497_v16  ;;  %v1739_v62 = vpop.f32.mrb[38].mxu0  ;;  %v1965_v61 = vpop.f32.mrb[38].mxu1  ;;  %3603 = vmatprep.mubr.bf16.mxu0 %v6511_v14  ;;  %3829 = vmatprep.mubr.bf16.mxu1 %v6511_v14  ;;  %v5846_v1 = vld [vmem:[#allocation4 + $0x428] ss:$28 sps:$4 sm:$0xff]  }
 0x24a   : > { %v5168_v45 = vadd.f32 %v1739_v62, %v6488_v12  ;;  %v5200_v63 = vadd.f32 %v1965_v61, %v6491_v13  ;;  %v1741_v2 = vpop.f32.mrb[39].mxu0  ;;  %v1967_v4 = vpop.f32.mrb[39].mxu1  ;;  %3604 = vmatmul.mubr.bf16.vlgmr.msra.gmra.mrb[64].mxu0 %v6507_v47  ;;  %3830 = vmatmul.mubr.bf16.vlgmr.msra.gmra.mrb[64].mxu1 %v6507_v47  ;;  %v2038_v10 = vmax.f32 %v5166_v55, 0.0  ;;  %v2040_v46 = vmax.f32 %v5198_v11, 0.0  ;;  %v5843_v11 = vld [vmem:[#allocation4 + $0x430] ss:$28 sps:$4 sm:$0xff]  }
 0x24b   : > { %v5169_v7 = vadd.f32 %v1741_v2, %v6494_v15  ;;  %v5201_v43 = vadd.f32 %v1967_v4, %v6497_v16  ;;  %3911 = vmatpush1.bf16.msra.mxu1 %v5825_v53  ;;  %3685 = vmatpush1.bf16.msra.mxu0 %v5828_v54  ;;  %v2039_v26 = vmax.f32 %v5167_v59, 0.0  ;;  %v2041_v6 = vmax.f32 %v5199_v60, 0.0  ;;  %v5851_v56 = vld [vmem:[#allocation4 + $0x46c] ss:$28 sps:$4 sm:$0xff]   ;;  %v5854_v62 = vld [vmem:[#allocation4 + $0x464] ss:$28 sps:$4 sm:$0xff]  }
 0x24c   : > { %v2042_v29 = vmax.f32 %v5168_v45, 0.0  ;;  %v2044_v5 = vmax.f32 %v5200_v63, 0.0  ;;  %3912 = vmatprep.subr.bf16.mxu1 %v5833_v57  ;;  %3686 = vmatprep.subr.bf16.mxu0 %v5836_v58 }
 0x24d   : > { %v2043_v0 = vmax.f32 %v5169_v7, 0.0  ;;  %v2045_v24 = vmax.f32 %v5201_v43, 0.0 }
 0x24e   : > { %v6527_v18 = vpack.c.bf16 %v2042_v29, %v2038_v10  ;;  %v6529_v19 = vpack.c.bf16 %v2044_v5, %v2040_v46  ;;  %v5849_v10 = vld [vmem:[#allocation4 + $0x468] ss:$28 sps:$4 sm:$0xff]   ;;  %v5852_v46 = vld [vmem:[#allocation4 + $0x460] ss:$28 sps:$4 sm:$0xff]  }
 0x24f   : > { %v6531_v22 = vpack.c.bf16 %v2043_v0, %v2039_v26  ;;  %v6533_v27 = vpack.c.bf16 %v2045_v24, %v2041_v6  ;;  %3913 = vmatpush1.bf16.msra.mxu1 %v5831_v8  ;;  %v1745_v3 = vpop.f32.mrb[40].mxu0  ;;  %v1971_v52 = vpop.f32.mrb[40].mxu1  ;;  %3687 = vmatpush1.bf16.msra.mxu0 %v5834_v41  ;;  %v5857_v6 = vld [vmem:[#allocation4 + $0x4a4] ss:$28 sps:$4 sm:$0xff]   ;;  %v5860_v0 = vld [vmem:[#allocation4 + $0x49c] ss:$28 sps:$4 sm:$0xff]  }
 0x250   : > { %v5170_v25 = vadd.f32 %v1745_v3, %v6488_v12  ;;  %v5202_v32 = vadd.f32 %v1971_v52, %v6491_v13  ;;  %v1747_v36 = vpop.f32.mrb[41].mxu0  ;;  %v1973_v37 = vpop.f32.mrb[41].mxu1  ;;  %3914 = vmatprep.subr.bf16.mxu1 %v5839_v9  ;;  %3688 = vmatprep.subr.bf16.mxu0 %v5842_v17 }
 0x251   : > { %v5171_v38 = vadd.f32 %v1747_v36, %v6494_v15  ;;  %v5203_v39 = vadd.f32 %v1973_v37, %v6497_v16  ;;  %v1749_v40 = vpop.f32.mrb[42].mxu0  ;;  %v1975_v42 = vpop.f32.mrb[42].mxu1  ;;  %3613 = vmatprep.mubr.bf16.mxu0 %v6531_v22  ;;  %3839 = vmatprep.mubr.bf16.mxu1 %v6531_v22 }
 0x252   : > { %v5172_v44 = vadd.f32 %v1749_v40, %v6488_v12  ;;  %v5204_v50 = vadd.f32 %v1975_v42, %v6491_v13  ;;  %v1751_v51 = vpop.f32.mrb[43].mxu0  ;;  %v1977_v53 = vpop.f32.mrb[43].mxu1  ;;  %3614 = vmatmul.mubr.bf16.gmra.mrb[68].mxu0 %v6527_v18  ;;  %3840 = vmatmul.mubr.bf16.gmra.mrb[68].mxu1 %v6527_v18  ;;  %v2046_v57 = vmax.f32 %v5170_v25, 0.0  ;;  %v2048_v58 = vmax.f32 %v5202_v32, 0.0 }
 0x253   : > { %v5173_v54 = vadd.f32 %v1751_v51, %v6494_v15  ;;  %v5205_v55 = vadd.f32 %v1977_v53, %v6497_v16  ;;  %3915 = vmatpush1.bf16.msra.mxu1 %v5837_v28  ;;  %3689 = vmatpush1.bf16.msra.mxu0 %v5840_v31  ;;  %v2047_v61 = vmax.f32 %v5171_v38, 0.0  ;;  %v2049_v45 = vmax.f32 %v5203_v39, 0.0  ;;  %v5858_v38 = vld [vmem:[#allocation4 + $0x498] ss:$28 sps:$4 sm:$0xff]  }
 0x254   : > { %v2050_v59 = vmax.f32 %v5172_v44, 0.0  ;;  %v2052_v60 = vmax.f32 %v5204_v50, 0.0  ;;  %3916 = vmatprep.subr.bf16.mxu1 %v5845_v49  ;;  %3690 = vmatprep.subr.bf16.mxu0 %v5848_v34  ;;  %v5855_v34 = vld [vmem:[#allocation4 + $0x4a0] ss:$28 sps:$4 sm:$0xff]   ;;  %v5866_v51 = vld [vmem:[#allocation4 + $0x4d4] ss:$28 sps:$4 sm:$0xff]  }
 0x255   : > { %v2051_v63 = vmax.f32 %v5173_v54, 0.0  ;;  %v2053_v2 = vmax.f32 %v5205_v55, 0.0  ;;  %v5863_v39 = vld [vmem:[#allocation4 + $0x4dc] ss:$28 sps:$4 sm:$0xff]  }
 0x256   : > { %v6547_v4 = vpack.c.bf16 %v2050_v59, %v2046_v57  ;;  %v6549_v7 = vpack.c.bf16 %v2052_v60, %v2048_v58 }
 0x257   : > { %v6551_v43 = vpack.c.bf16 %v2051_v63, %v2047_v61  ;;  %v6553_v8 = vpack.c.bf16 %v2053_v2, %v2049_v45  ;;  %3917 = vmatpush1.bf16.msra.mxu1 %v5843_v11  ;;  %v1755_v41 = vpop.f32.mrb[44].mxu0  ;;  %v1981_v9 = vpop.f32.mrb[44].mxu1  ;;  %3691 = vmatpush1.bf16.msra.mxu0 %v5846_v1  ;;  %v5864_v61 = vld [vmem:[#allocation4 + $0x4d0] ss:$28 sps:$4 sm:$0xff]  }
 0x258   : > { %v5174_v29 = vadd.f32 %v1755_v41, %v6488_v12  ;;  %v5206_v5 = vadd.f32 %v1981_v9, %v6491_v13  ;;  %v1757_v17 = vpop.f32.mrb[45].mxu0  ;;  %v1983_v26 = vpop.f32.mrb[45].mxu1  ;;  %3918 = vmatprep.subr.bf16.mxu1 %v5851_v56  ;;  %3692 = vmatprep.subr.bf16.mxu0 %v5854_v62  ;;  %v5861_v62 = vld [vmem:[#allocation4 + $0x4d8] ss:$28 sps:$4 sm:$0xff]  }
 0x259   : > { %v5175_v24 = vadd.f32 %v1757_v17, %v6494_v15  ;;  %v5207_v3 = vadd.f32 %v1983_v26, %v6497_v16  ;;  %v1759_v52 = vpop.f32.mrb[46].mxu0  ;;  %v1985_v28 = vpop.f32.mrb[46].mxu1  ;;  %3623 = vmatprep.mubr.bf16.mxu0 %v6551_v43  ;;  %3849 = vmatprep.mubr.bf16.mxu1 %v6551_v43  ;;  %v5869_v9 = vld [vmem:[#allocation4 + $0x514] ss:$28 sps:$4 sm:$0xff]  }
 0x25a   : > { %v5176_v31 = vadd.f32 %v1759_v52, %v6488_v12  ;;  %v5208_v25 = vadd.f32 %v1985_v28, %v6491_v13  ;;  %v1761_v32 = vpop.f32.mrb[47].mxu0  ;;  %v1987_v36 = vpop.f32.mrb[47].mxu1  ;;  %3624 = vmatmul.mubr.bf16.gmra.mrb[72].mxu0 %v6547_v4  ;;  %3850 = vmatmul.mubr.bf16.gmra.mrb[72].mxu1 %v6547_v4  ;;  %v2054_v40 = vmax.f32 %v5174_v29, 0.0  ;;  %v2056_v42 = vmax.f32 %v5206_v5, 0.0  ;;  %v5867_v28 = vld [vmem:[#allocation4 + $0x510] ss:$28 sps:$4 sm:$0xff]  }
 0x25b   : > { %v5177_v37 = vadd.f32 %v1761_v32, %v6494_v15  ;;  %v5209_v49 = vadd.f32 %v1987_v36, %v6497_v16  ;;  %3919 = vmatpush1.bf16.msra.mxu1 %v5849_v10  ;;  %3693 = vmatpush1.bf16.msra.mxu0 %v5852_v46  ;;  %v2055_v53 = vmax.f32 %v5175_v24, 0.0  ;;  %v2057_v54 = vmax.f32 %v5207_v3, 0.0  ;;  %v5872_v10 = vld [vmem:[#allocation4 + $0x50c] ss:$28 sps:$4 sm:$0xff]  }
 0x25c   : > { %v2058_v44 = vmax.f32 %v5176_v31, 0.0  ;;  %v2060_v50 = vmax.f32 %v5208_v25, 0.0  ;;  %3920 = vmatprep.subr.bf16.mxu1 %v5857_v6  ;;  %3694 = vmatprep.subr.bf16.mxu0 %v5860_v0  ;;  %v5870_v31 = vld [vmem:[#allocation4 + $0x508] ss:$28 sps:$4 sm:$0xff]  }
 0x25d   : > { %v2059_v55 = vmax.f32 %v5177_v37, 0.0  ;;  %v2061_v11 = vmax.f32 %v5209_v49, 0.0  ;;  %v5875_v25 = vld [vmem:[#allocation4 + $0x54c] ss:$28 sps:$4 sm:$0xff]  }
 0x25e   : > { %v6567_v1 = vpack.c.bf16 %v2058_v44, %v2054_v40  ;;  %v6569_v56 = vpack.c.bf16 %v2060_v50, %v2056_v42 }
 0x25f   : > { %v6571_v57 = vpack.c.bf16 %v2059_v55, %v2055_v53  ;;  %v6573_v58 = vpack.c.bf16 %v2061_v11, %v2057_v54  ;;  %3921 = vmatpush1.bf16.msra.mxu1 %v5855_v34  ;;  %v1765_v59 = vpop.f32.mrb[48].mxu0  ;;  %v1991_v60 = vpop.f32.mrb[48].mxu1  ;;  %3695 = vmatpush1.bf16.msra.mxu0 %v5858_v38  ;;  %v5878_v34 = vld [vmem:[#allocation4 + $0x544] ss:$28 sps:$4 sm:$0xff]  }
 0x260   : > { %v5178_v45 = vadd.f32 %v1765_v59, %v6488_v12  ;;  %v5210_v63 = vadd.f32 %v1991_v60, %v6491_v13  ;;  %v1767_v2 = vpop.f32.mrb[49].mxu0  ;;  %v1993_v41 = vpop.f32.mrb[49].mxu1  ;;  %3922 = vmatprep.subr.bf16.mxu1 %v5863_v39  ;;  %3696 = vmatprep.subr.bf16.mxu0 %v5866_v51  ;;  %v5873_v11 = vld [vmem:[#allocation4 + $0x548] ss:$28 sps:$4 sm:$0xff]   ;;  %v5876_v59 = vld [vmem:[#allocation4 + $0x540] ss:$28 sps:$4 sm:$0xff]  }
 0x261   : > { %v5179_v46 = vadd.f32 %v1767_v2, %v6494_v15  ;;  %v5211_v29 = vadd.f32 %v1993_v41, %v6497_v16  ;;  %v1769_v5 = vpop.f32.mrb[50].mxu0  ;;  %v1995_v17 = vpop.f32.mrb[50].mxu1  ;;  %3633 = vmatprep.mubr.bf16.mxu0 %v6571_v57  ;;  %3859 = vmatprep.mubr.bf16.mxu1 %v6571_v57  ;;  %v5884_v2 = vld [vmem:[#allocation4 + $0x57c] ss:$28 sps:$4 sm:$0xff]  }
 0x262   : > { %v5180_v26 = vadd.f32 %v1769_v5, %v6488_v12  ;;  %v5212_v6 = vadd.f32 %v1995_v17, %v6491_v13  ;;  %v1771_v0 = vpop.f32.mrb[51].mxu0  ;;  %v1997_v24 = vpop.f32.mrb[51].mxu1  ;;  %3634 = vmatmul.mubr.bf16.gmra.mrb[76].mxu0 %v6567_v1  ;;  %3860 = vmatmul.mubr.bf16.gmra.mrb[76].mxu1 %v6567_v1  ;;  %v2062_v32 = vmax.f32 %v5178_v45, 0.0  ;;  %v2064_v36 = vmax.f32 %v5210_v63, 0.0  ;;  %v5881_v63 = vld [vmem:[#allocation4 + $0x584] ss:$28 sps:$4 sm:$0xff]  }
 0x263   : > { %v5181_v3 = vadd.f32 %v1771_v0, %v6494_v15  ;;  %v5213_v52 = vadd.f32 %v1997_v24, %v6497_v16  ;;  %3923 = vmatpush1.bf16.msra.mxu1 %v5861_v62  ;;  %3697 = vmatpush1.bf16.msra.mxu0 %v5864_v61  ;;  %v2063_v38 = vmax.f32 %v5179_v46, 0.0  ;;  %v2065_v39 = vmax.f32 %v5211_v29, 0.0  ;;  %v5879_v24 = vld [vmem:[#allocation4 + $0x580] ss:$28 sps:$4 sm:$0xff]  }
 0x264   : > { %v2066_v37 = vmax.f32 %v5180_v26, 0.0  ;;  %v2068_v49 = vmax.f32 %v5212_v6, 0.0  ;;  %3924 = vmatprep.subr.bf16.mxu1 %v5869_v9  ;;  %3698 = vmatprep.subr.bf16.mxu0 %v5872_v10 }
 0x265   : > { %v2067_v40 = vmax.f32 %v5181_v3, 0.0  ;;  %v2069_v42 = vmax.f32 %v5213_v52, 0.0  ;;  %v5882_v3 = vld [vmem:[#allocation4 + $0x578] ss:$28 sps:$4 sm:$0xff]  }
 0x266   : > { %v6587_v44 = vpack.c.bf16 %v2066_v37, %v2062_v32  ;;  %v6589_v50 = vpack.c.bf16 %v2068_v49, %v2064_v36  ;;  %v5887_v52 = vld [vmem:[#allocation4 + $0x5bc] ss:$28 sps:$4 sm:$0xff]   ;;  %v5890_v36 = vld [vmem:[#allocation4 + $0x5b4] ss:$28 sps:$4 sm:$0xff]  }
 0x267   : > { %v6591_v51 = vpack.c.bf16 %v2067_v40, %v2063_v38  ;;  %v6593_v53 = vpack.c.bf16 %v2069_v42, %v2065_v39  ;;  %3925 = vmatpush1.bf16.msra.mxu1 %v5867_v28  ;;  %v1775_v54 = vpop.f32.mrb[52].mxu0  ;;  %v2001_v55 = vpop.f32.mrb[52].mxu1  ;;  %3699 = vmatpush1.bf16.msra.mxu0 %v5870_v31 }
 0x268   : > { %v5182_v60 = vadd.f32 %v1775_v54, %v6488_v12  ;;  %v5214_v62 = vadd.f32 %v2001_v55, %v6491_v13  ;;  %v1777_v61 = vpop.f32.mrb[53].mxu0  ;;  %v2003_v45 = vpop.f32.mrb[53].mxu1  ;;  %3926 = vmatprep.subr.bf16.mxu1 %v5875_v25  ;;  %3700 = vmatprep.subr.bf16.mxu0 %v5878_v34 }
 0x269   : > { %v5183_v41 = vadd.f32 %v1777_v61, %v6494_v15  ;;  %v5215_v9 = vadd.f32 %v2003_v45, %v6497_v16  ;;  %v1779_v10 = vpop.f32.mrb[54].mxu0  ;;  %v2005_v46 = vpop.f32.mrb[54].mxu1  ;;  %3643 = vmatprep.mubr.bf16.mxu0 %v6591_v51  ;;  %3869 = vmatprep.mubr.bf16.mxu1 %v6591_v51 }
 0x26a   : > { %v5184_v29 = vadd.f32 %v1779_v10, %v6488_v12  ;;  %v5216_v5 = vadd.f32 %v2005_v46, %v6491_v13  ;;  %v1781_v17 = vpop.f32.mrb[55].mxu0  ;;  %v2007_v26 = vpop.f32.mrb[55].mxu1  ;;  %3644 = vmatmul.mubr.bf16.gmra.mrb[80].mxu0 %v6587_v44  ;;  %3870 = vmatmul.mubr.bf16.gmra.mrb[80].mxu1 %v6587_v44  ;;  %v2070_v28 = vmax.f32 %v5182_v60, 0.0  ;;  %v2072_v31 = vmax.f32 %v5214_v62, 0.0  ;;  %v5888_v60 = vld [vmem:[#allocation4 + $0x5b0] ss:$28 sps:$4 sm:$0xff]  }
 0x26b   : > { %v5185_v6 = vadd.f32 %v1781_v17, %v6494_v15  ;;  %v5217_v0 = vadd.f32 %v2007_v26, %v6497_v16  ;;  %3927 = vmatpush1.bf16.msra.mxu1 %v5873_v11  ;;  %3701 = vmatpush1.bf16.msra.mxu0 %v5876_v59  ;;  %v2071_v37 = vmax.f32 %v5183_v41, 0.0  ;;  %v2073_v49 = vmax.f32 %v5215_v9, 0.0  ;;  %v5885_v59 = vld [vmem:[#allocation4 + $0x5b8] ss:$28 sps:$4 sm:$0xff]   ;;  %v5896_v41 = vld [vmem:[#allocation4 + $0x5ec] ss:$28 sps:$4 sm:$0xff]  }
 0x26c   : > { %v2074_v25 = vmax.f32 %v5184_v29, 0.0  ;;  %v2076_v32 = vmax.f32 %v5216_v5, 0.0  ;;  %3928 = vmatprep.subr.bf16.mxu1 %v5881_v63  ;;  %3702 = vmatprep.subr.bf16.mxu0 %v5884_v2  ;;  %v5893_v2 = vld [vmem:[#allocation4 + $0x5f4] ss:$28 sps:$4 sm:$0xff]  }
 0x26d   : > { %v2075_v34 = vmax.f32 %v5185_v6, 0.0  ;;  %v2077_v38 = vmax.f32 %v5217_v0, 0.0 }
 0x26e   : > { %v6607_v39 = vpack.c.bf16 %v2074_v25, %v2070_v28  ;;  %v6609_v40 = vpack.c.bf16 %v2076_v32, %v2072_v31  ;;  %v5899_v28 = vld [vmem:[#allocation4 + $0x62c] ss:$28 sps:$4 sm:$0xff]  }
 0x26f   : > { %v6611_v42 = vpack.c.bf16 %v2075_v34, %v2071_v37  ;;  %v6613_v54 = vpack.c.bf16 %v2077_v38, %v2073_v49  ;;  %3929 = vmatpush1.bf16.msra.mxu1 %v5879_v24  ;;  %v1785_v55 = vpop.f32.mrb[56].mxu0  ;;  %v2011_v11 = vpop.f32.mrb[56].mxu1  ;;  %3703 = vmatpush1.bf16.msra.mxu0 %v5882_v3  ;;  %v5891_v3 = vld [vmem:[#allocation4 + $0x5f0] ss:$28 sps:$4 sm:$0xff]   ;;  %v5902_v37 = vld [vmem:[#allocation4 + $0x624] ss:$28 sps:$4 sm:$0xff]  }
 0x270   : > { %v5186_v62 = vadd.f32 %v1785_v55, %v6488_v12  ;;  %v5218_v61 = vadd.f32 %v2011_v11, %v6491_v13  ;;  %v1787_v45 = vpop.f32.mrb[57].mxu0  ;;  %v2013_v63 = vpop.f32.mrb[57].mxu1  ;;  %3930 = vmatprep.subr.bf16.mxu1 %v5887_v52  ;;  %3704 = vmatprep.subr.bf16.mxu0 %v5890_v36  ;;  %v5894_v52 = vld [vmem:[#allocation4 + $0x5e8] ss:$28 sps:$4 sm:$0xff]  }
 0x271   : > { %v5187_v9 = vadd.f32 %v1787_v45, %v6494_v15  ;;  %v5219_v10 = vadd.f32 %v2013_v63, %v6497_v16  ;;  %v1789_v46 = vpop.f32.mrb[58].mxu0  ;;  %v2015_v29 = vpop.f32.mrb[58].mxu1  ;;  %3653 = vmatprep.mubr.bf16.mxu0 %v6611_v42  ;;  %3879 = vmatprep.mubr.bf16.mxu1 %v6611_v42  ;;  %v5897_v63 = vld [vmem:[#allocation4 + $0x628] ss:$28 sps:$4 sm:$0xff]  }
 0x272   : > { %v5188_v5 = vadd.f32 %v1789_v46, %v6488_v12  ;;  %v5220_v17 = vadd.f32 %v2015_v29, %v6491_v13  ;;  %v1791_v26 = vpop.f32.mrb[59].mxu0  ;;  %v2017_v6 = vpop.f32.mrb[59].mxu1  ;;  %3654 = vmatmul.mubr.bf16.gmra.mrb[84].mxu0 %v6607_v39  ;;  %3880 = vmatmul.mubr.bf16.gmra.mrb[84].mxu1 %v6607_v39  ;;  %v2078_v31 = vmax.f32 %v5186_v62, 0.0  ;;  %v2080_v25 = vmax.f32 %v5218_v61, 0.0  ;;  %v5905_v29 = vld [vmem:[#allocation4 + $0x664] ss:$28 sps:$4 sm:$0xff]  }
 0x273   : > { %v5189_v0 = vadd.f32 %v1791_v26, %v6494_v15  ;;  %v5221_v24 = vadd.f32 %v2017_v6, %v6497_v16  ;;  %3931 = vmatpush1.bf16.msra.mxu1 %v5885_v59  ;;  %3705 = vmatpush1.bf16.msra.mxu0 %v5888_v60  ;;  %v2079_v49 = vmax.f32 %v5187_v9, 0.0  ;;  %v2081_v34 = vmax.f32 %v5219_v10, 0.0 }
 0x274   : > { %v2082_v32 = vmax.f32 %v5188_v5, 0.0  ;;  %v2084_v36 = vmax.f32 %v5220_v17, 0.0  ;;  %3932 = vmatprep.subr.bf16.mxu1 %v5893_v2  ;;  %3706 = vmatprep.subr.bf16.mxu0 %v5896_v41  ;;  %v5900_v2 = vld [vmem:[#allocation4 + $0x620] ss:$28 sps:$4 sm:$0xff]  }
 0x275   : > { %v2083_v38 = vmax.f32 %v5189_v0, 0.0  ;;  %v2085_v55 = vmax.f32 %v5221_v24, 0.0  ;;  %v5908_v5 = vld [vmem:[#allocation4 + $0x65c] ss:$28 sps:$4 sm:$0xff]  }
 0x276   : > { %v6627_v11 = vpack.c.bf16 %v2082_v32, %v2078_v31  ;;  %v6629_v45 = vpack.c.bf16 %v2084_v36, %v2080_v25  ;;  %v5903_v32 = vld [vmem:[#allocation4 + $0x660] ss:$28 sps:$4 sm:$0xff]   ;;  %v5906_v36 = vld [vmem:[#allocation4 + $0x658] ss:$28 sps:$4 sm:$0xff]  }
 0x277   : > { %v6631_v59 = vpack.c.bf16 %v2083_v38, %v2079_v49  ;;  %v6633_v60 = vpack.c.bf16 %v2085_v55, %v2081_v34  ;;  %3933 = vmatpush1.bf16.msra.mxu1 %v5891_v3  ;;  %v1795_v62 = vpop.f32.mrb[60].mxu0  ;;  %v2021_v61 = vpop.f32.mrb[60].mxu1  ;;  %3707 = vmatpush1.bf16.msra.mxu0 %v5894_v52 }
 0x278   : > { %v5190_v41 = vadd.f32 %v1795_v62, %v6488_v12  ;;  %v5222_v9 = vadd.f32 %v2021_v61, %v6491_v13  ;;  %v1797_v10 = vpop.f32.mrb[61].mxu0  ;;  %v2023_v46 = vpop.f32.mrb[61].mxu1  ;;  %3934 = vmatprep.subr.bf16.mxu1 %v5899_v28  ;;  %3708 = vmatprep.subr.bf16.mxu0 %v5902_v37  ;;  %v5911_v37 = vld [vmem:[#allocation4 + $0x69c] ss:$28 sps:$4 sm:$0xff]  }
 0x279   : > { %v5191_v17 = vadd.f32 %v1797_v10, %v6494_v15  ;;  %v5223_v26 = vadd.f32 %v2023_v46, %v6497_v16  ;;  %v1799_v6 = vpop.f32.mrb[62].mxu0  ;;  %v2025_v0 = vpop.f32.mrb[62].mxu1  ;;  %3663 = vmatprep.mubr.bf16.mxu0 %v6631_v59  ;;  %3889 = vmatprep.mubr.bf16.mxu1 %v6631_v59 }
 0x27a   : > { %v5192_v24 = vadd.f32 %v1799_v6, %v6488_v12  ;;  %v5224_v3 = vadd.f32 %v2025_v0, %v6491_v13  ;;  %v1801_v52 = vpop.f32.mrb[63].mxu0  ;;  %v2027_v31 = vpop.f32.mrb[63].mxu1  ;;  %3664 = vmatmul.mubr.bf16.gmra.mrb[88].mxu0 %v6627_v11  ;;  %3890 = vmatmul.mubr.bf16.gmra.mrb[88].mxu1 %v6627_v11  ;;  %v2086_v49 = vmax.f32 %v5190_v41, 0.0  ;;  %v2088_v34 = vmax.f32 %v5222_v9, 0.0  ;;  %v5914_v13 = vld [vmem:[#allocation4 + $0x694] ss:$28 sps:$4 sm:$0xff]  }
 0x27b   : > { %v5193_v28 = vadd.f32 %v1801_v52, %v6494_v15  ;;  %v5225_v25 = vadd.f32 %v2027_v31, %v6497_v16  ;;  %3935 = vmatpush1.bf16.msra.mxu1 %v5897_v63  ;;  %3709 = vmatpush1.bf16.msra.mxu0 %v5900_v2  ;;  %v2087_v55 = vmax.f32 %v5191_v17, 0.0  ;;  %v2089_v62 = vmax.f32 %v5223_v26, 0.0  ;;  %v5909_v2 = vld [vmem:[#allocation4 + $0x698] ss:$28 sps:$4 sm:$0xff]   ;;  %v5912_v41 = vld [vmem:[#allocation4 + $0x690] ss:$28 sps:$4 sm:$0xff]  }
 0x27c   : > { %v2090_v12 = vmax.f32 %v5192_v24, 0.0  ;;  %v2092_v38 = vmax.f32 %v5224_v3, 0.0  ;;  %3936 = vmatprep.subr.bf16.mxu1 %v5905_v29  ;;  %3710 = vmatprep.subr.bf16.mxu0 %v5908_v5  ;;  %v5917_v9 = vld [vmem:[#allocation4 + $0x6d4] ss:$28 sps:$4 sm:$0xff]   ;;  %v5920_v29 = vld [vmem:[#allocation4 + $0x6cc] ss:$28 sps:$4 sm:$0xff]  }
 0x27d   : > { %v2091_v61 = vmax.f32 %v5193_v28, 0.0  ;;  %v2093_v10 = vmax.f32 %v5225_v25, 0.0  ;;  %v5915_v5 = vld [vmem:[#allocation4 + $0x6d0] ss:$28 sps:$4 sm:$0xff]   ;;  %v5918_v17 = vld [vmem:[#allocation4 + $0x6c8] ss:$28 sps:$4 sm:$0xff]  }
 0x27e   : > { %v6647_v46 = vpack.c.bf16 %v2090_v12, %v2086_v49  ;;  %v6649_v15 = vpack.c.bf16 %v2092_v38, %v2088_v34  ;;  %v5921_v26 = vld [vmem:[#allocation4 + $0x1d8] ss:$28 sps:$4 sm:$0xff]   ;;  %v5922_v24 = vld [vmem:[#allocation4 + $0x10] ss:$28 sps:$4 sm:$0xff]   ;;  %v5926_v28 = vld [vmem:[#allocation4 + $0x48] ss:$28 sps:$4 sm:$0xff]  }
 0x27f   : > { %v6651_v16 = vpack.c.bf16 %v2091_v61, %v2087_v55  ;;  %v6653_v63 = vpack.c.bf16 %v2093_v10, %v2089_v62  ;;  %3937 = vmatpush1.bf16.msra.mxu1 %v5903_v32  ;;  %3711 = vmatpush1.bf16.msra.mxu0 %v5906_v36  ;;  %v5924_v6 = vld [vmem:[#allocation4 + $0x14] ss:$28 sps:$4 sm:$0xff]   ;;  %v5928_v3 = vld [vmem:[#allocation4 + $0x4c] ss:$28 sps:$4 sm:$0xff]   ;;  %v5932_v32 = vld [vmem:[#allocation4 + $0x84] ss:$28 sps:$4 sm:$0xff]  }
 0x280   : > { %3938 = vmatprep.subr.bf16.mxu1 %v5911_v37  ;;  %3712 = vmatprep.subr.bf16.mxu0 %v5914_v13  ;;  %v5925_v0 = vld [vmem:[#allocation4 + $0x18] ss:$28 sps:$4 sm:$0xff]   ;;  %v5929_v52 = vld [vmem:[#allocation4 + $0x210] ss:$28 sps:$4 sm:$0xff]   ;;  %v5937_v25 = vld [vmem:[#allocation4 + $0x248] ss:$28 sps:$4 sm:$0xff]  }
 0x281   : > { %3673 = vmatprep.mubr.bf16.mxu0 %v6651_v16  ;;  %3899 = vmatprep.mubr.bf16.mxu1 %v6651_v16  ;;  %v5933_v31 = vld [vmem:[#allocation4 + $0x50] ss:$28 sps:$4 sm:$0xff]   ;;  %v5930_v36 = vld [vmem:[#allocation4 + $0x80] ss:$28 sps:$4 sm:$0xff]   ;;  %v5941_v37 = vld [vmem:[#allocation4 + $0x88] ss:$28 sps:$4 sm:$0xff]  }
 0x282   : > { %3674 = vmatmul.mubr.bf16.gmra.mrb[92].mxu0 %v6647_v46  ;;  %3900 = vmatmul.mubr.bf16.gmra.mrb[92].mxu1 %v6647_v46  ;;  %v5936_v49 = vld [vmem:[#allocation4 + $0xbc] ss:$28 sps:$4 sm:$0xff]   ;;  %v5940_v13 = vld [vmem:[#allocation4 + $0xf4] ss:$28 sps:$4 sm:$0xff]   ;;  %v5944_v10 = vld [vmem:[#allocation4 + $0x12c] ss:$28 sps:$4 sm:$0xff]  }
 0x283   : > { %3939 = vmatpush1.bf16.msra.mxu1 %v5909_v2  ;;  %3713 = vmatpush1.bf16.msra.mxu0 %v5912_v41  ;;  %v5945_v34 = vld [vmem:[#allocation4 + $0x280] ss:$28 sps:$4 sm:$0xff]   ;;  %v5934_v12 = vld [vmem:[#allocation4 + $0xb8] ss:$28 sps:$4 sm:$0xff]   ;;  %v5938_v62 = vld [vmem:[#allocation4 + $0xf0] ss:$28 sps:$4 sm:$0xff]  }
 0x284   : > { %3716 = vmatprep.mubr.bf16.mxu0 %v6513_v48  ;;  %3942 = vmatprep.mubr.bf16.mxu1 %v6513_v48  ;;  %v5949_v38 = vld [vmem:[#allocation4 + $0xc0] ss:$28 sps:$4 sm:$0xff]   ;;  %v5953_v55 = vld [vmem:[#allocation4 + $0x2b8] ss:$28 sps:$4 sm:$0xff]   ;;  %v5961_v2 = vld [vmem:[#allocation4 + $0x2f0] ss:$28 sps:$4 sm:$0xff]  }
 0x285   : > { %3940 = vmatprep.subr.bf16.mxu1 %v5917_v9  ;;  %3714 = vmatprep.subr.bf16.mxu0 %v5920_v29  ;;  %v5957_v61 = vld [vmem:[#allocation4 + $0xf8] ss:$28 sps:$4 sm:$0xff]   ;;  %v5942_v41 = vld [vmem:[#allocation4 + $0x128] ss:$28 sps:$4 sm:$0xff]   ;;  %v5965_v9 = vld [vmem:[#allocation4 + $0x130] ss:$28 sps:$4 sm:$0xff]  }
 0x286   : > { %v5948_v29 = vld [vmem:[#allocation4 + $0x164] ss:$28 sps:$4 sm:$0xff]  }
 0x287   : > { %3941 = vmatpush1.bf16.msra.mxu1 %v5915_v5  ;;  %3715 = vmatpush1.bf16.msra.mxu0 %v5918_v17  ;;  %v5969_v5 = vld [vmem:[#allocation4 + $0x328] ss:$28 sps:$4 sm:$0xff]   ;;  %v5946_v17 = vld [vmem:[#allocation4 + $0x160] ss:$28 sps:$4 sm:$0xff]  }
 0x288   : > { %5034 = vmatprep.subr.bf16.mxu1 %v5921_v26  ;;  %4023 = vmatprep.subr.bf16.mxu0 %v5924_v6  ;;  %v5973_v26 = vld [vmem:[#allocation4 + $0x168] ss:$28 sps:$4 sm:$0xff]   ;;  %v5952_v6 = vld [vmem:[#allocation4 + $0x19c] ss:$28 sps:$4 sm:$0xff]  }
 0x28a   : > { %3717 = vmatmul.mubr.bf16.vlgmr.msra.gmra.mrb[64].mxu0 %v6509_v30  ;;  %3943 = vmatmul.mubr.bf16.vlgmr.msra.gmra.mrb[64].mxu1 %v6509_v30 }
 0x28b   : > { %5035 = vmatpush3.bf16.msra.mxu1 %v5925_v0  ;;  %3726 = vmatprep.mubr.bf16.mxu0 %v6533_v27  ;;  %v5977_v0 = vld [vmem:[#allocation4 + $0x360] ss:$28 sps:$4 sm:$0xff]  }
 0x28c   : > { %3952 = vmatprep.mubr.bf16.mxu1 %v6533_v27  ;;  %4024 = vmatpush1.bf16.msra.mxu0 %v5922_v24  ;;  %v5950_v24 = vld [vmem:[#allocation4 + $0x198] ss:$28 sps:$4 sm:$0xff]  }
 0x28d   : > { %4025 = vmatprep.subr.bf16.mxu0 %v5928_v3  ;;  %5036 = vmatprep.subr.bf16.mxu1 %v5929_v52  ;;  %v5981_v3 = vld [vmem:[#allocation4 + $0x1a0] ss:$28 sps:$4 sm:$0xff]   ;;  %v5956_v52 = vld [vmem:[#allocation4 + $0x1d4] ss:$28 sps:$4 sm:$0xff]  }
 0x28f   : > { %5037 = vmatpush3.bf16.msra.mxu1 %v5933_v31  ;;  %v5985_v31 = vld [vmem:[#allocation4 + $0x558] ss:$28 sps:$4 sm:$0xff]  }
 0x290   : > { %4026 = vmatpush1.bf16.msra.mxu0 %v5926_v28  ;;  %5038 = vmatprep.subr.bf16.mxu1 %v5937_v25  ;;  %v5954_v28 = vld [vmem:[#allocation4 + $0x1d0] ss:$28 sps:$4 sm:$0xff]  }
 0x291   : > { %4027 = vmatprep.subr.bf16.mxu0 %v5932_v32  ;;  %v5960_v25 = vld [vmem:[#allocation4 + $0x20c] ss:$28 sps:$4 sm:$0xff]  }
 0x292   : > { %3727 = vmatmul.mubr.bf16.gmra.mrb[68].mxu0 %v6529_v19  ;;  %3953 = vmatmul.mubr.bf16.gmra.mrb[68].mxu1 %v6529_v19  ;;  %v5958_v32 = vld [vmem:[#allocation4 + $0x208] ss:$28 sps:$4 sm:$0xff]  }
 0x293   : > { %3736 = vmatprep.mubr.bf16.mxu0 %v6553_v8  ;;  %3962 = vmatprep.mubr.bf16.mxu1 %v6553_v8 }
 0x294   : > { %4028 = vmatpush1.bf16.msra.mxu0 %v5930_v36  ;;  %5039 = vmatpush3.bf16.msra.mxu1 %v5941_v37  ;;  %v5964_v36 = vld [vmem:[#allocation4 + $0x244] ss:$28 sps:$4 sm:$0xff]  }
 0x295   : > { %4029 = vmatprep.subr.bf16.mxu0 %v5936_v49  ;;  %5040 = vmatprep.subr.bf16.mxu1 %v5945_v34  ;;  %v5962_v37 = vld [vmem:[#allocation4 + $0x240] ss:$28 sps:$4 sm:$0xff]   ;;  %v5966_v34 = vld [vmem:[#allocation4 + $0x278] ss:$28 sps:$4 sm:$0xff]  }
 0x296   : > { %v5968_v49 = vld [vmem:[#allocation4 + $0x27c] ss:$28 sps:$4 sm:$0xff]  }
 0x298   : > { %4030 = vmatpush1.bf16.msra.mxu0 %v5934_v12  ;;  %5041 = vmatpush3.bf16.msra.mxu1 %v5949_v38  ;;  %v5972_v12 = vld [vmem:[#allocation4 + $0x2b4] ss:$28 sps:$4 sm:$0xff]  }
 0x299   : > { %4031 = vmatprep.subr.bf16.mxu0 %v5940_v13  ;;  %5042 = vmatprep.subr.bf16.mxu1 %v5953_v55  ;;  %v5970_v38 = vld [vmem:[#allocation4 + $0x2b0] ss:$28 sps:$4 sm:$0xff]   ;;  %v5974_v55 = vld [vmem:[#allocation4 + $0x2e8] ss:$28 sps:$4 sm:$0xff]  }
 0x29a   : > { %3737 = vmatmul.mubr.bf16.gmra.mrb[72].mxu0 %v6549_v7  ;;  %3963 = vmatmul.mubr.bf16.gmra.mrb[72].mxu1 %v6549_v7  ;;  %v5976_v13 = vld [vmem:[#allocation4 + $0x2ec] ss:$28 sps:$4 sm:$0xff]  }
 0x29b   : > { %3746 = vmatprep.mubr.bf16.mxu0 %v6573_v58  ;;  %3972 = vmatprep.mubr.bf16.mxu1 %v6573_v58 }
 0x29c   : > { %4032 = vmatpush1.bf16.msra.mxu0 %v5938_v62  ;;  %5043 = vmatpush3.bf16.msra.mxu1 %v5957_v61  ;;  %v5980_v62 = vld [vmem:[#allocation4 + $0x324] ss:$28 sps:$4 sm:$0xff]  }
 0x29d   : > { %4033 = vmatprep.subr.bf16.mxu0 %v5944_v10  ;;  %5044 = vmatprep.subr.bf16.mxu1 %v5961_v2  ;;  %v5978_v61 = vld [vmem:[#allocation4 + $0x320] ss:$28 sps:$4 sm:$0xff]   ;;  %v5982_v2 = vld [vmem:[#allocation4 + $0x358] ss:$28 sps:$4 sm:$0xff]  }
 0x29e   : > { %v5984_v10 = vld [vmem:[#allocation4 + $0x35c] ss:$28 sps:$4 sm:$0xff]  }
 0x2a0   : > { %4034 = vmatpush1.bf16.msra.mxu0 %v5942_v41  ;;  %5045 = vmatpush3.bf16.msra.mxu1 %v5965_v9  ;;  %v5988_v41 = vld [vmem:[#allocation4 + $0x394] ss:$28 sps:$4 sm:$0xff]  }
 0x2a1   : > { %4035 = vmatprep.subr.bf16.mxu0 %v5948_v29  ;;  %5046 = vmatprep.subr.bf16.mxu1 %v5969_v5  ;;  %v5989_v9 = vld [vmem:[#allocation4 + $0x398] ss:$28 sps:$4 sm:$0xff]   ;;  %v5986_v29 = vld [vmem:[#allocation4 + $0x390] ss:$28 sps:$4 sm:$0xff]  }
 0x2a2   : > { %3747 = vmatmul.mubr.bf16.gmra.mrb[76].mxu0 %v6569_v56  ;;  %3973 = vmatmul.mubr.bf16.gmra.mrb[76].mxu1 %v6569_v56  ;;  %v5992_v5 = vld [vmem:[#allocation4 + $0x3cc] ss:$28 sps:$4 sm:$0xff]  }
 0x2a3   : > { %3756 = vmatprep.mubr.bf16.mxu0 %v6593_v53  ;;  %3982 = vmatprep.mubr.bf16.mxu1 %v6593_v53 }
 0x2a4   : > { %4036 = vmatpush1.bf16.msra.mxu0 %v5946_v17  ;;  %5047 = vmatpush3.bf16.msra.mxu1 %v5973_v26  ;;  %v5993_v17 = vld [vmem:[#allocation4 + $0x590] ss:$28 sps:$4 sm:$0xff]  }
 0x2a5   : > { %4037 = vmatprep.subr.bf16.mxu0 %v5952_v6  ;;  %5048 = vmatprep.subr.bf16.mxu1 %v5977_v0  ;;  %v5997_v26 = vld [vmem:[#allocation4 + $0x3d0] ss:$28 sps:$4 sm:$0xff]   ;;  %v6001_v6 = vld [vmem:[#allocation4 + $0x5c8] ss:$28 sps:$4 sm:$0xff]  }
 0x2a6   : > { %v5996_v0 = vld [vmem:[#allocation4 + $0x404] ss:$28 sps:$4 sm:$0xff]  }
 0x2a8   : > { %4038 = vmatpush1.bf16.msra.mxu0 %v5950_v24  ;;  %5049 = vmatpush3.bf16.msra.mxu1 %v5981_v3  ;;  %v5994_v24 = vld [vmem:[#allocation4 + $0x400] ss:$28 sps:$4 sm:$0xff]  }
 0x2a9   : > { %4039 = vmatprep.subr.bf16.mxu0 %v5956_v52  ;;  %5098 = vmatprep.subr.bf16.mxu1 %v5985_v31  ;;  %v6000_v3 = vld [vmem:[#allocation4 + $0x43c] ss:$28 sps:$4 sm:$0xff]   ;;  %v6005_v52 = vld [vmem:[#allocation4 + $0x408] ss:$28 sps:$4 sm:$0xff]   ;;  %v6004_v31 = vld [vmem:[#allocation4 + $0x474] ss:$28 sps:$4 sm:$0xff]  }
 0x2aa   : > { %3757 = vmatmul.mubr.bf16.gmra.mrb[80].mxu0 %v6589_v50  ;;  %3983 = vmatmul.mubr.bf16.gmra.mrb[80].mxu1 %v6589_v50 }
 0x2ab   : > { %3766 = vmatprep.mubr.bf16.mxu0 %v6613_v54  ;;  %3992 = vmatprep.mubr.bf16.mxu1 %v6613_v54 }
 0x2ac   : > { %4040 = vmatpush1.bf16.msra.mxu0 %v5954_v28  ;;  %v6013_v28 = vld [vmem:[#allocation4 + $0x440] ss:$28 sps:$4 sm:$0xff]  }
 0x2ad   : > { %4041 = vmatprep.subr.bf16.mxu0 %v5960_v25  ;;  %v6017_v25 = vld [vmem:[#allocation4 + $0x638] ss:$28 sps:$4 sm:$0xff]  }
 0x2b0   : > { %4042 = vmatpush1.bf16.msra.mxu0 %v5958_v32  ;;  %v6002_v32 = vld [vmem:[#allocation4 + $0x470] ss:$28 sps:$4 sm:$0xff]  }
 0x2b1   : > { %4043 = vmatprep.subr.bf16.mxu0 %v5964_v36  ;;  %v6008_v36 = vld [vmem:[#allocation4 + $0x4ac] ss:$28 sps:$4 sm:$0xff]  }
 0x2b2   : > { %3767 = vmatmul.mubr.bf16.gmra.mrb[84].mxu0 %v6609_v40  ;;  %3993 = vmatmul.mubr.bf16.gmra.mrb[84].mxu1 %v6609_v40 }
 0x2b3   : > { %3776 = vmatprep.mubr.bf16.mxu0 %v6633_v60  ;;  %4002 = vmatprep.mubr.bf16.mxu1 %v6633_v60 }
 0x2b4   : > { %4044 = vmatpush1.bf16.msra.mxu0 %v5962_v37  ;;  %v6021_v37 = vld [vmem:[#allocation4 + $0x478] ss:$28 sps:$4 sm:$0xff]  }
 0x2b5   : > { %4045 = vmatprep.subr.bf16.mxu0 %v5968_v49  ;;  %v6012_v49 = vld [vmem:[#allocation4 + $0x4e4] ss:$28 sps:$4 sm:$0xff]  }
 0x2b8   : > { %4046 = vmatpush1.bf16.msra.mxu0 %v5966_v34  ;;  %v6029_v34 = vld [vmem:[#allocation4 + $0x4b0] ss:$28 sps:$4 sm:$0xff]  }
 0x2b9   : > { %4047 = vmatprep.subr.bf16.mxu0 %v5972_v12  ;;  %v6033_v12 = vld [vmem:[#allocation4 + $0x6a8] ss:$28 sps:$4 sm:$0xff]  }
 0x2ba   : > { %3777 = vmatmul.mubr.bf16.gmra.mrb[88].mxu0 %v6629_v45  ;;  %4003 = vmatmul.mubr.bf16.gmra.mrb[88].mxu1 %v6629_v45 }
 0x2bb   : > { %3786 = vmatprep.mubr.bf16.mxu0 %v6653_v63  ;;  %4012 = vmatprep.mubr.bf16.mxu1 %v6653_v63 }
 0x2bc   : > { %4048 = vmatpush1.bf16.msra.mxu0 %v5970_v38  ;;  %v6010_v38 = vld [vmem:[#allocation4 + $0x4e0] ss:$28 sps:$4 sm:$0xff]  }
 0x2bd   : > { %4049 = vmatprep.subr.bf16.mxu0 %v5976_v13  ;;  %v6016_v13 = vld [vmem:[#allocation4 + $0x51c] ss:$28 sps:$4 sm:$0xff]  }
 0x2c0   : > { %4050 = vmatpush1.bf16.msra.mxu0 %v5974_v55  ;;  %v6037_v55 = vld [vmem:[#allocation4 + $0x4e8] ss:$28 sps:$4 sm:$0xff]  }
 0x2c1   : > { %4051 = vmatprep.subr.bf16.mxu0 %v5980_v62  ;;  %v6020_v62 = vld [vmem:[#allocation4 + $0x554] ss:$28 sps:$4 sm:$0xff]  }
 0x2c2   : > { %3787 = vmatmul.mubr.bf16.gmra.mrb[92].mxu0 %v6649_v15  ;;  %4013 = vmatmul.mubr.bf16.gmra.mrb[92].mxu1 %v6649_v15 }
 0x2c3   : > { %4055 = vmatprep.mubr.bf16.mxu0 %v6511_v14  ;;  %4281 = vmatprep.mubr.bf16.mxu1 %v6511_v14  ;;  %v5990_v14 = vld [vmem:[#allocation4 + $0x3c8] ss:$28 sps:$4 sm:$0xff]  }
 0x2c4   : > { %4052 = vmatpush1.bf16.msra.mxu0 %v5978_v61  ;;  %v6045_v61 = vld [vmem:[#allocation4 + $0x520] ss:$28 sps:$4 sm:$0xff]  }
 0x2c5   : > { %4053 = vmatprep.subr.bf16.mxu0 %v5984_v10  ;;  %v6018_v10 = vld [vmem:[#allocation4 + $0x550] ss:$28 sps:$4 sm:$0xff]  }
 0x2c8   : > { %4054 = vmatpush1.bf16.msra.mxu0 %v5982_v2  ;;  %v6024_v2 = vld [vmem:[#allocation4 + $0x58c] ss:$28 sps:$4 sm:$0xff]  }
 0x2c9   : > { %4136 = vmatprep.subr.bf16.mxu0 %v5988_v41  ;;  %v6026_v41 = vld [vmem:[#allocation4 + $0x5c0] ss:$28 sps:$4 sm:$0xff]  }
 0x2ca   : > { %4282 = vmatmul.mubr.bf16.vlgmr.msra.gmra.mrb[96].mxu1 %v6507_v47 }
 0x2cb   : > { %4056 = vmatmul.mubr.bf16.vlgmr.msra.gmra.mrb[96].mxu0 %v6507_v47  ;;  %5099 = vmatpush3.bf16.msra.mxu1 %v5989_v9  ;;  %v6009_v47 = vld [vmem:[#allocation4 + $0x600] ss:$28 sps:$4 sm:$0xff]  }
 0x2cc   : > { %4065 = vmatprep.mubr.bf16.mxu0 %v6531_v22  ;;  %4137 = vmatpush1.bf16.msra.mxu0 %v5986_v29  ;;  %v6032_v9 = vld [vmem:[#allocation4 + $0x5fc] ss:$28 sps:$4 sm:$0xff]   ;;  %v6034_v29 = vld [vmem:[#allocation4 + $0x630] ss:$28 sps:$4 sm:$0xff]  }
 0x2cd   : > { %4289 = vmatprep.mubr.bf16.mxu1 %v6531_v22  ;;  %4138 = vmatprep.subr.bf16.mxu0 %v5992_v5  ;;  %v5998_v22 = vld [vmem:[#allocation4 + $0x438] ss:$28 sps:$4 sm:$0xff]   ;;  %v6040_v5 = vld [vmem:[#allocation4 + $0x66c] ss:$28 sps:$4 sm:$0xff]  }
 0x2ce   : > { %5100 = vmatprep.subr.bf16.mxu1 %v5993_v17  ;;  %v6042_v17 = vld [vmem:[#allocation4 + $0x6a0] ss:$28 sps:$4 sm:$0xff]  }
 0x2cf   : > { %5101 = vmatpush3.bf16.msra.mxu1 %v5997_v26  ;;  %v6048_v26 = vld [vmem:[#allocation4 + $0x6dc] ss:$28 sps:$4 sm:$0xff]  }
 0x2d0   : > { %4139 = vmatpush1.bf16.msra.mxu0 %v5990_v14  ;;  %5102 = vmatprep.subr.bf16.mxu1 %v6001_v6 }
 0x2d1   : > { %4140 = vmatprep.subr.bf16.mxu0 %v5996_v0 }
 0x2d2   : > { %4290 = vmatmul.mubr.bf16.gmra.mrb[100].mxu1 %v6527_v18 }
 0x2d3   : > { %4066 = vmatmul.mubr.bf16.gmra.mrb[100].mxu0 %v6527_v18  ;;  %4297 = vmatprep.mubr.bf16.mxu1 %v6551_v43  ;;  %v6025_v18 = vld [vmem:[#allocation4 + $0x670] ss:$28 sps:$4 sm:$0xff]  }
 0x2d4   : > { %4075 = vmatprep.mubr.bf16.mxu0 %v6551_v43  ;;  %4141 = vmatpush1.bf16.msra.mxu0 %v5994_v24  ;;  %v6006_v43 = vld [vmem:[#allocation4 + $0x4a8] ss:$28 sps:$4 sm:$0xff]  }
 0x2d5   : > { %4142 = vmatprep.subr.bf16.mxu0 %v6000_v3  ;;  %5103 = vmatpush3.bf16.msra.mxu1 %v6005_v52 }
 0x2d6   : > { %5104 = vmatprep.subr.bf16.mxu1 %v6009_v47 }
 0x2d8   : > { %4143 = vmatpush1.bf16.msra.mxu0 %v5998_v22 }
 0x2d9   : > { %4144 = vmatprep.subr.bf16.mxu0 %v6004_v31  ;;  %5105 = vmatpush3.bf16.msra.mxu1 %v6013_v28 }
 0x2da   : > { %4298 = vmatmul.mubr.bf16.gmra.mrb[104].mxu1 %v6547_v4  ;;  %5106 = vmatprep.subr.bf16.mxu1 %v6017_v25 }
 0x2db   : > { %4076 = vmatmul.mubr.bf16.gmra.mrb[104].mxu0 %v6547_v4  ;;  %4305 = vmatprep.mubr.bf16.mxu1 %v6571_v57  ;;  %v6041_v4 = vld [vmem:[#allocation4 + $0x6e0] ss:$28 sps:$4 sm:$0xff]  }
 0x2dc   : > { %4085 = vmatprep.mubr.bf16.mxu0 %v6571_v57  ;;  %4145 = vmatpush1.bf16.msra.mxu0 %v6002_v32  ;;  %v6014_v57 = vld [vmem:[#allocation4 + $0x518] ss:$28 sps:$4 sm:$0xff]  }
 0x2dd   : > { %4146 = vmatprep.subr.bf16.mxu0 %v6008_v36  ;;  %5107 = vmatpush3.bf16.msra.mxu1 %v6021_v37 }
 0x2de   : > { %5108 = vmatprep.subr.bf16.mxu1 %v6025_v18 }
 0x2e0   : > { %4147 = vmatpush1.bf16.msra.mxu0 %v6006_v43 }
 0x2e1   : > { %4148 = vmatprep.subr.bf16.mxu0 %v6012_v49  ;;  %5109 = vmatpush3.bf16.msra.mxu1 %v6029_v34 }
 0x2e2   : > { %4306 = vmatmul.mubr.bf16.gmra.mrb[108].mxu1 %v6567_v1  ;;  %5110 = vmatprep.subr.bf16.mxu1 %v6033_v12 }
 0x2e3   : > { %4086 = vmatmul.mubr.bf16.gmra.mrb[108].mxu0 %v6567_v1  ;;  %4313 = vmatprep.mubr.bf16.mxu1 %v6591_v51  ;;  %v6022_v1 = vld [vmem:[#allocation4 + $0x588] ss:$28 sps:$4 sm:$0xff]  }
 0x2e4   : > { %4095 = vmatprep.mubr.bf16.mxu0 %v6591_v51  ;;  %4149 = vmatpush1.bf16.msra.mxu0 %v6010_v38  ;;  %v6028_v51 = vld [vmem:[#allocation4 + $0x5c4] ss:$28 sps:$4 sm:$0xff]  }
 0x2e5   : > { %4150 = vmatprep.subr.bf16.mxu0 %v6016_v13  ;;  %5111 = vmatpush3.bf16.msra.mxu1 %v6037_v55 }
 0x2e6   : > { %5112 = vmatprep.subr.bf16.mxu1 %v6041_v4 }
 0x2e8   : > { %4151 = vmatpush1.bf16.msra.mxu0 %v6014_v57 }
 0x2e9   : > { %4152 = vmatprep.subr.bf16.mxu0 %v6020_v62  ;;  %5113 = vmatpush3.bf16.msra.mxu1 %v6045_v61 }
 0x2ea   : > { %4314 = vmatmul.mubr.bf16.gmra.mrb[112].mxu1 %v6587_v44 }
 0x2eb   : > { %4096 = vmatmul.mubr.bf16.gmra.mrb[112].mxu0 %v6587_v44  ;;  %4321 = vmatprep.mubr.bf16.mxu1 %v6611_v42  ;;  %v6030_v44 = vld [vmem:[#allocation4 + $0x5f8] ss:$28 sps:$4 sm:$0xff]  }
 0x2ec   : > { %4105 = vmatprep.mubr.bf16.mxu0 %v6611_v42  ;;  %4153 = vmatpush1.bf16.msra.mxu0 %v6018_v10  ;;  %v6036_v42 = vld [vmem:[#allocation4 + $0x634] ss:$28 sps:$4 sm:$0xff]  }
 0x2ed   : > { %4154 = vmatprep.subr.bf16.mxu0 %v6024_v2 }
 0x2f0   : > { %4155 = vmatpush1.bf16.msra.mxu0 %v6022_v1 }
 0x2f1   : > { %4156 = vmatprep.subr.bf16.mxu0 %v6028_v51 }
 0x2f2   : > { %4322 = vmatmul.mubr.bf16.gmra.mrb[116].mxu1 %v6607_v39 }
 0x2f3   : > { %4106 = vmatmul.mubr.bf16.gmra.mrb[116].mxu0 %v6607_v39  ;;  %4329 = vmatprep.mubr.bf16.mxu1 %v6631_v59  ;;  %v6038_v39 = vld [vmem:[#allocation4 + $0x668] ss:$28 sps:$4 sm:$0xff]  }
 0x2f4   : > { %4115 = vmatprep.mubr.bf16.mxu0 %v6631_v59  ;;  %4157 = vmatpush1.bf16.msra.mxu0 %v6026_v41  ;;  %v6044_v59 = vld [vmem:[#allocation4 + $0x6a4] ss:$28 sps:$4 sm:$0xff]  }
 0x2f5   : > { %4158 = vmatprep.subr.bf16.mxu0 %v6032_v9 }
 0x2f8   : > { %4159 = vmatpush1.bf16.msra.mxu0 %v6030_v44 }
 0x2f9   : > { %4160 = vmatprep.subr.bf16.mxu0 %v6036_v42 }
 0x2fa   : > { %4330 = vmatmul.mubr.bf16.gmra.mrb[120].mxu1 %v6627_v11 }
 0x2fb   : > { %4116 = vmatmul.mubr.bf16.gmra.mrb[120].mxu0 %v6627_v11  ;;  %4337 = vmatprep.mubr.bf16.mxu1 %v6651_v16  ;;  %v6046_v11 = vld [vmem:[#allocation4 + $0x6d8] ss:$28 sps:$4 sm:$0xff]  }
 0x2fc   : > { %4125 = vmatprep.mubr.bf16.mxu0 %v6651_v16  ;;  %4161 = vmatpush1.bf16.msra.mxu0 %v6034_v29 }
 0x2fd   : > { %4162 = vmatprep.subr.bf16.mxu0 %v6040_v5 }
 0x300   : > { %4163 = vmatpush1.bf16.msra.mxu0 %v6038_v39 }
 0x301   : > { %4164 = vmatprep.subr.bf16.mxu0 %v6044_v59 }
 0x302   : > { %4338 = vmatmul.mubr.bf16.gmra.mrb[124].mxu1 %v6647_v46 }
 0x303   : > { %4126 = vmatmul.mubr.bf16.gmra.mrb[124].mxu0 %v6647_v46  ;;  %4378 = vmatprep.mubr.bf16.mxu1 %v6513_v48 }
 0x304   : > { %4165 = vmatpush1.bf16.msra.mxu0 %v6042_v17  ;;  %4168 = vmatprep.mubr.bf16.mxu0 %v6513_v48 }
 0x305   : > { %4166 = vmatprep.subr.bf16.mxu0 %v6048_v26 }
 0x308   : > { %4167 = vmatpush1.bf16.msra.mxu0 %v6046_v11 }
 0x30a   : > { %4379 = vmatmul.mubr.bf16.vlgmr.msra.gmra.mrb[128].mxu1 %v6509_v30 }
 0x30b   : > { %4169 = vmatmul.mubr.bf16.vlgmr.msra.gmra.mrb[96].mxu0 %v6509_v30  ;;  %4386 = vmatprep.mubr.bf16.mxu1 %v6533_v27  ;;  %v6758_v30 = vld [vmem:[%s7069_s6] sm:$0xff] }
 0x30c   : > { %4178 = vmatprep.mubr.bf16.mxu0 %v6533_v27  ;;  %v6763_v48 = vrot.slane %v6758_v30, %v6330_v21  ;;  %v6771_v27 = vrot.slane %v6758_v30, %v6336_v23 }
 0x312   : > { %4387 = vmatmul.mubr.bf16.gmra.mrb[132].mxu1 %v6529_v19 }
 0x313   : > { %4179 = vmatmul.mubr.bf16.gmra.mrb[100].mxu0 %v6529_v19  ;;  %4394 = vmatprep.mubr.bf16.mxu1 %v6553_v8  ;;  %v6767_v19 = vrot.slane %v6758_v30, %v6348_v33 }
 0x314   : > { %4188 = vmatprep.mubr.bf16.mxu0 %v6553_v8 }
 0x31a   : > { %4395 = vmatmul.mubr.bf16.gmra.mrb[136].mxu1 %v6549_v7 }
 0x31b   : > { %4189 = vmatmul.mubr.bf16.gmra.mrb[104].mxu0 %v6549_v7  ;;  %4402 = vmatprep.mubr.bf16.mxu1 %v6573_v58  ;;  %v6775_v7 = vrot.slane %v6758_v30, %v6352_v35 }
 0x31c   : > { %4198 = vmatprep.mubr.bf16.mxu0 %v6573_v58 }
 0x322   : > { %4403 = vmatmul.mubr.bf16.gmra.mrb[140].mxu1 %v6569_v56 }
 0x323   : > { %4199 = vmatmul.mubr.bf16.gmra.mrb[108].mxu0 %v6569_v56  ;;  %4410 = vmatprep.mubr.bf16.mxu1 %v6593_v53 }
 0x324   : > { %4208 = vmatprep.mubr.bf16.mxu0 %v6593_v53 }
 0x32a   : > { %4411 = vmatmul.mubr.bf16.gmra.mrb[144].mxu1 %v6589_v50 }
 0x32b   : > { %4209 = vmatmul.mubr.bf16.gmra.mrb[112].mxu0 %v6589_v50  ;;  %4418 = vmatprep.mubr.bf16.mxu1 %v6613_v54 }
 0x32c   : > { %4218 = vmatprep.mubr.bf16.mxu0 %v6613_v54 }
 0x332   : > { %4419 = vmatmul.mubr.bf16.gmra.mrb[148].mxu1 %v6609_v40 }
 0x333   : > { %4219 = vmatmul.mubr.bf16.gmra.mrb[116].mxu0 %v6609_v40  ;;  %4426 = vmatprep.mubr.bf16.mxu1 %v6633_v60 }
 0x334   : > { %4228 = vmatprep.mubr.bf16.mxu0 %v6633_v60 }
 0x33a   : > { %4427 = vmatmul.mubr.bf16.gmra.mrb[152].mxu1 %v6629_v45 }
 0x33b   : > { %4229 = vmatmul.mubr.bf16.gmra.mrb[120].mxu0 %v6629_v45  ;;  %4434 = vmatprep.mubr.bf16.mxu1 %v6653_v63 }
 0x33c   : > { %4238 = vmatprep.mubr.bf16.mxu0 %v6653_v63 }
 0x342   : > { %4435 = vmatmul.mubr.bf16.gmra.mrb[156].mxu1 %v6649_v15 }
 0x343   : > { %4239 = vmatmul.mubr.bf16.gmra.mrb[124].mxu0 %v6649_v15 }
 0x35d   : > { %v3718_v21 = vpop.f32.mrb[64].mxu0  ;;  %v3944_v8 = vpop.f32.mrb[64].mxu1 }
 0x35e   : > { %v5226_v33 = vadd.f32 %v3718_v21, %v6763_v48  ;;  %v5258_v23 = vadd.f32 %v3944_v8, %v6767_v19  ;;  %v3720_v56 = vpop.f32.mrb[65].mxu0  ;;  %v3946_v58 = vpop.f32.mrb[65].mxu1 }
 0x35f   : > { %v5227_v35 = vadd.f32 %v3720_v56, %v6771_v27  ;;  %v5259_v50 = vadd.f32 %v3946_v58, %v6775_v7  ;;  %v3722_v53 = vpop.f32.mrb[66].mxu0  ;;  %v3948_v40 = vpop.f32.mrb[66].mxu1 }
 0x360   : > { %4443 = vst [vmem:[%s6780_s9] sm:$0xff] %v5226_v33  ;;  %4445 = vst [vmem:[%s6780_s9 + $0x10] sm:$0xff] %v5258_v23  ;;  %v5228_v54 = vadd.f32 %v3722_v53, %v6763_v48  ;;  %v5260_v45 = vadd.f32 %v3948_v40, %v6767_v19  ;;  %v3724_v60 = vpop.f32.mrb[67].mxu0  ;;  %v3950_v46 = vpop.f32.mrb[67].mxu1 }
 0x361   : > { %4444 = vst [vmem:[%s6780_s9 + $0x8] sm:$0xff] %v5227_v35  ;;  %4446 = vst [vmem:[%s6780_s9 + $0x18] sm:$0xff] %v5259_v50  ;;  %v5229_v15 = vadd.f32 %v3724_v60, %v6771_v27  ;;  %v5261_v16 = vadd.f32 %v3950_v46, %v6775_v7 }
 0x362   : > { %4450 = vst [vmem:[%s6780_s9 + $0x38] sm:$0xff] %v5228_v54  ;;  %4452 = vst [vmem:[%s6780_s9 + $0x48] sm:$0xff] %v5260_v45 }
 0x363   : > { %4451 = vst [vmem:[%s6780_s9 + $0x40] sm:$0xff] %v5229_v15  ;;  %4453 = vst [vmem:[%s6780_s9 + $0x50] sm:$0xff] %v5261_v16 }
 0x365   : > { %v3728_v63 = vpop.f32.mrb[68].mxu0  ;;  %v3954_v14 = vpop.f32.mrb[68].mxu1 }
 0x366   : > { %v5230_v6 = vadd.f32 %v3728_v63, %v6763_v48  ;;  %v5262_v0 = vadd.f32 %v3954_v14, %v6767_v19  ;;  %v3730_v24 = vpop.f32.mrb[69].mxu0  ;;  %v3956_v3 = vpop.f32.mrb[69].mxu1 }
 0x367   : > { %v5231_v52 = vadd.f32 %v3730_v24, %v6771_v27  ;;  %v5263_v47 = vadd.f32 %v3956_v3, %v6775_v7  ;;  %v3732_v22 = vpop.f32.mrb[70].mxu0  ;;  %v3958_v31 = vpop.f32.mrb[70].mxu1 }
 0x368   : > { %4457 = vst [vmem:[%s6780_s9 + $0x70] sm:$0xff] %v5230_v6  ;;  %4459 = vst [vmem:[%s6780_s9 + $0x80] sm:$0xff] %v5262_v0  ;;  %v5232_v28 = vadd.f32 %v3732_v22, %v6763_v48  ;;  %v5264_v25 = vadd.f32 %v3958_v31, %v6767_v19  ;;  %v3734_v32 = vpop.f32.mrb[71].mxu0  ;;  %v3960_v36 = vpop.f32.mrb[71].mxu1 }
 0x369   : > { %4458 = vst [vmem:[%s6780_s9 + $0x78] sm:$0xff] %v5231_v52  ;;  %4460 = vst [vmem:[%s6780_s9 + $0x88] sm:$0xff] %v5263_v47  ;;  %v5233_v37 = vadd.f32 %v3734_v32, %v6771_v27  ;;  %v5265_v18 = vadd.f32 %v3960_v36, %v6775_v7 }
 0x36a   : > { %4464 = vst [vmem:[%s6780_s9 + $0xa8] sm:$0xff] %v5232_v28  ;;  %4466 = vst [vmem:[%s6780_s9 + $0xb8] sm:$0xff] %v5264_v25 }
 0x36b   : > { %4465 = vst [vmem:[%s6780_s9 + $0xb0] sm:$0xff] %v5233_v37  ;;  %4467 = vst [vmem:[%s6780_s9 + $0xc0] sm:$0xff] %v5265_v18 }
 0x36d   : > { %v3738_v43 = vpop.f32.mrb[72].mxu0  ;;  %v3964_v49 = vpop.f32.mrb[72].mxu1 }
 0x36e   : > { %v5234_v34 = vadd.f32 %v3738_v43, %v6763_v48  ;;  %v5266_v12 = vadd.f32 %v3964_v49, %v6767_v19  ;;  %v3740_v38 = vpop.f32.mrb[73].mxu0  ;;  %v3966_v13 = vpop.f32.mrb[73].mxu1 }
 0x36f   : > { %v5235_v55 = vadd.f32 %v3740_v38, %v6771_v27  ;;  %v5267_v4 = vadd.f32 %v3966_v13, %v6775_v7  ;;  %v3742_v57 = vpop.f32.mrb[74].mxu0  ;;  %v3968_v62 = vpop.f32.mrb[74].mxu1 }
 0x370   : > { %4471 = vst [vmem:[%s6780_s9 + $0xe0] sm:$0xff] %v5234_v34  ;;  %4473 = vst [vmem:[%s6780_s9 + $0xf0] sm:$0xff] %v5266_v12  ;;  %v5236_v61 = vadd.f32 %v3742_v57, %v6763_v48  ;;  %v5268_v10 = vadd.f32 %v3968_v62, %v6767_v19  ;;  %v3744_v2 = vpop.f32.mrb[75].mxu0  ;;  %v3970_v1 = vpop.f32.mrb[75].mxu1 }
 0x371   : > { %4472 = vst [vmem:[%s6780_s9 + $0xe8] sm:$0xff] %v5235_v55  ;;  %4474 = vst [vmem:[%s6780_s9 + $0xf8] sm:$0xff] %v5267_v4  ;;  %v5237_v51 = vadd.f32 %v3744_v2, %v6771_v27  ;;  %v5269_v41 = vadd.f32 %v3970_v1, %v6775_v7 }
 0x372   : > { %4478 = vst [vmem:[%s6780_s9 + $0x118] sm:$0xff] %v5236_v61  ;;  %4480 = vst [vmem:[%s6780_s9 + $0x128] sm:$0xff] %v5268_v10 }
 0x373   : > { %4479 = vst [vmem:[%s6780_s9 + $0x120] sm:$0xff] %v5237_v51  ;;  %4481 = vst [vmem:[%s6780_s9 + $0x130] sm:$0xff] %v5269_v41 }
 0x375   : > { %v3748_v9 = vpop.f32.mrb[76].mxu0  ;;  %v3974_v44 = vpop.f32.mrb[76].mxu1 }
 0x376   : > { %v5238_v42 = vadd.f32 %v3748_v9, %v6763_v48  ;;  %v5270_v29 = vadd.f32 %v3974_v44, %v6767_v19  ;;  %v3750_v5 = vpop.f32.mrb[77].mxu0  ;;  %v3976_v39 = vpop.f32.mrb[77].mxu1 }
 0x377   : > { %v5239_v59 = vadd.f32 %v3750_v5, %v6771_v27  ;;  %v5271_v17 = vadd.f32 %v3976_v39, %v6775_v7  ;;  %v3752_v26 = vpop.f32.mrb[78].mxu0  ;;  %v3978_v11 = vpop.f32.mrb[78].mxu1 }
 0x378   : > { %4485 = vst [vmem:[%s6780_s9 + $0x150] sm:$0xff] %v5238_v42  ;;  %4487 = vst [vmem:[%s6780_s9 + $0x160] sm:$0xff] %v5270_v29  ;;  %v5240_v21 = vadd.f32 %v3752_v26, %v6763_v48  ;;  %v5272_v8 = vadd.f32 %v3978_v11, %v6767_v19  ;;  %v3754_v33 = vpop.f32.mrb[79].mxu0  ;;  %v3980_v23 = vpop.f32.mrb[79].mxu1 }
 0x379   : > { %4486 = vst [vmem:[%s6780_s9 + $0x158] sm:$0xff] %v5239_v59  ;;  %4488 = vst [vmem:[%s6780_s9 + $0x168] sm:$0xff] %v5271_v17  ;;  %v5241_v56 = vadd.f32 %v3754_v33, %v6771_v27  ;;  %v5273_v58 = vadd.f32 %v3980_v23, %v6775_v7 }
 0x37a   : > { %4492 = vst [vmem:[%s6780_s9 + $0x188] sm:$0xff] %v5240_v21  ;;  %4494 = vst [vmem:[%s6780_s9 + $0x198] sm:$0xff] %v5272_v8 }
 0x37b   : > { %4493 = vst [vmem:[%s6780_s9 + $0x190] sm:$0xff] %v5241_v56  ;;  %4495 = vst [vmem:[%s6780_s9 + $0x1a0] sm:$0xff] %v5273_v58 }
 0x37d   : > { %v3758_v35 = vpop.f32.mrb[80].mxu0  ;;  %v3984_v50 = vpop.f32.mrb[80].mxu1 }
 0x37e   : > { %v5242_v53 = vadd.f32 %v3758_v35, %v6763_v48  ;;  %v5274_v40 = vadd.f32 %v3984_v50, %v6767_v19  ;;  %v3760_v54 = vpop.f32.mrb[81].mxu0  ;;  %v3986_v45 = vpop.f32.mrb[81].mxu1 }
 0x37f   : > { %v5243_v60 = vadd.f32 %v3760_v54, %v6771_v27  ;;  %v5275_v46 = vadd.f32 %v3986_v45, %v6775_v7  ;;  %v3762_v15 = vpop.f32.mrb[82].mxu0  ;;  %v3988_v16 = vpop.f32.mrb[82].mxu1 }
 0x380   : > { %4499 = vst [vmem:[%s6780_s9 + $0x1c0] sm:$0xff] %v5242_v53  ;;  %4501 = vst [vmem:[%s6780_s9 + $0x1d0] sm:$0xff] %v5274_v40  ;;  %v5244_v63 = vadd.f32 %v3762_v15, %v6763_v48  ;;  %v5276_v14 = vadd.f32 %v3988_v16, %v6767_v19  ;;  %v3764_v6 = vpop.f32.mrb[83].mxu0  ;;  %v3990_v0 = vpop.f32.mrb[83].mxu1 }
 0x381   : > { %4500 = vst [vmem:[%s6780_s9 + $0x1c8] sm:$0xff] %v5243_v60  ;;  %4502 = vst [vmem:[%s6780_s9 + $0x1d8] sm:$0xff] %v5275_v46  ;;  %v5245_v24 = vadd.f32 %v3764_v6, %v6771_v27  ;;  %v5277_v3 = vadd.f32 %v3990_v0, %v6775_v7 }
 0x382   : > { %4506 = vst [vmem:[%s6780_s9 + $0x1f8] sm:$0xff] %v5244_v63  ;;  %4508 = vst [vmem:[%s6780_s9 + $0x208] sm:$0xff] %v5276_v14 }
 0x383   : > { %4507 = vst [vmem:[%s6780_s9 + $0x200] sm:$0xff] %v5245_v24  ;;  %4509 = vst [vmem:[%s6780_s9 + $0x210] sm:$0xff] %v5277_v3 }
 0x385   : > { %v3768_v52 = vpop.f32.mrb[84].mxu0  ;;  %v3994_v47 = vpop.f32.mrb[84].mxu1 }
 0x386   : > { %v5246_v22 = vadd.f32 %v3768_v52, %v6763_v48  ;;  %v5278_v31 = vadd.f32 %v3994_v47, %v6767_v19  ;;  %v3770_v28 = vpop.f32.mrb[85].mxu0  ;;  %v3996_v25 = vpop.f32.mrb[85].mxu1 }
 0x387   : > { %v5247_v32 = vadd.f32 %v3770_v28, %v6771_v27  ;;  %v5279_v36 = vadd.f32 %v3996_v25, %v6775_v7  ;;  %v3772_v37 = vpop.f32.mrb[86].mxu0  ;;  %v3998_v18 = vpop.f32.mrb[86].mxu1 }
 0x388   : > { %4513 = vst [vmem:[%s6780_s9 + $0x230] sm:$0xff] %v5246_v22  ;;  %4515 = vst [vmem:[%s6780_s9 + $0x240] sm:$0xff] %v5278_v31  ;;  %v5248_v43 = vadd.f32 %v3772_v37, %v6763_v48  ;;  %v5280_v49 = vadd.f32 %v3998_v18, %v6767_v19  ;;  %v3774_v34 = vpop.f32.mrb[87].mxu0  ;;  %v4000_v12 = vpop.f32.mrb[87].mxu1 }
 0x389   : > { %4514 = vst [vmem:[%s6780_s9 + $0x238] sm:$0xff] %v5247_v32  ;;  %4516 = vst [vmem:[%s6780_s9 + $0x248] sm:$0xff] %v5279_v36  ;;  %v5249_v38 = vadd.f32 %v3774_v34, %v6771_v27  ;;  %v5281_v13 = vadd.f32 %v4000_v12, %v6775_v7 }
 0x38a   : > { %4520 = vst [vmem:[%s6780_s9 + $0x268] sm:$0xff] %v5248_v43  ;;  %4522 = vst [vmem:[%s6780_s9 + $0x278] sm:$0xff] %v5280_v49 }
 0x38b   : > { %4521 = vst [vmem:[%s6780_s9 + $0x270] sm:$0xff] %v5249_v38  ;;  %4523 = vst [vmem:[%s6780_s9 + $0x280] sm:$0xff] %v5281_v13 }
 0x38d   : > { %v3778_v55 = vpop.f32.mrb[88].mxu0  ;;  %v4004_v4 = vpop.f32.mrb[88].mxu1 }
 0x38e   : > { %v5250_v57 = vadd.f32 %v3778_v55, %v6763_v48  ;;  %v5282_v62 = vadd.f32 %v4004_v4, %v6767_v19  ;;  %v3780_v61 = vpop.f32.mrb[89].mxu0  ;;  %v4006_v10 = vpop.f32.mrb[89].mxu1 }
 0x38f   : > { %v5251_v2 = vadd.f32 %v3780_v61, %v6771_v27  ;;  %v5283_v1 = vadd.f32 %v4006_v10, %v6775_v7  ;;  %v3782_v51 = vpop.f32.mrb[90].mxu0  ;;  %v4008_v41 = vpop.f32.mrb[90].mxu1 }
 0x390   : > { %4527 = vst [vmem:[%s6780_s9 + $0x2a0] sm:$0xff] %v5250_v57  ;;  %4529 = vst [vmem:[%s6780_s9 + $0x2b0] sm:$0xff] %v5282_v62  ;;  %v5252_v9 = vadd.f32 %v3782_v51, %v6763_v48  ;;  %v5284_v44 = vadd.f32 %v4008_v41, %v6767_v19  ;;  %v3784_v42 = vpop.f32.mrb[91].mxu0  ;;  %v4010_v29 = vpop.f32.mrb[91].mxu1 }
 0x391   : > { %4528 = vst [vmem:[%s6780_s9 + $0x2a8] sm:$0xff] %v5251_v2  ;;  %4530 = vst [vmem:[%s6780_s9 + $0x2b8] sm:$0xff] %v5283_v1  ;;  %v5253_v5 = vadd.f32 %v3784_v42, %v6771_v27  ;;  %v5285_v39 = vadd.f32 %v4010_v29, %v6775_v7 }
 0x392   : > { %4534 = vst [vmem:[%s6780_s9 + $0x2d8] sm:$0xff] %v5252_v9  ;;  %4536 = vst [vmem:[%s6780_s9 + $0x2e8] sm:$0xff] %v5284_v44 }
 0x393   : > { %4535 = vst [vmem:[%s6780_s9 + $0x2e0] sm:$0xff] %v5253_v5  ;;  %4537 = vst [vmem:[%s6780_s9 + $0x2f0] sm:$0xff] %v5285_v39  ;;  %v2410_v5 = vsub.s32 6, %v6327_v20 }
 0x395   : > { %v3788_v59 = vpop.f32.mrb[92].mxu0  ;;  %v4014_v17 = vpop.f32.mrb[92].mxu1 }
 0x396   : > { %v5254_v26 = vadd.f32 %v3788_v59, %v6763_v48  ;;  %v5286_v11 = vadd.f32 %v4014_v17, %v6767_v19  ;;  %v3790_v21 = vpop.f32.mrb[93].mxu0  ;;  %v4016_v8 = vpop.f32.mrb[93].mxu1  ;;  %v2402_v17 = vsub.s32 4, %v6327_v20 }
 0x397   : > { %v5255_v33 = vadd.f32 %v3790_v21, %v6771_v27  ;;  %v5287_v23 = vadd.f32 %v4016_v8, %v6775_v7  ;;  %v3792_v56 = vpop.f32.mrb[94].mxu0  ;;  %v4018_v58 = vpop.f32.mrb[94].mxu1  ;;  %v6942_v8 = vrot.slane %v6758_v30, %v2410_v5 }
 0x398   : > { %4541 = vst [vmem:[%s6780_s9 + $0x310] sm:$0xff] %v5254_v26  ;;  %4543 = vst [vmem:[%s6780_s9 + $0x320] sm:$0xff] %v5286_v11  ;;  %v5256_v35 = vadd.f32 %v3792_v56, %v6763_v48  ;;  %v5288_v50 = vadd.f32 %v4018_v58, %v6767_v19  ;;  %v3794_v53 = vpop.f32.mrb[95].mxu0  ;;  %v4020_v40 = vpop.f32.mrb[95].mxu1  ;;  %v2406_v11 = vsub.s32 5, %v6327_v20 }
 0x399   : > { %4542 = vst [vmem:[%s6780_s9 + $0x318] sm:$0xff] %v5255_v33  ;;  %4544 = vst [vmem:[%s6780_s9 + $0x328] sm:$0xff] %v5287_v23  ;;  %v5257_v54 = vadd.f32 %v3794_v53, %v6771_v27  ;;  %v5289_v45 = vadd.f32 %v4020_v40, %v6775_v7  ;;  %v6945_v33 = vrot.slane %v6758_v30, %v2402_v17 }
 0x39a   : > { %4548 = vst [vmem:[%s6780_s9 + $0x348] sm:$0xff] %v5256_v35  ;;  %4550 = vst [vmem:[%s6780_s9 + $0x358] sm:$0xff] %v5288_v50  ;;  %v6948_v23 = vrot.slane %v6758_v30, %v2406_v11 }
 0x39b   : > { %4549 = vst [vmem:[%s6780_s9 + $0x350] sm:$0xff] %v5257_v54  ;;  %4551 = vst [vmem:[%s6780_s9 + $0x360] sm:$0xff] %v5289_v45 }
 0x39d   : > { %v5050_v60 = vpop.f32.mrb[96].mxu1 }
 0x39e   : > { %v5051_v46 = vpop.f32.mrb[97].mxu1 }
 0x39f   : > { %v5052_v15 = vadd.f32 %v5051_v46, %v5050_v60  ;;  %v5053_v16 = vpop.f32.mrb[98].mxu1 }
 0x3a0   : > { %v5054_v63 = vpop.f32.mrb[99].mxu1 }
 0x3a1   : > { %v5055_v48 = vadd.f32 %v5054_v63, %v5053_v16  ;;  %v4284_v50 = vadd.f32 %v5052_v15, %v6942_v8 }
 0x3a3   : > { %v4287_v46 = vadd.f32 %v5055_v48, %v6942_v8 }
 0x3a5   : > { %v5056_v14 = vpop.f32.mrb[100].mxu1 }
 0x3a6   : > { %v5057_v19 = vpop.f32.mrb[101].mxu1 }
 0x3a7   : > { %v6910_v6 = vadd.f32 %v5057_v19, %v5056_v14  ;;  %v5059_v0 = vpop.f32.mrb[102].mxu1 }
 0x3a8   : > { %v5060_v24 = vpop.f32.mrb[103].mxu1 }
 0x3a9   : > { %v6912_v3 = vadd.f32 %v5060_v24, %v5059_v0  ;;  %v4292_v48 = vadd.f32 %v6910_v6, %v6942_v8 }
 0x3ad   : > { %v5062_v27 = vpop.f32.mrb[104].mxu1 }
 0x3ae   : > { %v5063_v7 = vpop.f32.mrb[105].mxu1 }
 0x3af   : > { %v6914_v52 = vadd.f32 %v5063_v7, %v5062_v27  ;;  %v5065_v47 = vpop.f32.mrb[106].mxu1 }
 0x3b0   : > { %v5066_v22 = vpop.f32.mrb[107].mxu1 }
 0x3b1   : > { %v6916_v31 = vadd.f32 %v5066_v22, %v5065_v47 }
 0x3b5   : > { %v5068_v28 = vpop.f32.mrb[108].mxu1 }
 0x3b6   : > { %v5069_v25 = vpop.f32.mrb[109].mxu1 }
 0x3b7   : > { %v6918_v32 = vadd.f32 %v5069_v25, %v5068_v28  ;;  %v5071_v36 = vpop.f32.mrb[110].mxu1 }
 0x3b8   : > { %v5072_v37 = vpop.f32.mrb[111].mxu1 }
 0x3b9   : > { %v6920_v18 = vadd.f32 %v5072_v37, %v5071_v36 }
 0x3bd   : > { %v5074_v43 = vpop.f32.mrb[112].mxu1 }
 0x3be   : > { %v5075_v49 = vpop.f32.mrb[113].mxu1 }
 0x3bf   : > { %v6922_v34 = vadd.f32 %v5075_v49, %v5074_v43  ;;  %v5077_v12 = vpop.f32.mrb[114].mxu1  ;;  %v4295_v49 = vadd.f32 %v6912_v3, %v6942_v8  ;;  %v4300_v3 = vadd.f32 %v6914_v52, %v6942_v8 }
 0x3c0   : > { %v5078_v38 = vpop.f32.mrb[115].mxu1 }
 0x3c1   : > { %v6924_v13 = vadd.f32 %v5078_v38, %v5077_v12 }
 0x3c5   : > { %v5080_v55 = vpop.f32.mrb[116].mxu1 }
 0x3c6   : > { %v5081_v4 = vpop.f32.mrb[117].mxu1 }
 0x3c7   : > { %v6926_v57 = vadd.f32 %v5081_v4, %v5080_v55  ;;  %v5083_v62 = vpop.f32.mrb[118].mxu1 }
 0x3c8   : > { %v5084_v61 = vpop.f32.mrb[119].mxu1 }
 0x3c9   : > { %v6928_v10 = vadd.f32 %v5084_v61, %v5083_v62 }
 0x3cd   : > { %v5086_v2 = vpop.f32.mrb[120].mxu1 }
 0x3ce   : > { %v5087_v1 = vpop.f32.mrb[121].mxu1 }
 0x3cf   : > { %v6930_v51 = vadd.f32 %v5087_v1, %v5086_v2  ;;  %v5089_v41 = vpop.f32.mrb[122].mxu1 }
 0x3d0   : > { %v5090_v9 = vpop.f32.mrb[123].mxu1 }
 0x3d1   : > { %v6932_v44 = vadd.f32 %v5090_v9, %v5089_v41 }
 0x3d5   : > { %v5092_v42 = vpop.f32.mrb[124].mxu1 }
 0x3d6   : > { %v5093_v29 = vpop.f32.mrb[125].mxu1 }
 0x3d7   : > { %v6935_v39 = vadd.f32 %v5093_v29, %v5092_v42  ;;  %v5095_v59 = vpop.f32.mrb[126].mxu1 }
 0x3d8   : > { %v5096_v26 = vpop.f32.mrb[127].mxu1 }
 0x3d9   : > { %v6939_v21 = vadd.f32 %v5096_v26, %v5095_v59  ;;  %v4303_v26 = vadd.f32 %v6916_v31, %v6942_v8  ;;  %v4308_v31 = vadd.f32 %v6918_v32, %v6942_v8 }
 0x3dd   : > { %v5114_v56 = vpop.f32.mrb[128].mxu1 }
 0x3de   : > { %v4170_v58 = vpop.f32.mrb[96].mxu0  ;;  %v5115_v35 = vpop.f32.mrb[129].mxu1 }
 0x3df   : > { %v5290_v20 = vadd.f32 %v4170_v58, %v6945_v33  ;;  %v4172_v53 = vpop.f32.mrb[97].mxu0  ;;  %v5116_v40 = vadd.f32 %v5115_v35, %v5114_v56  ;;  %v5117_v54 = vpop.f32.mrb[130].mxu1 }
 0x3e0   : > { %v5291_v45 = vadd.f32 %v4172_v53, %v6948_v23  ;;  %v4174_v60 = vpop.f32.mrb[98].mxu0  ;;  %v5118_v30 = vpop.f32.mrb[131].mxu1 }
 0x3e1   : > { %4447 = vst [vmem:[%s6780_s9 + $0x20] sm:$0xff] %v5290_v20  ;;  %v4381_v16 = vadd.f32 %v5116_v40, %v4284_v50  ;;  %v5292_v63 = vadd.f32 %v4174_v60, %v6945_v33  ;;  %v4176_v15 = vpop.f32.mrb[99].mxu0  ;;  %v5119_v14 = vadd.f32 %v5118_v30, %v5117_v54 }
 0x3e2   : > { %4448 = vst [vmem:[%s6780_s9 + $0x28] sm:$0xff] %v5291_v45  ;;  %v5293_v19 = vadd.f32 %v4176_v15, %v6948_v23  ;;  %v4311_v15 = vadd.f32 %v6920_v18, %v6942_v8  ;;  %v4316_v18 = vadd.f32 %v6922_v34, %v6942_v8 }
 0x3e3   : > { %4449 = vst [vmem:[%s6780_s9 + $0x30] sm:$0xff] %v4381_v16  ;;  %4454 = vst [vmem:[%s6780_s9 + $0x58] sm:$0xff] %v5292_v63  ;;  %v4384_v0 = vadd.f32 %v5119_v14, %v4287_v46 }
 0x3e4   : > { %4455 = vst [vmem:[%s6780_s9 + $0x60] sm:$0xff] %v5293_v19 }
 0x3e5   : > { %4456 = vst [vmem:[%s6780_s9 + $0x68] sm:$0xff] %v4384_v0  ;;  %v5120_v24 = vpop.f32.mrb[132].mxu1 }
 0x3e6   : > { %v4180_v27 = vpop.f32.mrb[100].mxu0  ;;  %v5121_v7 = vpop.f32.mrb[133].mxu1 }
 0x3e7   : > { %v5294_v47 = vadd.f32 %v4180_v27, %v6945_v33  ;;  %v4182_v22 = vpop.f32.mrb[101].mxu0  ;;  %v5122_v28 = vadd.f32 %v5121_v7, %v5120_v24  ;;  %v5123_v25 = vpop.f32.mrb[134].mxu1 }
 0x3e8   : > { %v5295_v36 = vadd.f32 %v4182_v22, %v6948_v23  ;;  %v4184_v37 = vpop.f32.mrb[102].mxu0  ;;  %v5124_v43 = vpop.f32.mrb[135].mxu1 }
 0x3e9   : > { %4461 = vst [vmem:[%s6780_s9 + $0x90] sm:$0xff] %v5294_v47  ;;  %v4389_v12 = vadd.f32 %v5122_v28, %v4292_v48  ;;  %v5296_v6 = vadd.f32 %v4184_v37, %v6945_v33  ;;  %v4186_v38 = vpop.f32.mrb[103].mxu0  ;;  %v5125_v55 = vadd.f32 %v5124_v43, %v5123_v25 }
 0x3ea   : > { %4462 = vst [vmem:[%s6780_s9 + $0x98] sm:$0xff] %v5295_v36  ;;  %v5297_v4 = vadd.f32 %v4186_v38, %v6948_v23 }
 0x3eb   : > { %4463 = vst [vmem:[%s6780_s9 + $0xa0] sm:$0xff] %v4389_v12  ;;  %4468 = vst [vmem:[%s6780_s9 + $0xc8] sm:$0xff] %v5296_v6  ;;  %v4392_v62 = vadd.f32 %v5125_v55, %v4295_v49  ;;  %v4319_v12 = vadd.f32 %v6924_v13, %v6942_v8  ;;  %v4324_v13 = vadd.f32 %v6926_v57, %v6942_v8 }
 0x3ec   : > { %4469 = vst [vmem:[%s6780_s9 + $0xd0] sm:$0xff] %v5297_v4 }
 0x3ed   : > { %4470 = vst [vmem:[%s6780_s9 + $0xd8] sm:$0xff] %v4392_v62  ;;  %v5126_v61 = vpop.f32.mrb[136].mxu1 }
 0x3ee   : > { %v4190_v2 = vpop.f32.mrb[104].mxu0  ;;  %v5127_v1 = vpop.f32.mrb[137].mxu1 }
 0x3ef   : > { %v5298_v41 = vadd.f32 %v4190_v2, %v6945_v33  ;;  %v4192_v9 = vpop.f32.mrb[105].mxu0  ;;  %v5128_v42 = vadd.f32 %v5127_v1, %v5126_v61  ;;  %v5129_v29 = vpop.f32.mrb[138].mxu1 }
 0x3f0   : > { %v5299_v5 = vadd.f32 %v4192_v9, %v6948_v23  ;;  %v4194_v59 = vpop.f32.mrb[106].mxu0  ;;  %v5130_v17 = vpop.f32.mrb[139].mxu1 }
 0x3f1   : > { %4475 = vst [vmem:[%s6780_s9 + $0x100] sm:$0xff] %v5298_v41  ;;  %v4397_v11 = vadd.f32 %v5128_v42, %v4300_v3  ;;  %v5300_v52 = vadd.f32 %v4194_v59, %v6945_v33  ;;  %v4196_v56 = vpop.f32.mrb[107].mxu0  ;;  %v5131_v58 = vadd.f32 %v5130_v17, %v5129_v29  ;;  %v4327_v17 = vadd.f32 %v6928_v10, %v6942_v8 }
 0x3f2   : > { %4476 = vst [vmem:[%s6780_s9 + $0x108] sm:$0xff] %v5299_v5  ;;  %v5301_v35 = vadd.f32 %v4196_v56, %v6948_v23  ;;  %v4332_v10 = vadd.f32 %v6930_v51, %v6942_v8 }
 0x3f3   : > { %4477 = vst [vmem:[%s6780_s9 + $0x110] sm:$0xff] %v4397_v11  ;;  %4482 = vst [vmem:[%s6780_s9 + $0x138] sm:$0xff] %v5300_v52  ;;  %v4400_v50 = vadd.f32 %v5131_v58, %v4303_v26 }
 0x3f4   : > { %4483 = vst [vmem:[%s6780_s9 + $0x140] sm:$0xff] %v5301_v35 }
 0x3f5   : > { %4484 = vst [vmem:[%s6780_s9 + $0x148] sm:$0xff] %v4400_v50  ;;  %v5132_v20 = vpop.f32.mrb[140].mxu1 }
 0x3f6   : > { %v4200_v53 = vpop.f32.mrb[108].mxu0  ;;  %v5133_v40 = vpop.f32.mrb[141].mxu1 }
 0x3f7   : > { %v5302_v54 = vadd.f32 %v4200_v53, %v6945_v33  ;;  %v4202_v45 = vpop.f32.mrb[109].mxu0  ;;  %v5134_v60 = vadd.f32 %v5133_v40, %v5132_v20  ;;  %v5135_v30 = vpop.f32.mrb[142].mxu1 }
 0x3f8   : > { %v5303_v46 = vadd.f32 %v4202_v45, %v6948_v23  ;;  %v4204_v16 = vpop.f32.mrb[110].mxu0  ;;  %v5136_v63 = vpop.f32.mrb[143].mxu1 }
 0x3f9   : > { %4489 = vst [vmem:[%s6780_s9 + $0x170] sm:$0xff] %v5302_v54  ;;  %v4405_v14 = vadd.f32 %v5134_v60, %v4308_v31  ;;  %v5304_v32 = vadd.f32 %v4204_v16, %v6945_v33  ;;  %v4206_v19 = vpop.f32.mrb[111].mxu0  ;;  %v5137_v0 = vadd.f32 %v5136_v63, %v5135_v30 }
 0x3fa   : > { %4490 = vst [vmem:[%s6780_s9 + $0x178] sm:$0xff] %v5303_v46  ;;  %v5305_v24 = vadd.f32 %v4206_v19, %v6948_v23  ;;  %v4335_v46 = vadd.f32 %v6932_v44, %v6942_v8  ;;  %v4340_v44 = vadd.f32 %v6935_v39, %v6942_v8 }
 0x3fb   : > { %4491 = vst [vmem:[%s6780_s9 + $0x180] sm:$0xff] %v4405_v14  ;;  %4496 = vst [vmem:[%s6780_s9 + $0x1a8] sm:$0xff] %v5304_v32  ;;  %v4408_v27 = vadd.f32 %v5137_v0, %v4311_v15 }
 0x3fc   : > { %4497 = vst [vmem:[%s6780_s9 + $0x1b0] sm:$0xff] %v5305_v24 }
 0x3fd   : > { %4498 = vst [vmem:[%s6780_s9 + $0x1b8] sm:$0xff] %v4408_v27  ;;  %v5138_v7 = vpop.f32.mrb[144].mxu1 }
 0x3fe   : > { %v4210_v48 = vpop.f32.mrb[112].mxu0  ;;  %v5139_v47 = vpop.f32.mrb[145].mxu1 }
 0x3ff   : > { %v5306_v22 = vadd.f32 %v4210_v48, %v6945_v33  ;;  %v4212_v28 = vpop.f32.mrb[113].mxu0  ;;  %v5140_v25 = vadd.f32 %v5139_v47, %v5138_v7  ;;  %v5141_v36 = vpop.f32.mrb[146].mxu1 }
 0x400   : > { %v5307_v37 = vadd.f32 %v4212_v28, %v6948_v23  ;;  %v4214_v43 = vpop.f32.mrb[114].mxu0  ;;  %v5142_v49 = vpop.f32.mrb[147].mxu1 }
 0x401   : > { %4503 = vst [vmem:[%s6780_s9 + $0x1e0] sm:$0xff] %v5306_v22  ;;  %v4413_v6 = vadd.f32 %v5140_v25, %v4316_v18  ;;  %v5308_v34 = vadd.f32 %v4214_v43, %v6945_v33  ;;  %v4216_v38 = vpop.f32.mrb[115].mxu0  ;;  %v5143_v55 = vadd.f32 %v5142_v49, %v5141_v36  ;;  %v4343_v25 = vadd.f32 %v6939_v21, %v6942_v8 }
 0x402   : > { %4504 = vst [vmem:[%s6780_s9 + $0x1e8] sm:$0xff] %v5307_v37  ;;  %v5309_v4 = vadd.f32 %v4216_v38, %v6948_v23 }
 0x403   : > { %4505 = vst [vmem:[%s6780_s9 + $0x1f0] sm:$0xff] %v4413_v6  ;;  %4510 = vst [vmem:[%s6780_s9 + $0x218] sm:$0xff] %v5308_v34  ;;  %v4416_v62 = vadd.f32 %v5143_v55, %v4319_v12 }
 0x404   : > { %4511 = vst [vmem:[%s6780_s9 + $0x220] sm:$0xff] %v5309_v4 }
 0x405   : > { %4512 = vst [vmem:[%s6780_s9 + $0x228] sm:$0xff] %v4416_v62  ;;  %v5144_v61 = vpop.f32.mrb[148].mxu1 }
 0x406   : > { %v4220_v2 = vpop.f32.mrb[116].mxu0  ;;  %v5145_v1 = vpop.f32.mrb[149].mxu1 }
 0x407   : > { %v5310_v3 = vadd.f32 %v4220_v2, %v6945_v33  ;;  %v4222_v41 = vpop.f32.mrb[117].mxu0  ;;  %v5146_v9 = vadd.f32 %v5145_v1, %v5144_v61  ;;  %v5147_v42 = vpop.f32.mrb[150].mxu1 }
 0x408   : > { %v5311_v29 = vadd.f32 %v4222_v41, %v6948_v23  ;;  %v4224_v5 = vpop.f32.mrb[118].mxu0  ;;  %v5148_v59 = vpop.f32.mrb[151].mxu1 }
 0x409   : > { %4517 = vst [vmem:[%s6780_s9 + $0x250] sm:$0xff] %v5310_v3  ;;  %v4421_v26 = vadd.f32 %v5146_v9, %v4324_v13  ;;  %v5312_v57 = vadd.f32 %v4224_v5, %v6945_v33  ;;  %v4226_v11 = vpop.f32.mrb[119].mxu0  ;;  %v5149_v52 = vadd.f32 %v5148_v59, %v5147_v42 }
 0x40a   : > { %4518 = vst [vmem:[%s6780_s9 + $0x258] sm:$0xff] %v5311_v29  ;;  %v5313_v56 = vadd.f32 %v4226_v11, %v6948_v23 }
 0x40b   : > { %4519 = vst [vmem:[%s6780_s9 + $0x260] sm:$0xff] %v4421_v26  ;;  %4524 = vst [vmem:[%s6780_s9 + $0x288] sm:$0xff] %v5312_v57  ;;  %v4424_v58 = vadd.f32 %v5149_v52, %v4327_v17 }
 0x40c   : > { %4525 = vst [vmem:[%s6780_s9 + $0x290] sm:$0xff] %v5313_v56 }
 0x40d   : > { %4526 = vst [vmem:[%s6780_s9 + $0x298] sm:$0xff] %v4424_v58  ;;  %v5150_v35 = vpop.f32.mrb[152].mxu1 }
 0x40e   : > { %v4230_v50 = vpop.f32.mrb[120].mxu0  ;;  %v5151_v20 = vpop.f32.mrb[153].mxu1 }
 0x40f   : > { %v5314_v53 = vadd.f32 %v4230_v50, %v6945_v33  ;;  %v4232_v40 = vpop.f32.mrb[121].mxu0  ;;  %v5152_v31 = vadd.f32 %v5151_v20, %v5150_v35  ;;  %v5153_v54 = vpop.f32.mrb[154].mxu1 }
 0x410   : > { %v5315_v45 = vadd.f32 %v4232_v40, %v6948_v23  ;;  %v4234_v60 = vpop.f32.mrb[122].mxu0  ;;  %v5154_v30 = vpop.f32.mrb[155].mxu1 }
 0x411   : > { %4531 = vst [vmem:[%s6780_s9 + $0x2c0] sm:$0xff] %v5314_v53  ;;  %v4429_v16 = vadd.f32 %v5152_v31, %v4332_v10  ;;  %v5316_v51 = vadd.f32 %v4234_v60, %v6945_v33  ;;  %v4236_v63 = vpop.f32.mrb[123].mxu0  ;;  %v5155_v15 = vadd.f32 %v5154_v30, %v5153_v54 }
 0x412   : > { %4532 = vst [vmem:[%s6780_s9 + $0x2c8] sm:$0xff] %v5315_v45  ;;  %v5317_v14 = vadd.f32 %v4236_v63, %v6948_v23 }
 0x413   : > { %4533 = vst [vmem:[%s6780_s9 + $0x2d0] sm:$0xff] %v4429_v16  ;;  %4538 = vst [vmem:[%s6780_s9 + $0x2f8] sm:$0xff] %v5316_v51  ;;  %v4432_v32 = vadd.f32 %v5155_v15, %v4335_v46 }
 0x414   : > { %4539 = vst [vmem:[%s6780_s9 + $0x300] sm:$0xff] %v5317_v14 }
 0x415   : > { %4540 = vst [vmem:[%s6780_s9 + $0x308] sm:$0xff] %v4432_v32  ;;  %v5156_v19 = vpop.f32.mrb[156].mxu1 }
 0x416   : > { %v4240_v0 = vpop.f32.mrb[124].mxu0  ;;  %v5157_v24 = vpop.f32.mrb[157].mxu1 }
 0x417   : > { %v5318_v27 = vadd.f32 %v4240_v0, %v6945_v33  ;;  %v4242_v7 = vpop.f32.mrb[125].mxu0  ;;  %v5158_v48 = vadd.f32 %v5157_v24, %v5156_v19  ;;  %v5159_v47 = vpop.f32.mrb[158].mxu1 }
 0x418   : > { %v5319_v18 = vadd.f32 %v4242_v7, %v6948_v23  ;;  %v4244_v22 = vpop.f32.mrb[126].mxu0  ;;  %v5160_v28 = vpop.f32.mrb[159].mxu1 }
 0x419   : > { %4545 = vst [vmem:[%s6780_s9 + $0x330] sm:$0xff] %v5318_v27  ;;  %v4437_v36 = vadd.f32 %v5158_v48, %v4340_v44  ;;  %v5320_v39 = vadd.f32 %v4244_v22, %v6945_v33  ;;  %v4246_v37 = vpop.f32.mrb[127].mxu0  ;;  %v5161_v43 = vadd.f32 %v5160_v28, %v5159_v47 }
 0x41a   : > { %4546 = vst [vmem:[%s6780_s9 + $0x338] sm:$0xff] %v5319_v18  ;;  %v5321_v49 = vadd.f32 %v4246_v37, %v6948_v23 }
 0x41b   : > { %4547 = vst [vmem:[%s6780_s9 + $0x340] sm:$0xff] %v4437_v36  ;;  %4552 = vst [vmem:[%s6780_s9 + $0x368] sm:$0xff] %v5320_v39  ;;  %v4440_v12 = vadd.f32 %v5161_v43, %v4343_v25 }
 0x41c   : > { %4553 = vst [vmem:[%s6780_s9 + $0x370] sm:$0xff] %v5321_v49 }
 0x41d   : > { %4554 = vst [vmem:[%s6780_s9 + $0x378] sm:$0xff] %v4440_v12 }
 0x41e PF: > { %s19_s24 = sadd.s32 1, %s6119_s24  }
 0x41f   : > { %p16_p2 = scmp.ge.s32.totalorder %s19_s24, 4  }
 0x421   :  { %18 = sbr.rel (!%p16_p2) target bundleno = 2 (0x2), region = 87 }
 0x428   :  { %4579 = vsyncpa [#allocation3], 1 }
 0x429   :  { %4581 = vsyncpa [#allocation3 + $0x1], 1 }
 0x42a   :  { %4582 = vsyncpa [#allocation5], 1 }

</bundles_post_ra>
